<compile_context>
chip_gen: v5e
topology: v5e:2x2
jax: 0.10.0
libtpu: 0.0.40
codegen_flags: <defaults>
</compile_context>

<pallas_src>
import jax
import jax.numpy as jnp
from jax import lax
from jax.experimental import pallas as pl
from jax.experimental.pallas import tpu as pltpu


# ---------------------- generation-aware VMEM configuration ------------------

_VMEM_CFG = None
_SB_OK = None


def _vmem_config():
    """(scoped_vmem_limit, buffer_budget) derived from the chip's physical VMEM."""
    global _VMEM_CFG
    if _VMEM_CFG is None:
        try:
            cap = int(pltpu.get_tpu_info().vmem_capacity_bytes)
        except Exception:
            cap = 64 * 1024 * 1024                      # conservative (v7x-sized) fallback
        limit = min((cap * 3) // 4, 100 * 1024 * 1024)  # ~48 MiB on v7x, ~96-100 MiB on v5e/v6e
        budget = min(cap // 2, 64 * 1024 * 1024)        # ~32 MiB on v7x, ~64 MiB on v5e/v6e
        _VMEM_CFG = (limit, budget)
    return _VMEM_CFG


def _probe_copy_kernel(x_ref, o_ref):
    o_ref[...] = x_ref[...]


def _single_buffering_supported():
    """Probe once whether BlockSpec(pipeline_mode=pl.Buffered(1)) compiles on this install."""
    global _SB_OK
    if _SB_OK is None:
        try:
            spec = pl.BlockSpec((8, 128), lambda i: (0, 0), pipeline_mode=pl.Buffered(1))
            out = pl.pallas_call(
                _probe_copy_kernel,
                out_shape=jax.ShapeDtypeStruct((16, 128), jnp.float32),
                grid=(2,),
                in_specs=[spec],
                out_specs=pl.BlockSpec((8, 128), lambda i: (i, 0)),
            )(jnp.zeros((8, 128), jnp.float32))
            jax.block_until_ready(out)
            _SB_OK = True
        except Exception:
            _SB_OK = False
    return _SB_OK


def _inv_spec(block_shape, index_map):
    """BlockSpec for a grid-invariant operand: single-buffered when supported."""
    if _single_buffering_supported():
        return pl.BlockSpec(block_shape, index_map, pipeline_mode=pl.Buffered(1))
    return pl.BlockSpec(block_shape, index_map)


def _pick_row_tile(m, row_bytes, fixed_bytes, budget, max_tm=1024, min_tm=128):
    """Largest power-of-two row tile whose double-buffered streamed operands plus the
    grid-invariant operands fit the VMEM budget, preferring >=2 grid steps (pipelining,
    megacore sharding) and an even / large step count (v7x two-TensorCore balance)."""
    cands = []
    tm = max_tm
    while tm >= min_tm:
        if fixed_bytes + 2 * tm * row_bytes <= budget:
            cands.append(tm)
        tm //= 2
    if not cands:
        cands = [min_tm]

    def pref(t):
        steps = pl.cdiv(m, t)
        return (steps >= 2, (steps % 2 == 0) or (steps >= 8), t)

    return max(cands, key=pref)


# ----------------------------- Pallas kernels -------------------------------


def _make_offsets_conv_kernel(ksize, dilation, out_w, mask_start, mask_end):
    """Fused td+bt conv_offset (plain KxK conv) with in-kernel tap construction.

    refs = [row_0, ..., row_{K-1}, w_ref, b_ref, o_ref]
      row_i : (1, 1, Wp, C)  bf16  padded input row h + i*dilation of image n
      w_ref : (K, K, C, Nc)  bf16  conv_offset weight, tap-major, output channels on lanes
      b_ref : (1, Nc)        f32   bias
      o_ref : (1, 1, W, Nc)  f32   conv output for output row h; the mask-logit lane
                                   range [mask_start, mask_end) has sigmoid applied.
    """

    def kernel(*refs):
        row_refs = refs[:ksize]
        w_ref = refs[ksize]
        b_ref = refs[ksize + 1]
        o_ref = refs[ksize + 2]

        acc = None
        for i in range(ksize):
            for j in range(ksize):
                tap = row_refs[i][0, 0, j * dilation: j * dilation + out_w, :]   # (W, C)
                part = jnp.dot(tap, w_ref[i, j], preferred_element_type=jnp.float32)
                acc = part if acc is None else acc + part
        z = acc + b_ref[...]                                                     # (W, Nc)

        # fold the DCNv2 mask-logit sigmoid (exact, single EUP tanh) into this kernel
        lane = lax.broadcasted_iota(jnp.int32, z.shape, 1)
        sig = 0.5 + 0.5 * jnp.tanh(0.5 * z)
        z = jnp.where((lane >= mask_start) & (lane < mask_end), sig, z)
        o_ref[0, 0, :, :] = z

    return kernel


def _dual_head_kernel(p_td_ref, p_bt_ref, w_td_ref, w_bt_ref,
                      st_td_ref, st_bt_ref, x_ref, y_ref, ex_ref, ey_ref):
    """Fused td/bt DCN heads: (deform patches @ weight) -> folded BN -> exact sigmoid
    (tanh form) -> weighted path aggregation, sharing one read of x / y and one (x-y)."""
    x = x_ref[...]
    y = y_ref[...]
    d = x - y

    z_td = (jnp.dot(p_td_ref[...], w_td_ref[...], preferred_element_type=jnp.float32)
            * st_td_ref[0:1, :] + st_td_ref[1:2, :])
    g_td = 0.5 + 0.5 * jnp.tanh(0.5 * z_td)                 # exact sigmoid, single EUP op
    ex_ref[...] = (y + g_td * d).astype(ex_ref.dtype)

    z_bt = (jnp.dot(p_bt_ref[...], w_bt_ref[...], preferred_element_type=jnp.float32)
            * st_bt_ref[0:1, :] + st_bt_ref[1:2, :])
    g_bt = 0.5 + 0.5 * jnp.tanh(0.5 * z_bt)
    ey_ref[...] = (y + g_bt * d).astype(ey_ref.dtype)


# ------------------------------ Pallas wrappers ------------------------------


def pallas_offsets_conv(base_p, w4, b2, out_h, out_w, ksize, dilation,
                        mask_start, mask_end):
    """Fused td+bt conv_offset over the spatially pre-padded bf16 base.

    base_p : (N, Hp, Wp, C) bf16, w4 : (K, K, C, Nc) bf16, b2 : (1, Nc) f32.
    Returns (N, H, W, Nc) f32 with sigmoid already applied on the mask lane range.
    The KxK taps are built in-kernel from K shifted row views of base_p, so the
    9x-expanded im2col slab is never written to HBM.
    """
    N, Hp, Wp, C = base_p.shape
    Nc = w4.shape[-1]
    vmem_limit, _ = _vmem_config()

    kernel = _make_offsets_conv_kernel(ksize, dilation, out_w, mask_start, mask_end)
    row_specs = [
        pl.BlockSpec((1, 1, Wp, C), (lambda n, h, i=i: (n, h + i * dilation, 0, 0)))
        for i in range(ksize)
    ]
    return pl.pallas_call(
        kernel,
        out_shape=jax.ShapeDtypeStruct((N, out_h, out_w, Nc), jnp.float32),
        grid=(N, out_h),
        in_specs=row_specs + [
            _inv_spec((ksize, ksize, C, Nc), lambda n, h: (0, 0, 0, 0)),
            _inv_spec((1, Nc), lambda n, h: (0, 0)),
        ],
        out_specs=pl.BlockSpec((1, 1, out_w, Nc), lambda n, h: (n, h, 0, 0)),
        compiler_params=pltpu.CompilerParams(
            dimension_semantics=("parallel", "parallel"),
            vmem_limit_bytes=vmem_limit),
    )(*([base_p] * ksize), w4, b2)


def pallas_dual_head(p_td, p_bt, w_td, w_bt, st_td, st_bt, x2d, y2d):
    """Fused td/bt DCN heads producing enhanced_x and enhanced_y in one pass over x/y.
    No row padding: grid = cdiv(M, tm), the partial last block is masked by Pallas."""
    M, K = p_td.shape
    C = w_td.shape[1]
    vmem_limit, budget = _vmem_config()

    row_bytes = 2 * K * p_td.dtype.itemsize + 4 * C * 4         # p_td, p_bt, x, y, ex, ey
    fixed_bytes = 2 * K * C * w_td.dtype.itemsize + 2 * 2 * C * 4   # single-buffered invariants
    tm = _pick_row_tile(M, row_bytes, fixed_bytes, budget)

    ex, ey = pl.pallas_call(
        _dual_head_kernel,
        out_shape=(jax.ShapeDtypeStruct((M, C), jnp.float32),
                   jax.ShapeDtypeStruct((M, C), jnp.float32)),
        grid=(pl.cdiv(M, tm),),
        in_specs=[
            pl.BlockSpec((tm, K), lambda i: (i, 0)),             # td patches (bf16)
            pl.BlockSpec((tm, K), lambda i: (i, 0)),             # bt patches (bf16)
            _inv_spec((K, C), lambda i: (0, 0)),                 # td weight  (bf16)
            _inv_spec((K, C), lambda i: (0, 0)),                 # bt weight  (bf16)
            _inv_spec((2, C), lambda i: (0, 0)),                 # td BN scale/shift (f32)
            _inv_spec((2, C), lambda i: (0, 0)),                 # bt BN scale/shift (f32)
            pl.BlockSpec((tm, C), lambda i: (i, 0)),             # x rows (f32)
            pl.BlockSpec((tm, C), lambda i: (i, 0)),             # y rows (f32)
        ],
        out_specs=(pl.BlockSpec((tm, C), lambda i: (i, 0)),
                   pl.BlockSpec((tm, C), lambda i: (i, 0))),
        compiler_params=pltpu.CompilerParams(
            dimension_semantics=("parallel",),
            vmem_limit_bytes=vmem_limit),
    )(p_td, p_bt, w_td, w_bt, st_td, st_bt, x2d, y2d)
    return ex, ey


# ------------------------------ JAX glue ------------------------------------


def dcn_im2col(base, offy, offx, mask, ksize, dilation, pad, dg, dtype=jnp.bfloat16):
    """Modulated deformable im2col: bilinear sampling at offset locations, zero outside,
    per-sample modulation.  offy/offx/mask: (N,H,W,dg,K2).  Returns (N*H*W, C*K2) with
    columns ordered (dg, K2, cpg), in `dtype`.

    Per review: the gather source is bf16 and both the out-of-bounds validity and the
    DCN modulation mask are folded into the four bilinear lerp weights, so XLA fuses
    gather + lerp + modulate into a single pass.
    """
    N, H, W, C = base.shape
    K2 = ksize * ksize
    cpg = C // dg
    HW = H * W

    ki = jnp.arange(ksize)
    ti, tj = jnp.meshgrid(ki, ki, indexing="ij")
    tap_dy = (ti * dilation - pad).reshape(K2).astype(jnp.float32)
    tap_dx = (tj * dilation - pad).reshape(K2).astype(jnp.float32)

    hh = jnp.arange(H, dtype=jnp.float32)[None, :, None, None, None]
    ww = jnp.arange(W, dtype=jnp.float32)[None, None, :, None, None]
    py = hh + tap_dy[None, None, None, None, :] + offy          # (N,H,W,dg,K2)
    px = ww + tap_dx[None, None, None, None, :] + offx

    y0 = jnp.floor(py)
    x0 = jnp.floor(px)
    ly = (py - y0).reshape(N, HW, dg, K2)
    lx = (px - x0).reshape(N, HW, dg, K2)
    y0i = y0.astype(jnp.int32).reshape(N, HW, dg, K2)
    x0i = x0.astype(jnp.int32).reshape(N, HW, dg, K2)
    y1i = y0i + 1
    x1i = x0i + 1
    m = mask.reshape(N, HW, dg, K2)

    # bf16 gather source over the flattened spatial axis (halves gather-side traffic).
    base_flat = base.astype(dtype).reshape(N, HW, dg, 1, cpg)

    # TODO(synk): this per-pixel data-dependent bilinear gather has no clean rectangular
    # BlockSpec equivalent; it stays in plain JAX (XLA gather).  Moving it inside the
    # dual-head kernel (base image resident in VMEM, pl.ANY + manual DMA) would remove
    # the 9x-expanded patch slabs entirely and is the remaining top optimization.
    def weight(yi, xi, w):
        inb = ((yi >= 0) & (yi < H) & (xi >= 0) & (xi < W)).astype(jnp.float32)
        return (w * inb * m)[..., None]                          # validity + mask folded in

    def corner(yi, xi, w):
        idx = jnp.clip(yi, 0, H - 1) * W + jnp.clip(xi, 0, W - 1)
        vals = jnp.take_along_axis(base_flat, idx[..., None], axis=1)   # (N,HW,dg,K2,cpg)
        return w * vals

    samp = (corner(y0i, x0i, weight(y0i, x0i, (1 - ly) * (1 - lx)))
            + corner(y0i, x1i, weight(y0i, x1i, (1 - ly) * lx))
            + corner(y1i, x0i, weight(y1i, x0i, ly * (1 - lx)))
            + corner(y1i, x1i, weight(y1i, x1i, ly * lx)))
    return samp.astype(dtype).reshape(N * HW, C * K2)            # cols = (dg, K2, cpg)


# ----------------------- parameters & module forward -------------------------


def make_params(key, C, ksize, dg):
    K2 = ksize * ksize
    off_out = 3 * dg * K2
    keys = jax.random.split(key, 16)

    def xavier(k, shape):
        fan_in = shape[1] * shape[2] * shape[3]
        fan_out = shape[0] * shape[2] * shape[3]
        a = (6.0 / (fan_in + fan_out)) ** 0.5
        return jax.random.uniform(k, shape, jnp.float32, -a, a)

    params = {}
    for idx, name in enumerate(("td", "bt")):
        b = idx * 8
        params[name] = dict(
            dcn_w=xavier(keys[b + 0], (C, C, ksize, ksize)),
            # mmcv zero-inits conv_offset; small deterministic values are used instead so
            # the deformable sampling path is actually exercised.
            off_w=0.1 * xavier(keys[b + 1], (off_out, C, ksize, ksize)),
            off_b=0.05 * jax.random.normal(keys[b + 2], (off_out,), jnp.float32),
            bn_gamma=1.0 + 0.1 * jax.random.normal(keys[b + 3], (C,), jnp.float32),
            bn_beta=0.1 * jax.random.normal(keys[b + 4], (C,), jnp.float32),
            bn_mean=0.1 * jax.random.normal(keys[b + 5], (C,), jnp.float32),
            bn_var=1.0 + 0.1 * jnp.abs(jax.random.normal(keys[b + 6], (C,), jnp.float32)),
        )
    return params


def weighted_path_aggregation(params, x_nchw, y_nchw, ksize, dilation, dg, bn_eps=1e-5):
    assert x_nchw.shape == y_nchw.shape
    N, C, H, W = x_nchw.shape
    K2 = ksize * ksize
    G = dg * K2
    cpg = C // dg
    pad = (ksize - 1) * dilation // 2
    Hp, Wp = H + 2 * pad, W + 2 * pad

    x = jnp.transpose(x_nchw, (0, 2, 3, 1)).astype(jnp.float32)     # NHWC
    y = jnp.transpose(y_nchw, (0, 2, 3, 1)).astype(jnp.float32)
    base = x + y
    M = N * H * W
    x2d = x.reshape(M, C)
    y2d = y.reshape(M, C)

    # spatially pre-padded bf16 base (~1.3x image bytes instead of the 9x im2col slab)
    base_p = jnp.pad(base, ((0, 0), (pad, pad), (pad, pad), (0, 0))).astype(jnp.bfloat16)

    td, bt = params["td"], params["bt"]

    # Fused + reordered conv_offset weight.  Output-channel (lane) layout:
    #   [td_o1 | td_o2 | bt_o1 | bt_o2 | td_mask | bt_mask | pad]
    # so the mask logits sit in one contiguous lane range for the in-kernel sigmoid.
    w_cat = jnp.concatenate(
        [td["off_w"][:2 * G], bt["off_w"][:2 * G],
         td["off_w"][2 * G:], bt["off_w"][2 * G:]], axis=0)          # (6G, C, K, K)
    b_cat = jnp.concatenate(
        [td["off_b"][:2 * G], bt["off_b"][:2 * G],
         td["off_b"][2 * G:], bt["off_b"][2 * G:]])
    nc = 6 * G
    nc_pad = max(128, pl.cdiv(nc, 128) * 128)
    w_cat = jnp.pad(w_cat, ((0, nc_pad - nc), (0, 0), (0, 0), (0, 0)))
    w4 = jnp.transpose(w_cat, (2, 3, 1, 0)).astype(jnp.bfloat16)     # (K, K, C, nc_pad)
    b2 = jnp.pad(b_cat, (0, nc_pad - nc)).reshape(1, nc_pad).astype(jnp.float32)

    off_all = pallas_offsets_conv(base_p, w4, b2, H, W, ksize, dilation,
                                  mask_start=4 * G, mask_end=6 * G)  # (N,H,W,nc_pad) f32

    def branch_patches(o1, o2, msk):
        # mmcv layout: offset = cat(o1, o2), read per deform group as interleaved (dy, dx)
        off = jnp.concatenate([o1, o2], axis=-1).reshape(N, H, W, dg, K2, 2)
        return dcn_im2col(base, off[..., 0], off[..., 1],
                          msk.reshape(N, H, W, dg, K2),
                          ksize, dilation, pad, dg)                  # (M, C*K2) bf16

    p_td = branch_patches(off_all[..., 0:G], off_all[..., G:2 * G],
                          off_all[..., 4 * G:5 * G])                 # mask already sigmoid'd
    p_bt = branch_patches(off_all[..., 2 * G:3 * G], off_all[..., 3 * G:4 * G],
                          off_all[..., 5 * G:6 * G])

    def head_weight(p):
        # permute weight columns to the gather-native (dg, K2, cpg) row order
        return (p["dcn_w"].reshape(C, dg, cpg, K2).transpose(0, 1, 3, 2)
                .reshape(C, C * K2).T.astype(jnp.bfloat16))          # (C*K2, C)

    def bn_fold(p):
        scale = p["bn_gamma"] / jnp.sqrt(p["bn_var"] + bn_eps)       # inference-mode BN
        shift = p["bn_beta"] - p["bn_mean"] * scale
        return jnp.stack([scale, shift], axis=0)                     # (2, C)

    ex2d, ey2d = pallas_dual_head(p_td, p_bt,
                                  head_weight(td), head_weight(bt),
                                  bn_fold(td), bn_fold(bt),
                                  x2d, y2d)

    enhanced_x = ex2d.reshape(N, H, W, C).transpose(0, 3, 1, 2)
    enhanced_y = ey2d.reshape(N, H, W, C).transpose(0, 3, 1, 2)
    return enhanced_x, enhanced_y


if __name__ == "__main__":
    key = jax.random.PRNGKey(0)
    kx, ky, kp = jax.random.split(key, 3)
    N, C, H, W = 2, 4, 16, 16
    ksize, dilation, dg = 3, 1, 2

    x = jax.random.normal(kx, (N, C, H, W), jnp.float32)
    y = jax.random.normal(ky, (N, C, H, W), jnp.float32)
    params = make_params(kp, C, ksize, dg)

    _single_buffering_supported()   # probe eagerly (outside jit) once
    fwd = jax.jit(weighted_path_aggregation, static_argnums=(3, 4, 5))
    ex, ey = fwd(params, x, y, ksize, dilation, dg)
    jax.block_until_ready((ex, ey))
    assert ex.shape == (N, C, H, W) and ey.shape == (N, C, H, W)
    assert bool(jnp.all(jnp.isfinite(ex))) and bool(jnp.all(jnp.isfinite(ey)))
    print("KERNEL_OK")
</pallas_src>

<mosaic_0001>
module attributes {stable_mosaic.version = 11 : i64} {
  func.func @_probe_copy_kernel(%arg0: i32, %arg1: memref<8x128xf32, #tpu.memory_space<vmem>>, %arg2: memref<8x128xf32, #tpu.memory_space<vmem>>) attributes {dimension_semantics = [#tpu.dimension_semantics<arbitrary>], iteration_bounds = array<i64: 2>, scalar_prefetch = 0 : i64, scratch_operands = 0 : i64, tpu.core_type = #tpu.core_type<tc>, window_params = [{pipeline_mode = #tpu.pipeline_mode<synchronous>, transform_indices = @transform_0, window_bounds = array<i64: 8, 128>}, {transform_indices = @transform_1, window_bounds = array<i64: 8, 128>}]} {
    %c0 = arith.constant 0 : index
    %c0_0 = arith.constant 0 : index
    %0 = vector.load %arg1[%c0, %c0_0] : memref<8x128xf32, #tpu.memory_space<vmem>>, vector<8x128xf32>
    %c0_1 = arith.constant 0 : index
    %c0_2 = arith.constant 0 : index
    %1 = vector.load %arg2[%c0_1, %c0_2] : memref<8x128xf32, #tpu.memory_space<vmem>>, vector<8x128xf32>
    tpu.vector_store %arg2[%c0_1, %c0_2], %0 {strides = array<i32>} : memref<8x128xf32, #tpu.memory_space<vmem>>, vector<8x128xf32>,
    return
  }
  func.func @transform_0(%arg0: i32) -> (i32, i32) {
    %c0_i32 = arith.constant 0 : i32
    %c0_i32_0 = arith.constant 0 : i32
    %c0_i32_1 = arith.constant 0 : i32
    return %c0_i32, %c0_i32_0 : i32, i32
  }
  func.func @transform_1(%arg0: i32) -> (i32, i32) {
    %c0_i32 = arith.constant 0 : i32
    %c0_i32_0 = arith.constant 0 : i32
    return %arg0, %c0_i32 : i32, i32
  }
}

module attributes {stable_mosaic.version = 11 : i64} {
  func.func @kernel(%arg0: i32, %arg1: i32, %arg2: memref<1x1x18x4xbf16, #tpu.memory_space<vmem>>, %arg3: memref<1x1x18x4xbf16, #tpu.memory_space<vmem>>, %arg4: memref<1x1x18x4xbf16, #tpu.memory_space<vmem>>, %arg5: memref<3x3x4x128xbf16, #tpu.memory_space<vmem>>, %arg6: memref<1x128xf32, #tpu.memory_space<vmem>>, %arg7: memref<1x1x16x128xf32, #tpu.memory_space<vmem>>) attributes {dimension_semantics = [#tpu.dimension_semantics<parallel>, #tpu.dimension_semantics<parallel>], iteration_bounds = array<i64: 2, 16>, scalar_prefetch = 0 : i64, scratch_operands = 0 : i64, tpu.core_type = #tpu.core_type<tc>, window_params = [{transform_indices = @transform_0, window_bounds = array<i64: 1, 1, 18, 4>}, {transform_indices = @transform_1, window_bounds = array<i64: 1, 1, 18, 4>}, {transform_indices = @transform_2, window_bounds = array<i64: 1, 1, 18, 4>}, {pipeline_mode = #tpu.pipeline_mode<synchronous>, transform_indices = @transform_3, window_bounds = array<i64: 3, 3, 4, 128>}, {pipeline_mode = #tpu.pipeline_mode<synchronous>, transform_indices = @transform_4, window_bounds = array<i64: 1, 128>}, {transform_indices = @transform_5, window_bounds = array<i64: 1, 1, 16, 128>}]} {
    %c0 = arith.constant 0 : index
    %c0_0 = arith.constant 0 : index
    %c0_1 = arith.constant 0 : index
    %c0_2 = arith.constant 0 : index
    %0 = vector.load %arg2[%c0, %c0_0, %c0_1, %c0_2] : memref<1x1x18x4xbf16, #tpu.memory_space<vmem>>, vector<1x1x16x4xbf16>
    %1 = vector.shape_cast %0 : vector<1x1x16x4xbf16> to vector<16x4xbf16>
    %c0_3 = arith.constant 0 : index
    %c0_4 = arith.constant 0 : index
    %c0_5 = arith.constant 0 : index
    %c0_6 = arith.constant 0 : index
    %2 = vector.load %arg5[%c0_3, %c0_4, %c0_5, %c0_6] : memref<3x3x4x128xbf16, #tpu.memory_space<vmem>>, vector<1x1x4x128xbf16>
    %3 = vector.shape_cast %2 : vector<1x1x4x128xbf16> to vector<4x128xbf16>
    %cst = arith.constant dense<0.000000e+00> : vector<16x128xf32>
    %4 = tpu.matmul %1, %3, %cst {dimension_numbers = #tpu.dot_dimension_numbers<[1], [0], [0], [1], [0, 0, 1, 1], [], []>} : vector<16x4xbf16>, vector<4x128xbf16>, vector<16x128xf32> -> vector<16x128xf32>
    %c0_7 = arith.constant 0 : index
    %c0_8 = arith.constant 0 : index
    %c1 = arith.constant 1 : index
    %c0_9 = arith.constant 0 : index
    %5 = vector.load %arg2[%c0_7, %c0_8, %c1, %c0_9] : memref<1x1x18x4xbf16, #tpu.memory_space<vmem>>, vector<1x1x16x4xbf16>
    %6 = vector.shape_cast %5 : vector<1x1x16x4xbf16> to vector<16x4xbf16>
    %c0_10 = arith.constant 0 : index
    %c1_11 = arith.constant 1 : index
    %c0_12 = arith.constant 0 : index
    %c0_13 = arith.constant 0 : index
    %7 = vector.load %arg5[%c0_10, %c1_11, %c0_12, %c0_13] : memref<3x3x4x128xbf16, #tpu.memory_space<vmem>>, vector<1x1x4x128xbf16>
    %8 = vector.shape_cast %7 : vector<1x1x4x128xbf16> to vector<4x128xbf16>
    %cst_14 = arith.constant dense<0.000000e+00> : vector<16x128xf32>
    %9 = tpu.matmul %6, %8, %cst_14 {dimension_numbers = #tpu.dot_dimension_numbers<[1], [0], [0], [1], [0, 0, 1, 1], [], []>} : vector<16x4xbf16>, vector<4x128xbf16>, vector<16x128xf32> -> vector<16x128xf32>
    %10 = arith.addf %4, %9 : vector<16x128xf32>
    %c0_15 = arith.constant 0 : index
    %c0_16 = arith.constant 0 : index
    %c2 = arith.constant 2 : index
    %c0_17 = arith.constant 0 : index
    %11 = vector.load %arg2[%c0_15, %c0_16, %c2, %c0_17] : memref<1x1x18x4xbf16, #tpu.memory_space<vmem>>, vector<1x1x16x4xbf16>
    %12 = vector.shape_cast %11 : vector<1x1x16x4xbf16> to vector<16x4xbf16>
    %c0_18 = arith.constant 0 : index
    %c2_19 = arith.constant 2 : index
    %c0_20 = arith.constant 0 : index
    %c0_21 = arith.constant 0 : index
    %13 = vector.load %arg5[%c0_18, %c2_19, %c0_20, %c0_21] : memref<3x3x4x128xbf16, #tpu.memory_space<vmem>>, vector<1x1x4x128xbf16>
    %14 = vector.shape_cast %13 : vector<1x1x4x128xbf16> to vector<4x128xbf16>
    %cst_22 = arith.constant dense<0.000000e+00> : vector<16x128xf32>
    %15 = tpu.matmul %12, %14, %cst_22 {dimension_numbers = #tpu.dot_dimension_numbers<[1], [0], [0], [1], [0, 0, 1, 1], [], []>} : vector<16x4xbf16>, vector<4x128xbf16>, vector<16x128xf32> -> vector<16x128xf32>
    %16 = arith.addf %10, %15 : vector<16x128xf32>
    %c0_23 = arith.constant 0 : index
    %c0_24 = arith.constant 0 : index
    %c0_25 = arith.constant 0 : index
    %c0_26 = arith.constant 0 : index
    %17 = vector.load %arg3[%c0_23, %c0_24, %c0_25, %c0_26] : memref<1x1x18x4xbf16, #tpu.memory_space<vmem>>, vector<1x1x16x4xbf16>
    %18 = vector.shape_cast %17 : vector<1x1x16x4xbf16> to vector<16x4xbf16>
    %c1_27 = arith.constant 1 : index
    %c0_28 = arith.constant 0 : index
    %c0_29 = arith.constant 0 : index
    %c0_30 = arith.constant 0 : index
    %19 = vector.load %arg5[%c1_27, %c0_28, %c0_29, %c0_30] : memref<3x3x4x128xbf16, #tpu.memory_space<vmem>>, vector<1x1x4x128xbf16>
    %20 = vector.shape_cast %19 : vector<1x1x4x128xbf16> to vector<4x128xbf16>
    %cst_31 = arith.constant dense<0.000000e+00> : vector<16x128xf32>
    %21 = tpu.matmul %18, %20, %cst_31 {dimension_numbers = #tpu.dot_dimension_numbers<[1], [0], [0], [1], [0, 0, 1, 1], [], []>} : vector<16x4xbf16>, vector<4x128xbf16>, vector<16x128xf32> -> vector<16x128xf32>
    %22 = arith.addf %16, %21 : vector<16x128xf32>
    %c0_32 = arith.constant 0 : index
    %c0_33 = arith.constant 0 : index
    %c1_34 = arith.constant 1 : index
    %c0_35 = arith.constant 0 : index
    %23 = vector.load %arg3[%c0_32, %c0_33, %c1_34, %c0_35] : memref<1x1x18x4xbf16, #tpu.memory_space<vmem>>, vector<1x1x16x4xbf16>
    %24 = vector.shape_cast %23 : vector<1x1x16x4xbf16> to vector<16x4xbf16>
    %c1_36 = arith.constant 1 : index
    %c1_37 = arith.constant 1 : index
    %c0_38 = arith.constant 0 : index
    %c0_39 = arith.constant 0 : index
    %25 = vector.load %arg5[%c1_36, %c1_37, %c0_38, %c0_39] : memref<3x3x4x128xbf16, #tpu.memory_space<vmem>>, vector<1x1x4x128xbf16>
    %26 = vector.shape_cast %25 : vector<1x1x4x128xbf16> to vector<4x128xbf16>
    %cst_40 = arith.constant dense<0.000000e+00> : vector<16x128xf32>
    %27 = tpu.matmul %24, %26, %cst_40 {dimension_numbers = #tpu.dot_dimension_numbers<[1], [0], [0], [1], [0, 0, 1, 1], [], []>} : vector<16x4xbf16>, vector<4x128xbf16>, vector<16x128xf32> -> vector<16x128xf32>
    %28 = arith.addf %22, %27 : vector<16x128xf32>
    %c0_41 = arith.constant 0 : index
    %c0_42 = arith.constant 0 : index
    %c2_43 = arith.constant 2 : index
    %c0_44 = arith.constant 0 : index
    %29 = vector.load %arg3[%c0_41, %c0_42, %c2_43, %c0_44] : memref<1x1x18x4xbf16, #tpu.memory_space<vmem>>, vector<1x1x16x4xbf16>
    %30 = vector.shape_cast %29 : vector<1x1x16x4xbf16> to vector<16x4xbf16>
    %c1_45 = arith.constant 1 : index
    %c2_46 = arith.constant 2 : index
    %c0_47 = arith.constant 0 : index
    %c0_48 = arith.constant 0 : index
    %31 = vector.load %arg5[%c1_45, %c2_46, %c0_47, %c0_48] : memref<3x3x4x128xbf16, #tpu.memory_space<vmem>>, vector<1x1x4x128xbf16>
    %32 = vector.shape_cast %31 : vector<1x1x4x128xbf16> to vector<4x128xbf16>
    %cst_49 = arith.constant dense<0.000000e+00> : vector<16x128xf32>
    %33 = tpu.matmul %30, %32, %cst_49 {dimension_numbers = #tpu.dot_dimension_numbers<[1], [0], [0], [1], [0, 0, 1, 1], [], []>} : vector<16x4xbf16>, vector<4x128xbf16>, vector<16x128xf32> -> vector<16x128xf32>
    %34 = arith.addf %28, %33 : vector<16x128xf32>
    %c0_50 = arith.constant 0 : index
    %c0_51 = arith.constant 0 : index
    %c0_52 = arith.constant 0 : index
    %c0_53 = arith.constant 0 : index
    %35 = vector.load %arg4[%c0_50, %c0_51, %c0_52, %c0_53] : memref<1x1x18x4xbf16, #tpu.memory_space<vmem>>, vector<1x1x16x4xbf16>
    %36 = vector.shape_cast %35 : vector<1x1x16x4xbf16> to vector<16x4xbf16>
    %c2_54 = arith.constant 2 : index
    %c0_55 = arith.constant 0 : index
    %c0_56 = arith.constant 0 : index
    %c0_57 = arith.constant 0 : index
    %37 = vector.load %arg5[%c2_54, %c0_55, %c0_56, %c0_57] : memref<3x3x4x128xbf16, #tpu.memory_space<vmem>>, vector<1x1x4x128xbf16>
    %38 = vector.shape_cast %37 : vector<1x1x4x128xbf16> to vector<4x128xbf16>
    %cst_58 = arith.constant dense<0.000000e+00> : vector<16x128xf32>
    %39 = tpu.matmul %36, %38, %cst_58 {dimension_numbers = #tpu.dot_dimension_numbers<[1], [0], [0], [1], [0, 0, 1, 1], [], []>} : vector<16x4xbf16>, vector<4x128xbf16>, vector<16x128xf32> -> vector<16x128xf32>
    %40 = arith.addf %34, %39 : vector<16x128xf32>
    %c0_59 = arith.constant 0 : index
    %c0_60 = arith.constant 0 : index
    %c1_61 = arith.constant 1 : index
    %c0_62 = arith.constant 0 : index
    %41 = vector.load %arg4[%c0_59, %c0_60, %c1_61, %c0_62] : memref<1x1x18x4xbf16, #tpu.memory_space<vmem>>, vector<1x1x16x4xbf16>
    %42 = vector.shape_cast %41 : vector<1x1x16x4xbf16> to vector<16x4xbf16>
    %c2_63 = arith.constant 2 : index
    %c1_64 = arith.constant 1 : index
    %c0_65 = arith.constant 0 : index
    %c0_66 = arith.constant 0 : index
    %43 = vector.load %arg5[%c2_63, %c1_64, %c0_65, %c0_66] : memref<3x3x4x128xbf16, #tpu.memory_space<vmem>>, vector<1x1x4x128xbf16>
    %44 = vector.shape_cast %43 : vector<1x1x4x128xbf16> to vector<4x128xbf16>
    %cst_67 = arith.constant dense<0.000000e+00> : vector<16x128xf32>
    %45 = tpu.matmul %42, %44, %cst_67 {dimension_numbers = #tpu.dot_dimension_numbers<[1], [0], [0], [1], [0, 0, 1, 1], [], []>} : vector<16x4xbf16>, vector<4x128xbf16>, vector<16x128xf32> -> vector<16x128xf32>
    %46 = arith.addf %40, %45 : vector<16x128xf32>
    %c0_68 = arith.constant 0 : index
    %c0_69 = arith.constant 0 : index
    %c2_70 = arith.constant 2 : index
    %c0_71 = arith.constant 0 : index
    %47 = vector.load %arg4[%c0_68, %c0_69, %c2_70, %c0_71] : memref<1x1x18x4xbf16, #tpu.memory_space<vmem>>, vector<1x1x16x4xbf16>
    %48 = vector.shape_cast %47 : vector<1x1x16x4xbf16> to vector<16x4xbf16>
    %c2_72 = arith.constant 2 : index
    %c2_73 = arith.constant 2 : index
    %c0_74 = arith.constant 0 : index
    %c0_75 = arith.constant 0 : index
    %49 = vector.load %arg5[%c2_72, %c2_73, %c0_74, %c0_75] : memref<3x3x4x128xbf16, #tpu.memory_space<vmem>>, vector<1x1x4x128xbf16>
    %50 = vector.shape_cast %49 : vector<1x1x4x128xbf16> to vector<4x128xbf16>
    %cst_76 = arith.constant dense<0.000000e+00> : vector<16x128xf32>
    %51 = tpu.matmul %48, %50, %cst_76 {dimension_numbers = #tpu.dot_dimension_numbers<[1], [0], [0], [1], [0, 0, 1, 1], [], []>} : vector<16x4xbf16>, vector<4x128xbf16>, vector<16x128xf32> -> vector<16x128xf32>
    %52 = arith.addf %46, %51 : vector<16x128xf32>
    %c0_77 = arith.constant 0 : index
    %c0_78 = arith.constant 0 : index
    %53 = vector.load %arg6[%c0_77, %c0_78] : memref<1x128xf32, #tpu.memory_space<vmem>>, vector<1x128xf32>
    %54 = vector.broadcast %53 : vector<1x128xf32> to vector<16x128xf32>
    %55 = arith.addf %52, %54 : vector<16x128xf32>
    %56 = tpu.iota {dimensions = array<i32: 1>} : vector<16x128xi32>
    %cst_79 = arith.constant 5.000000e-01 : f32
    %57 = vector.broadcast %cst_79 : f32 to vector<16x128xf32>
    %58 = arith.mulf %57, %55 : vector<16x128xf32>
    %59 = math.tanh %58 : vector<16x128xf32>
    %cst_80 = arith.constant 5.000000e-01 : f32
    %60 = vector.broadcast %cst_80 : f32 to vector<16x128xf32>
    %61 = arith.mulf %60, %59 : vector<16x128xf32>
    %cst_81 = arith.constant 5.000000e-01 : f32
    %62 = vector.broadcast %cst_81 : f32 to vector<16x128xf32>
    %63 = arith.addf %62, %61 : vector<16x128xf32>
    %c72_i32 = arith.constant 72 : i32
    %64 = vector.broadcast %c72_i32 : i32 to vector<16x128xi32>
    %65 = arith.cmpi sge, %56, %64 : vector<16x128xi32>
    %c108_i32 = arith.constant 108 : i32
    %66 = vector.broadcast %c108_i32 : i32 to vector<16x128xi32>
    %67 = arith.cmpi slt, %56, %66 : vector<16x128xi32>
    %68 = arith.andi %65, %67 : vector<16x128xi1>
    %69 = arith.select %68, %63, %55 : vector<16x128xi1>, vector<16x128xf32>
    %c0_82 = arith.constant 0 : index
    %c0_83 = arith.constant 0 : index
    %c0_84 = arith.constant 0 : index
    %c0_85 = arith.constant 0 : index
    %70 = vector.load %arg7[%c0_82, %c0_83, %c0_84, %c0_85] : memref<1x1x16x128xf32, #tpu.memory_space<vmem>>, vector<1x1x16x128xf32>
    %71 = vector.shape_cast %70 : vector<1x1x16x128xf32> to vector<16x128xf32>
    %72 = vector.shape_cast %69 : vector<16x128xf32> to vector<1x1x16x128xf32>
    tpu.vector_store %arg7[%c0_82, %c0_83, %c0_84, %c0_85], %72 {strides = array<i32>} : memref<1x1x16x128xf32, #tpu.memory_space<vmem>>, vector<1x1x16x128xf32>,
    return
  }
  func.func @transform_0(%arg0: i32, %arg1: i32) -> (i32, i32, i32, i32) {
    %c0_i32 = arith.constant 0 : i32
    %0 = arith.addi %arg1, %c0_i32 : i32
    %c0_i32_0 = arith.constant 0 : i32
    %c0_i32_1 = arith.constant 0 : i32
    %c0_i32_2 = arith.constant 0 : i32
    return %arg0, %0, %c0_i32_0, %c0_i32_1 : i32, i32, i32, i32
  }
  func.func @transform_1(%arg0: i32, %arg1: i32) -> (i32, i32, i32, i32) {
    %c1_i32 = arith.constant 1 : i32
    %0 = arith.addi %arg1, %c1_i32 : i32
    %c0_i32 = arith.constant 0 : i32
    %c0_i32_0 = arith.constant 0 : i32
    %c0_i32_1 = arith.constant 0 : i32
    return %arg0, %0, %c0_i32, %c0_i32_0 : i32, i32, i32, i32
  }
  func.func @transform_2(%arg0: i32, %arg1: i32) -> (i32, i32, i32, i32) {
    %c2_i32 = arith.constant 2 : i32
    %0 = arith.addi %arg1, %c2_i32 : i32
    %c0_i32 = arith.constant 0 : i32
    %c0_i32_0 = arith.constant 0 : i32
    %c0_i32_1 = arith.constant 0 : i32
    return %arg0, %0, %c0_i32, %c0_i32_0 : i32, i32, i32, i32
  }
  func.func @transform_3(%arg0: i32, %arg1: i32) -> (i32, i32, i32, i32) {
    %c0_i32 = arith.constant 0 : i32
    %c0_i32_0 = arith.constant 0 : i32
    %c0_i32_1 = arith.constant 0 : i32
    %c0_i32_2 = arith.constant 0 : i32
    %c0_i32_3 = arith.constant 0 : i32
    return %c0_i32, %c0_i32_0, %c0_i32_1, %c0_i32_2 : i32, i32, i32, i32
  }
  func.func @transform_4(%arg0: i32, %arg1: i32) -> (i32, i32) {
    %c0_i32 = arith.constant 0 : i32
    %c0_i32_0 = arith.constant 0 : i32
    %c0_i32_1 = arith.constant 0 : i32
    return %c0_i32, %c0_i32_0 : i32, i32
  }
  func.func @transform_5(%arg0: i32, %arg1: i32) -> (i32, i32, i32, i32) {
    %c0_i32 = arith.constant 0 : i32
    %c0_i32_0 = arith.constant 0 : i32
    %c0_i32_1 = arith.constant 0 : i32
    return %arg0, %arg1, %c0_i32, %c0_i32_0 : i32, i32, i32, i32
  }
}

module attributes {stable_mosaic.version = 11 : i64} {
  func.func @_dual_head_kernel(%arg0: i32, %arg1: memref<256x36xbf16, #tpu.memory_space<vmem>>, %arg2: memref<256x36xbf16, #tpu.memory_space<vmem>>, %arg3: memref<36x4xbf16, #tpu.memory_space<vmem>>, %arg4: memref<36x4xbf16, #tpu.memory_space<vmem>>, %arg5: memref<2x4xf32, #tpu.memory_space<vmem>>, %arg6: memref<2x4xf32, #tpu.memory_space<vmem>>, %arg7: memref<256x4xf32, #tpu.memory_space<vmem>>, %arg8: memref<256x4xf32, #tpu.memory_space<vmem>>, %arg9: memref<256x4xf32, #tpu.memory_space<vmem>>, %arg10: memref<256x4xf32, #tpu.memory_space<vmem>>) attributes {dimension_semantics = [#tpu.dimension_semantics<parallel>], iteration_bounds = array<i64: 2>, scalar_prefetch = 0 : i64, scratch_operands = 0 : i64, tpu.core_type = #tpu.core_type<tc>, window_params = [{transform_indices = @transform_0, window_bounds = array<i64: 256, 36>}, {transform_indices = @transform_1, window_bounds = array<i64: 256, 36>}, {pipeline_mode = #tpu.pipeline_mode<synchronous>, transform_indices = @transform_2, window_bounds = array<i64: 36, 4>}, {pipeline_mode = #tpu.pipeline_mode<synchronous>, transform_indices = @transform_3, window_bounds = array<i64: 36, 4>}, {pipeline_mode = #tpu.pipeline_mode<synchronous>, transform_indices = @transform_4, window_bounds = array<i64: 2, 4>}, {pipeline_mode = #tpu.pipeline_mode<synchronous>, transform_indices = @transform_5, window_bounds = array<i64: 2, 4>}, {transform_indices = @transform_6, window_bounds = array<i64: 256, 4>}, {transform_indices = @transform_7, window_bounds = array<i64: 256, 4>}, {transform_indices = @transform_8, window_bounds = array<i64: 256, 4>}, {transform_indices = @transform_9, window_bounds = array<i64: 256, 4>}]} {
    %c0 = arith.constant 0 : index
    %c0_0 = arith.constant 0 : index
    %0 = vector.load %arg7[%c0, %c0_0] : memref<256x4xf32, #tpu.memory_space<vmem>>, vector<256x4xf32>
    %c0_1 = arith.constant 0 : index
    %c0_2 = arith.constant 0 : index
    %1 = vector.load %arg8[%c0_1, %c0_2] : memref<256x4xf32, #tpu.memory_space<vmem>>, vector<256x4xf32>
    %2 = arith.subf %0, %1 : vector<256x4xf32>
    %c0_3 = arith.constant 0 : index
    %c0_4 = arith.constant 0 : index
    %3 = vector.load %arg1[%c0_3, %c0_4] : memref<256x36xbf16, #tpu.memory_space<vmem>>, vector<256x36xbf16>
    %c0_5 = arith.constant 0 : index
    %c0_6 = arith.constant 0 : index
    %4 = vector.load %arg3[%c0_5, %c0_6] : memref<36x4xbf16, #tpu.memory_space<vmem>>, vector<36x4xbf16>
    %cst = arith.constant dense<0.000000e+00> : vector<256x4xf32>
    %5 = tpu.matmul %3, %4, %cst {dimension_numbers = #tpu.dot_dimension_numbers<[1], [0], [0], [1], [0, 0, 1, 1], [], []>} : vector<256x36xbf16>, vector<36x4xbf16>, vector<256x4xf32> -> vector<256x4xf32>
    %c0_7 = arith.constant 0 : index
    %c0_8 = arith.constant 0 : index
    %6 = vector.load %arg5[%c0_7, %c0_8] : memref<2x4xf32, #tpu.memory_space<vmem>>, vector<1x4xf32>
    %7 = vector.broadcast %6 : vector<1x4xf32> to vector<256x4xf32>
    %8 = arith.mulf %5, %7 : vector<256x4xf32>
    %c1 = arith.constant 1 : index
    %c0_9 = arith.constant 0 : index
    %9 = vector.load %arg5[%c1, %c0_9] : memref<2x4xf32, #tpu.memory_space<vmem>>, vector<1x4xf32>
    %10 = vector.broadcast %9 : vector<1x4xf32> to vector<256x4xf32>
    %11 = arith.addf %8, %10 : vector<256x4xf32>
    %cst_10 = arith.constant 5.000000e-01 : f32
    %12 = vector.broadcast %cst_10 : f32 to vector<256x4xf32>
    %13 = arith.mulf %12, %11 : vector<256x4xf32>
    %14 = math.tanh %13 : vector<256x4xf32>
    %cst_11 = arith.constant 5.000000e-01 : f32
    %15 = vector.broadcast %cst_11 : f32 to vector<256x4xf32>
    %16 = arith.mulf %15, %14 : vector<256x4xf32>
    %cst_12 = arith.constant 5.000000e-01 : f32
    %17 = vector.broadcast %cst_12 : f32 to vector<256x4xf32>
    %18 = arith.addf %17, %16 : vector<256x4xf32>
    %19 = arith.mulf %18, %2 : vector<256x4xf32>
    %20 = arith.addf %1, %19 : vector<256x4xf32>
    %c0_13 = arith.constant 0 : index
    %c0_14 = arith.constant 0 : index
    %21 = vector.load %arg9[%c0_13, %c0_14] : memref<256x4xf32, #tpu.memory_space<vmem>>, vector<256x4xf32>
    tpu.vector_store %arg9[%c0_13, %c0_14], %20 {strides = array<i32>} : memref<256x4xf32, #tpu.memory_space<vmem>>, vector<256x4xf32>,
    %c0_15 = arith.constant 0 : index
    %c0_16 = arith.constant 0 : index
    %22 = vector.load %arg2[%c0_15, %c0_16] : memref<256x36xbf16, #tpu.memory_space<vmem>>, vector<256x36xbf16>
    %c0_17 = arith.constant 0 : index
    %c0_18 = arith.constant 0 : index
    %23 = vector.load %arg4[%c0_17, %c0_18] : memref<36x4xbf16, #tpu.memory_space<vmem>>, vector<36x4xbf16>
    %cst_19 = arith.constant dense<0.000000e+00> : vector<256x4xf32>
    %24 = tpu.matmul %22, %23, %cst_19 {dimension_numbers = #tpu.dot_dimension_numbers<[1], [0], [0], [1], [0, 0, 1, 1], [], []>} : vector<256x36xbf16>, vector<36x4xbf16>, vector<256x4xf32> -> vector<256x4xf32>
    %c0_20 = arith.constant 0 : index
    %c0_21 = arith.constant 0 : index
    %25 = vector.load %arg6[%c0_20, %c0_21] : memref<2x4xf32, #tpu.memory_space<vmem>>, vector<1x4xf32>
    %26 = vector.broadcast %25 : vector<1x4xf32> to vector<256x4xf32>
    %27 = arith.mulf %24, %26 : vector<256x4xf32>
    %c1_22 = arith.constant 1 : index
    %c0_23 = arith.constant 0 : index
    %28 = vector.load %arg6[%c1_22, %c0_23] : memref<2x4xf32, #tpu.memory_space<vmem>>, vector<1x4xf32>
    %29 = vector.broadcast %28 : vector<1x4xf32> to vector<256x4xf32>
    %30 = arith.addf %27, %29 : vector<256x4xf32>
    %cst_24 = arith.constant 5.000000e-01 : f32
    %31 = vector.broadcast %cst_24 : f32 to vector<256x4xf32>
    %32 = arith.mulf %31, %30 : vector<256x4xf32>
    %33 = math.tanh %32 : vector<256x4xf32>
    %cst_25 = arith.constant 5.000000e-01 : f32
    %34 = vector.broadcast %cst_25 : f32 to vector<256x4xf32>
    %35 = arith.mulf %34, %33 : vector<256x4xf32>
    %cst_26 = arith.constant 5.000000e-01 : f32
    %36 = vector.broadcast %cst_26 : f32 to vector<256x4xf32>
    %37 = arith.addf %36, %35 : vector<256x4xf32>
    %38 = arith.mulf %37, %2 : vector<256x4xf32>
    %39 = arith.addf %1, %38 : vector<256x4xf32>
    %c0_27 = arith.constant 0 : index
    %c0_28 = arith.constant 0 : index
    %40 = vector.load %arg10[%c0_27, %c0_28] : memref<256x4xf32, #tpu.memory_space<vmem>>, vector<256x4xf32>
    tpu.vector_store %arg10[%c0_27, %c0_28], %39 {strides = array<i32>} : memref<256x4xf32, #tpu.memory_space<vmem>>, vector<256x4xf32>,
    return
  }
  func.func @transform_0(%arg0: i32) -> (i32, i32) {
    %c0_i32 = arith.constant 0 : i32
    %c0_i32_0 = arith.constant 0 : i32
    return %arg0, %c0_i32 : i32, i32
  }
  func.func @transform_1(%arg0: i32) -> (i32, i32) {
    %c0_i32 = arith.constant 0 : i32
    %c0_i32_0 = arith.constant 0 : i32
    return %arg0, %c0_i32 : i32, i32
  }
  func.func @transform_2(%arg0: i32) -> (i32, i32) {
    %c0_i32 = arith.constant 0 : i32
    %c0_i32_0 = arith.constant 0 : i32
    %c0_i32_1 = arith.constant 0 : i32
    return %c0_i32, %c0_i32_0 : i32, i32
  }
  func.func @transform_3(%arg0: i32) -> (i32, i32) {
    %c0_i32 = arith.constant 0 : i32
    %c0_i32_0 = arith.constant 0 : i32
    %c0_i32_1 = arith.constant 0 : i32
    return %c0_i32, %c0_i32_0 : i32, i32
  }
  func.func @transform_4(%arg0: i32) -> (i32, i32) {
    %c0_i32 = arith.constant 0 : i32
    %c0_i32_0 = arith.constant 0 : i32
    %c0_i32_1 = arith.constant 0 : i32
    return %c0_i32, %c0_i32_0 : i32, i32
  }
  func.func @transform_5(%arg0: i32) -> (i32, i32) {
    %c0_i32 = arith.constant 0 : i32
    %c0_i32_0 = arith.constant 0 : i32
    %c0_i32_1 = arith.constant 0 : i32
    return %c0_i32, %c0_i32_0 : i32, i32
  }
  func.func @transform_6(%arg0: i32) -> (i32, i32) {
    %c0_i32 = arith.constant 0 : i32
    %c0_i32_0 = arith.constant 0 : i32
    return %arg0, %c0_i32 : i32, i32
  }
  func.func @transform_7(%arg0: i32) -> (i32, i32) {
    %c0_i32 = arith.constant 0 : i32
    %c0_i32_0 = arith.constant 0 : i32
    return %arg0, %c0_i32 : i32, i32
  }
  func.func @transform_8(%arg0: i32) -> (i32, i32) {
    %c0_i32 = arith.constant 0 : i32
    %c0_i32_0 = arith.constant 0 : i32
    return %arg0, %c0_i32 : i32, i32
  }
  func.func @transform_9(%arg0: i32) -> (i32, i32) {
    %c0_i32 = arith.constant 0 : i32
    %c0_i32_0 = arith.constant 0 : i32
    return %arg0, %c0_i32 : i32, i32
  }
}

</mosaic_0001>

<bundles_post_ra>
// kernel: tpu_custom_call.1
= control target key start
LH: loop header
LB: loop body
LE: loop exit
PB: predicated region body
PF: predicated region fallthrough
CT: control target
= control target key end

     0   :  { %6 = vsyncpa [#allocation3], 0  ;;  %s440_s0 = inlined_call_operand.hbm [shape: f32[8,128], index: 0, kind: input, shape index: {}]   ;;  %s441_s1 = inlined_call_operand.hbm [shape: f32[16,128], index: 1, kind: output, shape index: {}]  }
   0x1   :  { %7 = vsyncpa [#allocation4], 0 }
   0x2   :  { %9 = vsyncpa [#allocation4 + $0x1], 0  ;;  %s356_s6 = smov 0   ;;  %s358_s7 = smov 0  }
   0x3   :  { %s360_s8 = smov 0   ;;  %s362_s9 = smov 0  }
   0x4 LB: > { %s377_s10 = sadd.s32 4294967295, %s343_s9   ;;  %s187_s11 = sadd.s32 4294967294, %s343_s9   ;;  %s343_s9 = sphi %s362_s9, %s447_s9   ;;  %s339_s8 = sphi %s360_s8, %s446_s8   ;;  %s335_s7 = sphi %s358_s7, %s445_s7   ;;  %s331_s6 = sphi %s356_s6, %s444_s6  }
   0x5   : > { %s381_s12 = sadd.s32 1, %s343_s9   ;;  %s43_s13 = sadd.s32 1, %s339_s8 }
   0x6   : > { %s40_s14 = ssub.s32 %s343_s9, %s381_s12  ;;  %p53_p0 = scmp.ne.s32.totalorder %s339_s8, %s335_s7 }
   0x7   : > { %p41_p1 = scmp.eq.s32.totalorder %s40_s14, 0  ;;  %p54_p2 = scmp.eq.s32.totalorder %s377_s10, 1 }
   0x8   : > { %p59_p3 = scmp.ne.s32.totalorder %s335_s7, %s331_s6  ;;  %p60_p4 = scmp.eq.s32.totalorder %s187_s11, 1 }
   0x9   : > { %s392_s15 = scalar_select %p41_p1, %s339_s8, %s43_s13  }
   0xa   : > { %p394_p5 = por %p54_p2, %p53_p0  ;;  %p398_p6 = por %p60_p4, %p59_p3 }
   0xb   : > { %p188_p7 = scmp.ge.s32.totalorder %s343_s9, 1  ;;  %p67_p8 = scmp.lt.s32.totalorder %s343_s9, 3 }
   0xc   : > { %p211_p9 = scmp.eq.s32.totalorder %s377_s10, 0  ;;  %s79_s20 = sshll.u32 %s440_s0, 4  ;;  %s80_s20 = int_to_ptr.hbm [resolvable:$true] %s79_s20 }
   0xd   : > { %p68_p10 = pnand %p188_p7, %p67_p8  ;;  %s345_s21 = smov [#allocation2]  }
   0xe   : > { %s81_s22 = sshll.u32 %s345_s21, 4  ;;  %s82_s22 = int_to_ptr.vmem [resolvable:$true] %s81_s22 }
   0xf   : > { %p203_p11 = pneg %p68_p10  ;;  %94 = sbr.rel (%p68_p10) target bundleno = 37 (0x25), region = 24 }
  0x11   : > { %p204_p12 = pnand %p211_p9, %p203_p11 }
  0x13   : > { %206 = dma.hbm_to_vmem [thread:$0]  (!%p204_p12), %s80_s20, 128, %s82_s22, [#allocation3]  }
  0x14   : > { %322 = dma.done.wait (%p211_p9), [#allocation3], 128  }
  0x15   : > { %324 = vsyncadd (%p211_p9), [#allocation3], 4294967168  ;;  %s107_s23 = sand.u32 1, %s335_s7   ;;  %s194_s24 = sshll.u32 %s377_s10, 3  ;;  %v110_v0 = vld [vmem:[#allocation2] sm:$0xff] }
  0x16   : > { %s192_s25 = sshll.u32 %s107_s23, 3  ;;  %s123_s28 = scalar_lea.hbm %s441_s1, %s194_s24 }
  0x17   : > { %s109_s29 = scalar_lea.vmem [#allocation5], %s192_s25  ;;  %s127_s2 = sshll.u32 %s123_s28, 4  ;;  %s128_s2 = int_to_ptr.hbm [resolvable:$true] %s127_s2 }
  0x18   : > { %s125_s30 = sshll.u32 %s109_s29, 4  ;;  %111 = vst [vmem:[%s109_s29] sm:$0xff] %v110_v0  ;;  %s113_s3 = scalar_lea.sflag [#allocation4], %s107_s23  ;;  %s126_s30 = int_to_ptr.vmem [resolvable:$true] %s125_s30 }
  0x19   : > { %s291_s4 = sshra.s32 %s128_s2, 4  ;;  %s297_s13 = scalar_lea.hbm %s441_s1, 16  ;;  %s292_s4 = int_to_ptr.hbm [resolvable:$true] %s291_s4 }
  0x1a   : > { %s293_s5 = scalar_lea.hbm %s292_s4, 8  ;;  %p298_p2 = scmp.lt.s32.totalorder %s292_s4, %s441_s1 }
  0x1b   : > { %p294_p13 = scmp.ne.s32.totalorder %s292_s4, %s293_s5  ;;  %p299_p3 = scmp.lt.s32.totalorder %s297_s13, %s293_s5 }
  0x1d   : > { %p295_p0 = pnand %p294_p13, %p394_p5  ;;  %p300_p4 = por %p299_p3, %p298_p2 }
  0x1f   : > { %p296_p1 = pneg %p295_p0 }
  0x21   : > { %p301_p7 = pnand %p300_p4, %p296_p1 }
  0x23   : > { %304 = shalt.err (!%p301_p7)
}
  0x24   : > { %201 = dma.vmem_to_hbm [thread:$0]  (%p394_p5), %s126_s30, 128, %s128_s2, %s113_s3  }
  0x25 PF: > { %p213_p8 = scmp.ge.s32.totalorder %s343_s9, 2  ;;  %s139_s19 = sand.u32 1, %s331_s6  }
  0x26   : > { %s140_s20 = scalar_lea.sflag [#allocation4], %s139_s19 }
  0x27   : > { %p208_p9 = pnand %p213_p8, %p398_p6 }
  0x29   : > { %p209_p10 = pneg %p208_p9 }
  0x2b   : > { %326 = dma.done.wait (%p209_p10), %s140_s20, 128  }
  0x2c   : > { %328 = vsyncadd (%p209_p10), %s140_s20, 4294967168  ;;  %p12_p11 = scmp.ge.s32.totalorder %s381_s12, 4   ;;  %s444_s6 = smov %s335_s7 }
  0x2d   : > { %s445_s7 = smov %s339_s8  ;;  %s446_s8 = smov %s392_s15 }
  0x2e   : > { %s447_s9 = smov %s381_s12  ;;  %14 = sbr.rel (!%p12_p11) target bundleno = 4 (0x4), region = 61 }
  0x33   :  { %146 = vsyncpa [#allocation3], 1 }
  0x34   :  { %148 = vsyncpa [#allocation3 + $0x1], 1 }
  0x35   :  { %149 = vsyncpa [#allocation4], 1 }
  0x36   :  { %151 = vsyncpa [#allocation4 + $0x1], 1 }

// kernel: weighted_path_aggregation.2
= control target key start
LH: loop header
LB: loop body
LE: loop exit
PB: predicated region body
PF: predicated region fallthrough
CT: control target
= control target key end

     0   :  { %s1002_s18 = smov 0   ;;  %s1004_s19 = smov 0   ;;  %s1150_s0 = inlined_call_operand.vmem [shape: bf16[2,18,18,4], index: 0, kind: input, shape index: {}, may-alias: {0,1,2}]   ;;  %s1151_s1 = inlined_call_operand.vmem [shape: bf16[2,18,18,4], index: 1, kind: input, shape index: {}, may-alias: {0,1,2}]   ;;  %s1152_s2 = inlined_call_operand.vmem [shape: bf16[2,18,18,4], index: 2, kind: input, shape index: {}, may-alias: {0,1,2}]   ;;  %s1153_s3 = inlined_call_operand.vmem [shape: bf16[3,3,4,128], index: 3, kind: input, shape index: {}]   ;;  %s1154_s4 = inlined_call_operand.vmem [shape: f32[1,128], index: 4, kind: input, shape index: {}]   ;;  %s1155_s5 = inlined_call_operand.vmem [shape: f32[2,16,16,128], index: 5, kind: output, shape index: {}]  }
   0x1   :  { %s1006_s20 = smov 0   ;;  %s1008_s21 = smov 0  }
   0x2   :  { %s1010_s22 = smov 0  }
   0x3 LB: > { %s24_s23 = sadd.s32 1, %s962_s20  ;;  %s27_s24 = sadd.s32 1, %s966_s21  ;;  %s970_s22 = sphi %s1010_s22, %s15_s22   ;;  %s966_s21 = sphi %s1008_s21, %s1160_s21   ;;  %s962_s20 = sphi %s1006_s20, %s1159_s20   ;;  %s958_s19 = sphi %s1004_s19, %s1158_s19   ;;  %s954_s18 = sphi %s1002_s18, %s1157_s18  }
   0x4   : > { %p25_p0 = scmp.ge.s32.totalorder %s24_s23, 16  ;;  %p826_p1 = scmp.ge.s32.totalorder %s970_s22, 1 }
   0x5   : > { %p247_p2 = scmp.lt.s32.totalorder %s970_s22, 33 }
   0x6   : > { %s1162_s23 = smov (%p25_p0, %s24_s23), 0  ;;  %s1164_s24 = smov (!%p25_p0, %s27_s24), %s966_s21 }
   0x7   : > { %p248_p3 = pnand %p826_p1, %p247_p2  ;;  %p29_p4 = scmp.ge.s32.totalorder %s1164_s24, 2 }
   0x8   : > { %p303_p5 = scmp.lt.s32.totalorder (!%p248_p3), %s958_s19, 1  ;;  %p305_p6 = scmp.lt.s32.totalorder (!%p248_p3), %s954_s18, 17 }
   0x9   : > { %s1166_s24 = smov (%p29_p4, %s1164_s24), 0  ;;  %251 = sbr.rel (%p248_p3) target bundleno = 219 (0xdb), region = 40 }
   0xa   : > { %s312_s8 = sadd.s32 (!%p248_p3), 1, %s954_s18  ;;  %s323_s27 = sadd.s32 (!%p248_p3), 2, %s954_s18 }
   0xb   : > { %p315_p7 = scmp.lt.s32.totalorder (!%p248_p3), %s312_s8, 17  ;;  %p1076_p8 = scmp.lt.s32.totalorder (!%p248_p3), %s323_s27, 17 }
   0xc   : > { %p336_p9 = scmp.lt.s32.totalorder (!%p248_p3), %s954_s18, 15 }
   0xe   : > { %vm375_vm0 = vcmask 1041408   ;;  %v836_v0 = vld [vmem:[%s1153_s3 + $0x4] sm:$0x3]  ;;  %v833_v1 = vld [vmem:[%s1153_s3 + $0x2] sm:$0x3]  ;;  %s1168_s19 = smov (!%p303_p5, %s958_s19), 1 }
   0xf   : > { %v426_v2 = vsel %vm375_vm0, %v836_v0, 0  ;;  %v377_v3 = vsel %vm375_vm0, %v833_v1, 0  ;;  %v346_v4 = vld [vmem:[%s1153_s3] sm:$0x3]  ;;  %v838_v5 = vld [vmem:[%s1153_s3 + $0x6] sm:$0x3] }
  0x10   : > { %435 = vmatpush.bf16.msra.mxu2 %v426_v2  ;;  %386 = vmatpush.bf16.msra.mxu0 %v377_v3  ;;  %v396_v6 = vsel %vm375_vm0, %v346_v4, 0  ;;  %v457_v7 = vsel %vm375_vm0, %v838_v5, 0  ;;  %v844_v8 = vld [vmem:[%s1153_s3 + $0x8] sm:$0x3]  ;;  %s1058_s11 = smul.u32 54, %s1168_s19  ;;  %s1170_s8 = smov (!%p315_p7, %s312_s8), 17 }
  0x11   : > { %405 = vmatpush.bf16.msra.mxu1 %v396_v6  ;;  %466 = vmatpush.bf16.msra.mxu3 %v457_v7  ;;  %v504_v9 = vsel %vm375_vm0, %v844_v8, 0  ;;  %v848_v10 = vld [vmem:[%s1153_s3 + $0xc] sm:$0x3]  ;;  %s306_s14 = scalar_select %p305_p6, %s954_s18, 17  ;;  %v854_v12 = vld [vmem:[%s1153_s3 + $0xe] sm:$0x3] }
  0x12   : > { %v566_v11 = vsel %vm375_vm0, %v848_v10, 0  ;;  %v846_v13 = vld [vmem:[%s1153_s3 + $0xa] sm:$0x3]  ;;  %v613_v14 = vsel %vm375_vm0, %v854_v12, 0  ;;  %s885_s28 = smul.u32 3, %s1170_s8  ;;  %vm371_vm1 = vcmask 31744  }
  0x13   : > { %v535_v15 = vsel %vm375_vm0, %v846_v13, 0  ;;  %s883_s26 = smul.u32 3, %s306_s14  ;;  %s1172_s27 = smov (!%p1076_p8, %s323_s27), 17  ;;  %vm418_vm2 = vcmask 1046528   ;;  %v856_v34 = vld [vmem:[%s1153_s3 + $0x10] sm:$0x3] }
  0x14   : > { %513 = vmatpush.bf16.msrb.mxu0 %v504_v9  ;;  %575 = vmatpush.bf16.msrb.mxu2 %v566_v11  ;;  %s319_s7 = sadd.s32 %s885_s28, %s1058_s11  ;;  %s886_s16 = smul.u32 3, %s1172_s27  ;;  %vm358_vm3 = vsmask.f32 7424  ;;  %v644_v42 = vsel %vm375_vm0, %v856_v34, 0 }
  0x15   : > { %622 = vmatpush.bf16.msrb.mxu3 %v613_v14  ;;  %544 = vmatpush.bf16.msrb.mxu1 %v535_v15  ;;  %s309_s29 = sadd.s32 %s1058_s11, %s883_s26  ;;  %s828_s13 = sshll.u32 %s319_s7, 2 }
  0x16   : > { %s827_s6 = sshll.u32 %s309_s29, 2  ;;  %s1087_s8 = scalar_lea.vmem %s1151_s1, %s828_s13 }
  0x17   : > { %s311_s12 = scalar_lea.vmem %s1150_s0, %s827_s6  ;;  %v860_v22 = vld [vmem:[%s1087_s8] sm:$0xff]  ;;  %v477_v25 = vld [vmem:[%s1087_s8 + $0x8] sm:$0x1]  ;;  %s330_s17 = sadd.s32 %s886_s16, %s1058_s11 }
  0x18   : > { %v874_v16 = vld [vmem:[%s311_s12] sm:$0xf0]  ;;  %v347_v17 = vld [vmem:[%s311_s12 + $0x8] sm:$0x1]  ;;  %v875_v18 = vld [vmem:[%s311_s12] sm:$0xe]  ;;  %843 = vmatmul.msk.bf16.vlgmr.msra.gmra.mxu3 %vm371_vm1, %v860_v22  ;;  %v485_v33 = vunpack.c.l.b16 %v477_v25 }
  0x19   : > { %v355_v19 = vunpack.c.l.b16 %v347_v17  ;;  %v876_v20 = vor.u32 %v875_v18, %v874_v16  ;;  %v863_v21 = vld [vmem:[%s311_s12] sm:$0xff]   ;;  %s829_s28 = sshll.u32 %s330_s17, 2  ;;  %s1174_s18 = smov (!%p336_p9, %s954_s18), 15 }
  0x1a   : > { %v360_v23 = vshrl.u32 %v863_v21, 16  ;;  %v362_v24 = vshll.u32 %v863_v21, 16  ;;  %835 = vmatmul.msk.bf16.vlgmr.msra.gmra.mxu1 %vm371_vm1, %v863_v21  ;;  %v877_v29 = vld [vmem:[%s1087_s8] sm:$0xf0]  ;;  %v878_v30 = vld [vmem:[%s1087_s8] sm:$0xe]  ;;  %s1105_s30 = scalar_lea.vmem %s1152_s2, %s829_s28  ;;  %v487_v44 = vpack.c.b16 %v485_v33, %v485_v33 }
  0x1b   : > { %v357_v26 = vpack.c.b16 %v355_v19, %v355_v19  ;;  %v419_v27 = vrot.slane %v876_v20, 1  ;;  %v879_v38 = vor.u32 %v878_v30, %v877_v29  ;;  %v867_v39 = vld [vmem:[%s1087_s8] sm:$0xff]   ;;  %v586_v41 = vld [vmem:[%s1105_s30 + $0x8] sm:$0x1]  ;;  %s830_s7 = sshll.u32 %s1174_s18, 1  ;;  %s831_s9 = sshll.u32 %s1168_s19, 5 }
  0x1c   : > { %v364_v28 = vrot.slane %v362_v24, 1  ;;  %v871_v40 = vld [vmem:[%s1105_s30] sm:$0xff]   ;;  %v594_v45 = vunpack.c.l.b16 %v586_v41  ;;  %v491_v48 = vshll.u32 %v867_v39, 16  ;;  %v529_v51 = vrot.slane %v487_v44, 1  ;;  %s340_s10 = sadd.s32 %s831_s9, %s830_s7 }
  0x1d   : > { %v420_v31 = vrot.slane %v357_v26, 1  ;;  %v367_v32 = vshll.u32 %v357_v26, 16  ;;  %v598_v46 = vshrl.u32 %v871_v40, 16  ;;  %v600_v47 = vshll.u32 %v871_v40, 16  ;;  %v861_v63 = vld [vmem:[%s1105_s30] sm:$0xff]  ;;  %s832_s12 = sshll.u32 %s340_s10, 3 }
  0x1e   : > { %v365_v35 = vor.u32 %v364_v28, %v360_v23  ;;  %v596_v49 = vpack.c.b16 %v594_v45, %v594_v45  ;;  %v528_v50 = vrot.slane %v879_v38, 1  ;;  %v489_v54 = vshrl.u32 %v867_v39, 16  ;;  %v880_v1 = vld [vmem:[%s1105_s30] sm:$0xf0]  ;;  %v881_v2 = vld [vmem:[%s1105_s30] sm:$0xe]  ;;  %s342_s15 = scalar_lea.vmem %s1155_s5, %s832_s12 }
  0x1f   : > { %v421_v36 = vsel %vm418_vm2, %v419_v27, %v420_v31  ;;  %v369_v37 = vrot.slane %v367_v32, 1  ;;  %v602_v52 = vrot.slane %v600_v47, 1  ;;  %v493_v56 = vrot.slane %v491_v48, 1  ;;  %v927_v33 = vld [vmem:[%s1154_s4] ss:$0 sm:$0xff] }
  0x20   : > { %837 = vmatmul.msk.bf16.vlgmr.msra.gmra.mxu2 %vm371_vm1, %v421_v36  ;;  %v605_v53 = vshll.u32 %v596_v49, 16  ;;  %v496_v57 = vshll.u32 %v487_v44, 16  ;;  %v530_v59 = vsel %vm418_vm2, %v528_v50, %v529_v51  ;;  %v882_v3 = vor.u32 %v881_v2, %v880_v1 }
  0x21   : > { %v370_v43 = vsel %vm358_vm3, %v365_v35, %v369_v37  ;;  %v603_v55 = vor.u32 %v602_v52, %v598_v46  ;;  %v494_v61 = vor.u32 %v493_v56, %v489_v54  ;;  %v638_v5 = vrot.slane %v596_v49, 1 }
  0x22   : > { %834 = vmatmul.msk.bf16.vlgmr.msra.gmra.mxu0 %vm371_vm1, %v370_v43  ;;  %v607_v58 = vrot.slane %v605_v53, 1  ;;  %v498_v62 = vrot.slane %v496_v57, 1  ;;  %v637_v4 = vrot.slane %v882_v3, 1  ;;  %v668_v40 = vlaneseq }
  0x23   : > { %653 = vmatpush.bf16.msra.mxu0 %v644_v42 }
  0x24   : > { %v608_v60 = vsel %vm358_vm3, %v603_v55, %v607_v58  ;;  %v499_v0 = vsel %vm358_vm3, %v494_v61, %v498_v62  ;;  %v639_v6 = vsel %vm418_vm2, %v637_v4, %v638_v5  ;;  %v669_v43 = vand.u32 127, %v668_v40 }
  0x26   : > { %vm678_vm4 = vcmp.ge.s32.totalorder %v669_v43, 72  ;;  %vm679_vm5 = vcmp.lt.s32.totalorder %v669_v43, 108 }
  0x27   : > { %vm680_vm6 = vmand %vm678_vm4, %vm679_vm5 }
  0x28   : > { %855 = vmatmul.msk.bf16.vlgmr.msrb.gmra.mxu3 %vm371_vm1, %v608_v60 }
  0x2a   : > { %847 = vmatmul.msk.bf16.vlgmr.msrb.gmra.mxu1 %vm371_vm1, %v530_v59 }
  0x30   : > { %853 = vmatmul.msk.bf16.vlgmr.msrb.gmra.mxu2 %vm371_vm1, %v861_v63 }
  0x32   : > { %845 = vmatmul.msk.bf16.vlgmr.msrb.gmra.mxu0 %vm371_vm1, %v499_v0 }
  0x42   : > { %857 = vmatmul.msk.bf16.vlgmr.msra.gmra.mxu0 %vm371_vm1, %v639_v6 }
  0x97   : > { %v407_v8 = vpop.f32.mrf.mxu1 }
  0x9b   : > { %v468_v10 = vpop.f32.mrf.mxu3 }
  0x9f   : > { %v388_v7 = vpop.f32.mrf.mxu0  ;;  %v409_v12 = vpop.f32.mrf.mxu1 }
  0xa0   : > { %v408_v13 = vadd.f32 %v407_v8, %v388_v7 }
  0xa3   : > { %v437_v9 = vpop.f32.mrf.mxu2  ;;  %v470_v16 = vpop.f32.mrf.mxu3 }
  0xa4   : > { %v442_v15 = vadd.f32 %v437_v9, %v408_v13 }
  0xa6   : > { %v473_v18 = vadd.f32 %v468_v10, %v442_v15 }
  0xa7   : > { %v390_v11 = vpop.f32.mrf.mxu0  ;;  %v546_v19 = vpop.f32.mrf.mxu1 }
  0xa8   : > { %v410_v20 = vadd.f32 %v409_v12, %v390_v11 }
  0xab   : > { %v439_v14 = vpop.f32.mrf.mxu2  ;;  %v624_v27 = vpop.f32.mrf.mxu3 }
  0xac   : > { %v443_v22 = vadd.f32 %v439_v14, %v410_v20 }
  0xae   : > { %v474_v26 = vadd.f32 %v470_v16, %v443_v22 }
  0xaf   : > { %v515_v17 = vpop.f32.mrf.mxu0  ;;  %v548_v30 = vpop.f32.mrf.mxu1 }
  0xb0   : > { %v520_v21 = vadd.f32 %v515_v17, %v473_v18 }
  0xb2   : > { %v551_v24 = vadd.f32 %v546_v19, %v520_v21 }
  0xb3   : > { %v577_v23 = vpop.f32.mrf.mxu2  ;;  %v626_v39 = vpop.f32.mrf.mxu3 }
  0xb4   : > { %v582_v28 = vadd.f32 %v577_v23, %v551_v24 }
  0xb6   : > { %v629_v31 = vadd.f32 %v624_v27, %v582_v28 }
  0xb7   : > { %v517_v25 = vpop.f32.mrf.mxu0 }
  0xb8   : > { %v521_v29 = vadd.f32 %v517_v25, %v474_v26 }
  0xba   : > { %v552_v32 = vadd.f32 %v548_v30, %v521_v29 }
  0xbb   : > { %v579_v34 = vpop.f32.mrf.mxu2 }
  0xbc   : > { %v583_v37 = vadd.f32 %v579_v34, %v552_v32 }
  0xbe   : > { %v630_v42 = vadd.f32 %v626_v39, %v583_v37 }
  0xbf   : > { %v655_v35 = vpop.f32.mrf.mxu0 }
  0xc0   : > { %v660_v36 = vadd.f32 %v655_v35, %v629_v31 }
  0xc2   : > { %v666_v38 = vadd.f32 %v927_v33, %v660_v36 }
  0xc4   : > { %v670_v41 = vmul.f32 0.5, %v666_v38 }
  0xc6   : > { %928 = vtanh.f32 %v670_v41 }
  0xc7   : > { %v657_v44 = vpop.f32.mrf.mxu0 }
  0xc8   : > { %v661_v45 = vadd.f32 %v657_v44, %v630_v42 }
  0xca   : > { %v667_v46 = vadd.f32 %v927_v33, %v661_v45 }
  0xcc   : > { %v929_v47 = vpop.eup %928  ;;  %v671_v48 = vmul.f32 0.5, %v667_v46 }
  0xcd   : > { %v674_v49 = vmul.f32 0.5, %v929_v47 }
  0xce   : > { %930 = vtanh.f32 %v671_v48 }
  0xcf   : > { %v676_v50 = vadd.f32 0.5, %v674_v49 }
  0xd1   : > { %v681_v51 = vsel %vm680_vm6, %v676_v50, %v666_v38 }
  0xd2   : > { %683 = vst [vmem:[%s342_s15] sm:$0xff] %v681_v51 }
  0xd4   : > { %v931_v52 = vpop.eup %930 }
  0xd5   : > { %v675_v53 = vmul.f32 0.5, %v931_v52 }
  0xd7   : > { %v677_v54 = vadd.f32 0.5, %v675_v53 }
  0xd9   : > { %v682_v55 = vsel %vm680_vm6, %v677_v54, %v667_v46 }
  0xda   : > { %684 = vst [vmem:[%s342_s15 + $0x8] sm:$0xff] %v682_v55 }
  0xdb PF: > { %s15_s22 = sadd.s32 1, %s970_s22   ;;  %s1157_s18 = smov %s962_s20 }
  0xdc   : > { %p12_p10 = scmp.ge.s32.totalorder %s15_s22, 34   ;;  %s1158_s19 = smov %s966_s21 }
  0xdd   : > { %s1159_s20 = smov %s1162_s23  ;;  %s1160_s21 = smov %s1166_s24 }
  0xde   :  { %14 = sbr.rel (!%p12_p10) target bundleno = 3 (0x3), region = 84 }

// kernel: squeeze.12
= control target key start
LH: loop header
LB: loop body
LE: loop exit
PB: predicated region body
PF: predicated region fallthrough
CT: control target
= control target key end

     0   :  { %vm963_vm0 = vcmask 15360   ;;  %s6460_s16 = smov 126   ;;  %s8664_s0 = inlined_call_operand.vmem [shape: bf16[2,16,16,4], index: 0, kind: input, shape index: {}]   ;;  %s8665_s1 = inlined_call_operand.vmem [shape: bf16[2,256,2,2], index: 1, kind: output, shape index: {}]  }
   0x1   :  { %v6265_v0 = vld [vmem:[%s8664_s0] sm:$0xff]   ;;  %v6297_v1 = vld [vmem:[%s8664_s0 + $0x10] sm:$0xff]   ;;  %v6298_v6 = vld [vmem:[%s8664_s0 + $0x8] sm:$0xff]  }
   0x2   :  { %v6266_v2 = vunpack.c.l.bf16 %v6265_v0  ;;  %v6267_v3 = vunpack.c.h.bf16 %v6265_v0  ;;  %v6258_v4 = vunpack.c.l.bf16 %v6297_v1  ;;  %v6259_v5 = vunpack.c.h.bf16 %v6297_v1  ;;  %v6296_v7 = vld [vmem:[%s8664_s0 + $0x18] sm:$0xff]   ;;  %v6295_v10 = vld [vmem:[%s8664_s0 + $0x20] sm:$0xff]   ;;  %v6294_v18 = vld [vmem:[%s8664_s0 + $0x28] sm:$0xff]  }
   0x3   :  { %v6262_v11 = vunpack.c.l.bf16 %v6298_v6  ;;  %v6263_v12 = vunpack.c.h.bf16 %v6298_v6  ;;  %v6254_v13 = vunpack.c.l.bf16 %v6296_v7  ;;  %v6255_v14 = vunpack.c.h.bf16 %v6296_v7  ;;  %v6293_v21 = vld [vmem:[%s8664_s0 + $0x30] sm:$0xff]   ;;  %v6292_v22 = vld [vmem:[%s8664_s0 + $0x38] sm:$0xff]   ;;  %v6291_v30 = vld [vmem:[%s8664_s0 + $0x40] sm:$0xff]  }
   0x4   :  { %970 = vst.msk [vmem:[#allocation0 + $0x40] ss:$8 sm:$0xf] %vm963_vm0, %v6267_v3   ;;  %v6300_v8 = vpack.i.bf16 %v6267_v3, %v6266_v2  ;;  %v6310_v9 = vpack.i.bf16 %v6259_v5, %v6258_v4  ;;  %v6492_v15 = vunpack.c.l.bf16 %v6295_v10  ;;  %v6494_v16 = vunpack.c.h.bf16 %v6295_v10  ;;  %v6290_v33 = vld [vmem:[%s8664_s0 + $0x48] sm:$0xff]   ;;  %v6289_v34 = vld [vmem:[%s8664_s0 + $0x50] sm:$0xff]   ;;  %v6288_v42 = vld [vmem:[%s8664_s0 + $0x58] sm:$0xff]  }
   0x5   :  { %972 = vst.msk [vmem:[#allocation0 + $0x40] ss:$8 sm:$0xf0] %vm963_vm0, %v6267_v3   ;;  %v6305_v19 = vpack.i.bf16 %v6263_v12, %v6262_v11  ;;  %v6315_v20 = vpack.i.bf16 %v6255_v14, %v6254_v13  ;;  %v6512_v23 = vunpack.c.l.bf16 %v6294_v18  ;;  %v6514_v24 = vunpack.c.h.bf16 %v6294_v18  ;;  %v6287_v45 = vld [vmem:[%s8664_s0 + $0x60] sm:$0xff]   ;;  %v6286_v46 = vld [vmem:[%s8664_s0 + $0x68] sm:$0xff]   ;;  %v6285_v54 = vld [vmem:[%s8664_s0 + $0x70] sm:$0xff]  }
   0x6   :  { %6301 = vrot.lane.b32.xlu0 %v6300_v8, %s6460_s16  ;;  %964 = vst.msk [vmem:[#allocation0] ss:$8 sm:$0xf] %vm963_vm0, %v6266_v2   ;;  %6311 = vrot.lane.b32.xlu1 %v6310_v9, %s6460_s16  ;;  %v6320_v17 = vpack.i.bf16 %v6494_v16, %v6492_v15  ;;  %v6242_v25 = vunpack.c.l.bf16 %v6293_v21  ;;  %v6243_v26 = vunpack.c.h.bf16 %v6293_v21  ;;  %v6238_v27 = vunpack.c.l.bf16 %v6292_v22  ;;  %v6284_v57 = vld [vmem:[%s8664_s0 + $0x78] sm:$0xff]   ;;  %v6283_v58 = vld [vmem:[%s8664_s0 + $0x80] sm:$0xff]  }
   0x7   :  { %965 = vst.msk [vmem:[#allocation0] ss:$8 sm:$0xf0] %vm963_vm0, %v6266_v2   ;;  %v6239_v28 = vunpack.c.h.bf16 %v6292_v22  ;;  %v6325_v29 = vpack.i.bf16 %v6514_v24, %v6512_v23  ;;  %v6538_v35 = vunpack.c.l.bf16 %v6291_v30  ;;  %v6540_v36 = vunpack.c.h.bf16 %v6291_v30  ;;  %v6282_v2 = vld [vmem:[%s8664_s0 + $0x88] sm:$0xff]   ;;  %v6280_v6 = vld [vmem:[%s8664_s0 + $0x98] sm:$0xff]   ;;  %v6277_v18 = vld [vmem:[%s8664_s0 + $0xb0] sm:$0xff]  }
   0x8   :  { %998 = vst.msk [vmem:[#allocation0 + $0x140] ss:$8 sm:$0xf] %vm963_vm0, %v6259_v5   ;;  %6321 = vrot.lane.b32.xlu2 %v6320_v17, %s6460_s16  ;;  %v6330_v31 = vpack.i.bf16 %v6243_v26, %v6242_v25  ;;  %v6230_v37 = vunpack.c.l.bf16 %v6290_v33  ;;  %v6231_v38 = vunpack.c.h.bf16 %v6290_v33  ;;  %v6226_v39 = vunpack.c.l.bf16 %v6289_v34  ;;  %v6278_v17 = vld [vmem:[%s8664_s0 + $0xa8] sm:$0xff]  }
   0x9   :  { %1000 = vst.msk [vmem:[#allocation0 + $0x140] ss:$8 sm:$0xf0] %vm963_vm0, %v6259_v5   ;;  %v6335_v32 = vpack.i.bf16 %v6239_v28, %v6238_v27  ;;  %v6227_v40 = vunpack.c.h.bf16 %v6289_v34  ;;  %v6340_v41 = vpack.i.bf16 %v6540_v36, %v6538_v35  ;;  %v6564_v47 = vunpack.c.l.bf16 %v6288_v42  ;;  %v6281_v5 = vld [vmem:[%s8664_s0 + $0x90] sm:$0xff]   ;;  %v6274_v30 = vld [vmem:[%s8664_s0 + $0xc8] sm:$0xff]  }
   0xa   :  { %991 = vst.msk [vmem:[#allocation0 + $0x100] ss:$8 sm:$0xf] %vm963_vm0, %v6258_v4   ;;  %v6345_v43 = vpack.i.bf16 %v6231_v38, %v6230_v37  ;;  %v6566_v48 = vunpack.c.h.bf16 %v6288_v42  ;;  %v6218_v49 = vunpack.c.l.bf16 %v6287_v45  ;;  %v6219_v50 = vunpack.c.h.bf16 %v6287_v45  ;;  %v6271_v42 = vld [vmem:[%s8664_s0 + $0xe0] sm:$0xff]  }
   0xb   :  { %993 = vst.msk [vmem:[#allocation0 + $0x100] ss:$8 sm:$0xf0] %vm963_vm0, %v6258_v4   ;;  %v6350_v44 = vpack.i.bf16 %v6227_v40, %v6226_v39  ;;  %v6214_v51 = vunpack.c.l.bf16 %v6286_v46  ;;  %v6215_v52 = vunpack.c.h.bf16 %v6286_v46  ;;  %v6590_v59 = vunpack.c.l.bf16 %v6285_v54 }
   0xc   :  { %984 = vst.msk [vmem:[#allocation0 + $0xc0] ss:$8 sm:$0xf] %vm963_vm0, %v6263_v12   ;;  %v6355_v53 = vpack.i.bf16 %v6566_v48, %v6564_v47  ;;  %v6360_v55 = vpack.i.bf16 %v6219_v50, %v6218_v49  ;;  %v6592_v60 = vunpack.c.h.bf16 %v6285_v54  ;;  %v6206_v61 = vunpack.c.l.bf16 %v6284_v57  ;;  %v6268_v54 = vld [vmem:[%s8664_s0 + $0xf8] sm:$0xff]  }
   0xd   :  { %986 = vst.msk [vmem:[#allocation0 + $0xc0] ss:$8 sm:$0xf0] %vm963_vm0, %v6263_v12   ;;  %v6365_v56 = vpack.i.bf16 %v6215_v52, %v6214_v51  ;;  %v6207_v62 = vunpack.c.h.bf16 %v6284_v57  ;;  %v6202_v63 = vunpack.c.l.bf16 %v6283_v58  ;;  %v6203_v0 = vunpack.c.h.bf16 %v6283_v58 }
   0xe   :  { %6306 = vrot.lane.b32.xlu0 %v6305_v19, %s6460_s16  ;;  %977 = vst.msk [vmem:[#allocation0 + $0x80] ss:$8 sm:$0xf] %vm963_vm0, %v6262_v11   ;;  %6316 = vrot.lane.b32.xlu1 %v6315_v20, %s6460_s16  ;;  %v6370_v1 = vpack.i.bf16 %v6592_v60, %v6590_v59  ;;  %v6620_v7 = vunpack.c.l.bf16 %v6282_v2  ;;  %v6622_v8 = vunpack.c.h.bf16 %v6282_v2  ;;  %v6194_v9 = vunpack.c.l.bf16 %v6281_v5 }
   0xf   :  { %979 = vst.msk [vmem:[#allocation0 + $0x80] ss:$8 sm:$0xf0] %vm963_vm0, %v6262_v11   ;;  %v6375_v3 = vpack.i.bf16 %v6207_v62, %v6206_v61  ;;  %v6380_v4 = vpack.i.bf16 %v6203_v0, %v6202_v63  ;;  %v6195_v10 = vunpack.c.h.bf16 %v6281_v5  ;;  %v6629_v11 = vunpack.c.l.bf16 %v6280_v6 }
  0x10   :  { %1012 = vst.msk [vmem:[#allocation0 + $0x1c0] ss:$8 sm:$0xf] %vm963_vm0, %v6255_v14   ;;  %6326 = vrot.lane.b32.xlu2 %v6325_v29, %s6460_s16  ;;  %v6191_v12 = vunpack.c.h.bf16 %v6280_v6  ;;  %v6662_v21 = vunpack.c.l.bf16 %v6278_v17  ;;  %v6664_v22 = vunpack.c.h.bf16 %v6278_v17  ;;  %v6275_v29 = vld [vmem:[%s8664_s0 + $0xc0] sm:$0xff]  }
  0x11   :  { %1014 = vst.msk [vmem:[#allocation0 + $0x1c0] ss:$8 sm:$0xf0] %vm963_vm0, %v6255_v14   ;;  %v6279_v14 = vld [vmem:[%s8664_s0 + $0xa0] sm:$0xff]   ;;  %v6703_v33 = vunpack.c.l.bf16 %v6275_v29  ;;  %v6705_v34 = vunpack.c.h.bf16 %v6275_v29 }
  0x12   :  { %1005 = vst.msk [vmem:[#allocation0 + $0x180] ss:$8 sm:$0xf] %vm963_vm0, %v6254_v13   ;;  %v6653_v19 = vunpack.c.l.bf16 %v6279_v14  ;;  %v6655_v20 = vunpack.c.h.bf16 %v6279_v14 }
  0x13   :  { %1007 = vst.msk [vmem:[#allocation0 + $0x180] ss:$8 sm:$0xf0] %vm963_vm0, %v6254_v13   ;;  %v6385_v13 = vpack.i.bf16 %v6622_v8, %v6620_v7 }
  0x14   :  { %1054 = vst.msk [vmem:[#allocation0 + $0x340] ss:$8 sm:$0xf] %vm963_vm0, %v6243_v26  }
  0x15   :  { %1056 = vst.msk [vmem:[#allocation0 + $0x340] ss:$8 sm:$0xf0] %vm963_vm0, %v6243_v26   ;;  %v6276_v26 = vld [vmem:[%s8664_s0 + $0xb8] sm:$0xff]  }
  0x16   :  { %6331 = vrot.lane.b32.xlu0 %v6330_v31, %s6460_s16  ;;  %1047 = vst.msk [vmem:[#allocation0 + $0x300] ss:$8 sm:$0xf] %vm963_vm0, %v6242_v25   ;;  %6336 = vrot.lane.b32.xlu1 %v6335_v32, %s6460_s16  ;;  %v6691_v31 = vunpack.c.l.bf16 %v6276_v26  ;;  %v6693_v32 = vunpack.c.h.bf16 %v6276_v26 }
  0x17   :  { %1049 = vst.msk [vmem:[#allocation0 + $0x300] ss:$8 sm:$0xf0] %vm963_vm0, %v6242_v25   ;;  %v6400_v25 = vpack.i.bf16 %v6655_v20, %v6653_v19 }
  0x18   :  { %1068 = vst.msk [vmem:[#allocation0 + $0x3c0] ss:$8 sm:$0xf] %vm963_vm0, %v6239_v28   ;;  %6341 = vrot.lane.b32.xlu2 %v6340_v41, %s6460_s16  ;;  %v6272_v41 = vld [vmem:[%s8664_s0 + $0xd8] sm:$0xff]  }
  0x19   :  { %1070 = vst.msk [vmem:[#allocation0 + $0x3c0] ss:$8 sm:$0xf0] %vm963_vm0, %v6239_v28   ;;  %v6158_v45 = vunpack.c.l.bf16 %v6272_v41  ;;  %v6159_v46 = vunpack.c.h.bf16 %v6272_v41 }
  0x1a   :  { %1061 = vst.msk [vmem:[#allocation0 + $0x380] ss:$8 sm:$0xf] %vm963_vm0, %v6238_v27  }
  0x1b   :  { %1063 = vst.msk [vmem:[#allocation0 + $0x380] ss:$8 sm:$0xf0] %vm963_vm0, %v6238_v27   ;;  %v6405_v27 = vpack.i.bf16 %v6664_v22, %v6662_v21 }
  0x1c   :  { %1096 = vst.msk [vmem:[#allocation0 + $0x4c0] ss:$8 sm:$0xf] %vm963_vm0, %v6231_v38  }
  0x1d   :  { %1098 = vst.msk [vmem:[#allocation0 + $0x4c0] ss:$8 sm:$0xf0] %vm963_vm0, %v6231_v38   ;;  %v6273_v38 = vld [vmem:[%s8664_s0 + $0xd0] sm:$0xff]  }
  0x1e   :  { %6346 = vrot.lane.b32.xlu0 %v6345_v43, %s6460_s16  ;;  %1089 = vst.msk [vmem:[#allocation0 + $0x480] ss:$8 sm:$0xf] %vm963_vm0, %v6230_v37   ;;  %6351 = vrot.lane.b32.xlu1 %v6350_v44, %s6460_s16  ;;  %v6733_v43 = vunpack.c.l.bf16 %v6273_v38  ;;  %v6735_v44 = vunpack.c.h.bf16 %v6273_v38 }
  0x1f   :  { %1091 = vst.msk [vmem:[#allocation0 + $0x480] ss:$8 sm:$0xf0] %vm963_vm0, %v6230_v37   ;;  %v6709_v37 = vunpack.c.h.bf16 %v6274_v30 }
  0x20   :  { %1110 = vst.msk [vmem:[#allocation0 + $0x540] ss:$8 sm:$0xf] %vm963_vm0, %v6227_v40   ;;  %6356 = vrot.lane.b32.xlu2 %v6355_v53, %s6460_s16 }
  0x21   :  { %1112 = vst.msk [vmem:[#allocation0 + $0x540] ss:$8 sm:$0xf0] %vm963_vm0, %v6227_v40  }
  0x22   :  { %1103 = vst.msk [vmem:[#allocation0 + $0x500] ss:$8 sm:$0xf] %vm963_vm0, %v6226_v39  }
  0x23   :  { %1105 = vst.msk [vmem:[#allocation0 + $0x500] ss:$8 sm:$0xf0] %vm963_vm0, %v6226_v39   ;;  %v6420_v39 = vpack.i.bf16 %v6705_v34, %v6703_v33 }
  0x24   :  { %1026 = vst.msk [vmem:[#allocation0 + $0x240] ss:$8 sm:$0xf] %vm963_vm0, %v6494_v16  }
  0x25   :  { %1028 = vst.msk [vmem:[#allocation0 + $0x240] ss:$8 sm:$0xf0] %vm963_vm0, %v6494_v16   ;;  %v6395_v16 = vpack.i.bf16 %v6191_v12, %v6629_v11 }
  0x26   :  { %1019 = vst.msk [vmem:[#allocation0 + $0x200] ss:$8 sm:$0xf] %vm963_vm0, %v6492_v15   ;;  %6361 = vrot.lane.b32.xlu0 %v6360_v55, %s6460_s16  ;;  %6366 = vrot.lane.b32.xlu1 %v6365_v56, %s6460_s16 }
  0x27   :  { %1021 = vst.msk [vmem:[#allocation0 + $0x200] ss:$8 sm:$0xf0] %vm963_vm0, %v6492_v15   ;;  %v6390_v15 = vpack.i.bf16 %v6195_v10, %v6194_v9 }
  0x28   :  { %1138 = vst.msk [vmem:[#allocation0 + $0x640] ss:$8 sm:$0xf] %vm963_vm0, %v6219_v50   ;;  %6371 = vrot.lane.b32.xlu2 %v6370_v1, %s6460_s16 }
  0x29   :  { %1140 = vst.msk [vmem:[#allocation0 + $0x640] ss:$8 sm:$0xf0] %vm963_vm0, %v6219_v50   ;;  %v6155_v50 = vunpack.c.h.bf16 %v6271_v42 }
  0x2a   :  { %1131 = vst.msk [vmem:[#allocation0 + $0x600] ss:$8 sm:$0xf] %vm963_vm0, %v6218_v49  }
  0x2b   :  { %1133 = vst.msk [vmem:[#allocation0 + $0x600] ss:$8 sm:$0xf0] %vm963_vm0, %v6218_v49   ;;  %v6154_v49 = vunpack.c.l.bf16 %v6271_v42 }
  0x2c   :  { %1152 = vst.msk [vmem:[#allocation0 + $0x6c0] ss:$8 sm:$0xf] %vm963_vm0, %v6215_v52  }
  0x2d   :  { %1154 = vst.msk [vmem:[#allocation0 + $0x6c0] ss:$8 sm:$0xf0] %vm963_vm0, %v6215_v52   ;;  %v6435_v52 = vpack.i.bf16 %v6159_v46, %v6158_v45  ;;  %v6440_v53 = vpack.i.bf16 %v6155_v50, %v6154_v49 }
  0x2e   :  { %1145 = vst.msk [vmem:[#allocation0 + $0x680] ss:$8 sm:$0xf] %vm963_vm0, %v6214_v51   ;;  %6376 = vrot.lane.b32.xlu0 %v6375_v3, %s6460_s16  ;;  %6381 = vrot.lane.b32.xlu1 %v6380_v4, %s6460_s16 }
  0x2f   :  { %1147 = vst.msk [vmem:[#allocation0 + $0x680] ss:$8 sm:$0xf0] %vm963_vm0, %v6214_v51   ;;  %v6430_v51 = vpack.i.bf16 %v6735_v44, %v6733_v43 }
  0x30   :  { %1040 = vst.msk [vmem:[#allocation0 + $0x2c0] ss:$8 sm:$0xf] %vm963_vm0, %v6514_v24   ;;  %6386 = vrot.lane.b32.xlu2 %v6385_v13, %s6460_s16 }
  0x31   :  { %1042 = vst.msk [vmem:[#allocation0 + $0x2c0] ss:$8 sm:$0xf0] %vm963_vm0, %v6514_v24   ;;  %v6668_v24 = vunpack.c.h.bf16 %v6277_v18 }
  0x32   :  { %1033 = vst.msk [vmem:[#allocation0 + $0x280] ss:$8 sm:$0xf] %vm963_vm0, %v6512_v23  }
  0x33   :  { %1035 = vst.msk [vmem:[#allocation0 + $0x280] ss:$8 sm:$0xf0] %vm963_vm0, %v6512_v23   ;;  %v6666_v23 = vunpack.c.l.bf16 %v6277_v18 }
  0x34   :  { %1180 = vst.msk [vmem:[#allocation0 + $0x7c0] ss:$8 sm:$0xf] %vm963_vm0, %v6207_v62  }
  0x35   :  { %1182 = vst.msk [vmem:[#allocation0 + $0x7c0] ss:$8 sm:$0xf0] %vm963_vm0, %v6207_v62   ;;  %v6410_v28 = vpack.i.bf16 %v6668_v24, %v6666_v23  ;;  %v6143_v62 = vunpack.c.h.bf16 %v6268_v54 }
  0x36   :  { %1173 = vst.msk [vmem:[#allocation0 + $0x780] ss:$8 sm:$0xf] %vm963_vm0, %v6206_v61   ;;  %6391 = vrot.lane.b32.xlu0 %v6390_v15, %s6460_s16  ;;  %6396 = vrot.lane.b32.xlu1 %v6395_v16, %s6460_s16 }
  0x37   :  { %1175 = vst.msk [vmem:[#allocation0 + $0x780] ss:$8 sm:$0xf0] %vm963_vm0, %v6206_v61   ;;  %v6142_v61 = vunpack.c.l.bf16 %v6268_v54 }
  0x38   :  { %1194 = vst.msk [vmem:[#allocation0 + $0x840] ss:$8 sm:$0xf] %vm963_vm0, %v6203_v0   ;;  %6401 = vrot.lane.b32.xlu2 %v6400_v25, %s6460_s16 }
  0x39   :  { %1196 = vst.msk [vmem:[#allocation0 + $0x840] ss:$8 sm:$0xf0] %vm963_vm0, %v6203_v0   ;;  %v6455_v1 = vpack.i.bf16 %v6143_v62, %v6142_v61 }
  0x3a   :  { %1187 = vst.msk [vmem:[#allocation0 + $0x800] ss:$8 sm:$0xf] %vm963_vm0, %v6202_v63  }
  0x3b   :  { %1189 = vst.msk [vmem:[#allocation0 + $0x800] ss:$8 sm:$0xf0] %vm963_vm0, %v6202_v63  }
  0x3c   :  { %1082 = vst.msk [vmem:[#allocation0 + $0x440] ss:$8 sm:$0xf] %vm963_vm0, %v6540_v36  }
  0x3d   :  { %1084 = vst.msk [vmem:[#allocation0 + $0x440] ss:$8 sm:$0xf0] %vm963_vm0, %v6540_v36   ;;  %v6707_v36 = vunpack.c.l.bf16 %v6274_v30 }
  0x3e   :  { %1075 = vst.msk [vmem:[#allocation0 + $0x400] ss:$8 sm:$0xf] %vm963_vm0, %v6538_v35   ;;  %6406 = vrot.lane.b32.xlu0 %v6405_v27, %s6460_s16  ;;  %6411 = vrot.lane.b32.xlu1 %v6410_v28, %s6460_s16 }
  0x3f   :  { %1077 = vst.msk [vmem:[#allocation0 + $0x400] ss:$8 sm:$0xf0] %vm963_vm0, %v6538_v35   ;;  %v6415_v35 = vpack.i.bf16 %v6693_v32, %v6691_v31  ;;  %v6425_v40 = vpack.i.bf16 %v6709_v37, %v6707_v36 }
  0x40   :  { %1222 = vst.msk [vmem:[#allocation0 + $0x940] ss:$8 sm:$0xf] %vm963_vm0, %v6195_v10  }
  0x41   :  { %1224 = vst.msk [vmem:[#allocation0 + $0x940] ss:$8 sm:$0xf0] %vm963_vm0, %v6195_v10   ;;  %6416 = vrot.lane.b32.xlu2 %v6415_v35, %s6460_s16 }
  0x42   :  { %1215 = vst.msk [vmem:[#allocation0 + $0x900] ss:$8 sm:$0xf] %vm963_vm0, %v6194_v9  }
  0x43   :  { %1217 = vst.msk [vmem:[#allocation0 + $0x900] ss:$8 sm:$0xf0] %vm963_vm0, %v6194_v9  }
  0x44   :  { %1236 = vst.msk [vmem:[#allocation0 + $0x9c0] ss:$8 sm:$0xf] %vm963_vm0, %v6191_v12  }
  0x45   :  { %1238 = vst.msk [vmem:[#allocation0 + $0x9c0] ss:$8 sm:$0xf0] %vm963_vm0, %v6191_v12  }
  0x46   :  { %1229 = vst.msk [vmem:[#allocation0 + $0x980] ss:$8 sm:$0xf] %vm963_vm0, %v6629_v11   ;;  %6421 = vrot.lane.b32.xlu0 %v6420_v39, %s6460_s16  ;;  %6426 = vrot.lane.b32.xlu1 %v6425_v40, %s6460_s16 }
  0x47   :  { %1231 = vst.msk [vmem:[#allocation0 + $0x980] ss:$8 sm:$0xf0] %vm963_vm0, %v6629_v11  }
  0x48   :  { %1124 = vst.msk [vmem:[#allocation0 + $0x5c0] ss:$8 sm:$0xf] %vm963_vm0, %v6566_v48  }
  0x49   :  { %1126 = vst.msk [vmem:[#allocation0 + $0x5c0] ss:$8 sm:$0xf0] %vm963_vm0, %v6566_v48   ;;  %v6270_v48 = vld [vmem:[%s8664_s0 + $0xe8] sm:$0xff]   ;;  %6431 = vrot.lane.b32.xlu2 %v6430_v51, %s6460_s16 }
  0x4a   :  { %1117 = vst.msk [vmem:[#allocation0 + $0x580] ss:$8 sm:$0xf] %vm963_vm0, %v6564_v47   ;;  %v6765_v55 = vunpack.c.l.bf16 %v6270_v48  ;;  %v6767_v56 = vunpack.c.h.bf16 %v6270_v48 }
  0x4b   :  { %1119 = vst.msk [vmem:[#allocation0 + $0x580] ss:$8 sm:$0xf0] %vm963_vm0, %v6564_v47   ;;  %v6269_v47 = vld [vmem:[%s8664_s0 + $0xf0] sm:$0xff]  }
  0x4c   :  { %1264 = vst.msk [vmem:[#allocation0 + $0xac0] ss:$8 sm:$0xf] %vm963_vm0, %v6664_v22   ;;  %v6146_v57 = vunpack.c.l.bf16 %v6269_v47  ;;  %v6147_v58 = vunpack.c.h.bf16 %v6269_v47  ;;  %v6445_v63 = vpack.i.bf16 %v6767_v56, %v6765_v55 }
  0x4d   :  { %1266 = vst.msk [vmem:[#allocation0 + $0xac0] ss:$8 sm:$0xf0] %vm963_vm0, %v6664_v22  }
  0x4e   :  { %1257 = vst.msk [vmem:[#allocation0 + $0xa80] ss:$8 sm:$0xf] %vm963_vm0, %v6662_v21   ;;  %6436 = vrot.lane.b32.xlu0 %v6435_v52, %s6460_s16  ;;  %6441 = vrot.lane.b32.xlu1 %v6440_v53, %s6460_s16  ;;  %v6450_v0 = vpack.i.bf16 %v6147_v58, %v6146_v57 }
  0x4f   :  { %1259 = vst.msk [vmem:[#allocation0 + $0xa80] ss:$8 sm:$0xf0] %vm963_vm0, %v6662_v21  }
  0x50   :  { %1278 = vst.msk [vmem:[#allocation0 + $0xb40] ss:$8 sm:$0xf] %vm963_vm0, %v6668_v24  }
  0x51   :  { %1280 = vst.msk [vmem:[#allocation0 + $0xb40] ss:$8 sm:$0xf0] %vm963_vm0, %v6668_v24   ;;  %6446 = vrot.lane.b32.xlu2 %v6445_v63, %s6460_s16 }
  0x52   :  { %1271 = vst.msk [vmem:[#allocation0 + $0xb00] ss:$8 sm:$0xf] %vm963_vm0, %v6666_v23  }
  0x53   :  { %1273 = vst.msk [vmem:[#allocation0 + $0xb00] ss:$8 sm:$0xf0] %vm963_vm0, %v6666_v23  }
  0x54   :  { %1166 = vst.msk [vmem:[#allocation0 + $0x740] ss:$8 sm:$0xf] %vm963_vm0, %v6592_v60  }
  0x55   :  { %1168 = vst.msk [vmem:[#allocation0 + $0x740] ss:$8 sm:$0xf0] %vm963_vm0, %v6592_v60  }
  0x56   :  { %1159 = vst.msk [vmem:[#allocation0 + $0x700] ss:$8 sm:$0xf] %vm963_vm0, %v6590_v59   ;;  %6451 = vrot.lane.b32.xlu0 %v6450_v0, %s6460_s16  ;;  %6456 = vrot.lane.b32.xlu1 %v6455_v1, %s6460_s16 }
  0x57   :  { %1161 = vst.msk [vmem:[#allocation0 + $0x700] ss:$8 sm:$0xf0] %vm963_vm0, %v6590_v59  }
  0x58   :  { %1306 = vst.msk [vmem:[#allocation0 + $0xc40] ss:$8 sm:$0xf] %vm963_vm0, %v6705_v34  }
  0x59   :  { %1308 = vst.msk [vmem:[#allocation0 + $0xc40] ss:$8 sm:$0xf0] %vm963_vm0, %v6705_v34  }
  0x5a   :  { %1299 = vst.msk [vmem:[#allocation0 + $0xc00] ss:$8 sm:$0xf] %vm963_vm0, %v6703_v33  }
  0x5b   :  { %1301 = vst.msk [vmem:[#allocation0 + $0xc00] ss:$8 sm:$0xf0] %vm963_vm0, %v6703_v33  }
  0x5c   :  { %1320 = vst.msk [vmem:[#allocation0 + $0xcc0] ss:$8 sm:$0xf] %vm963_vm0, %v6709_v37  }
  0x5d   :  { %1322 = vst.msk [vmem:[#allocation0 + $0xcc0] ss:$8 sm:$0xf0] %vm963_vm0, %v6709_v37  }
  0x5e   :  { %1313 = vst.msk [vmem:[#allocation0 + $0xc80] ss:$8 sm:$0xf] %vm963_vm0, %v6707_v36  }
  0x5f   :  { %1315 = vst.msk [vmem:[#allocation0 + $0xc80] ss:$8 sm:$0xf0] %vm963_vm0, %v6707_v36  }
  0x60   :  { %1208 = vst.msk [vmem:[#allocation0 + $0x8c0] ss:$8 sm:$0xf] %vm963_vm0, %v6622_v8  }
  0x61   :  { %1210 = vst.msk [vmem:[#allocation0 + $0x8c0] ss:$8 sm:$0xf0] %vm963_vm0, %v6622_v8  }
  0x62   :  { %1201 = vst.msk [vmem:[#allocation0 + $0x880] ss:$8 sm:$0xf] %vm963_vm0, %v6620_v7  }
  0x63   :  { %1203 = vst.msk [vmem:[#allocation0 + $0x880] ss:$8 sm:$0xf0] %vm963_vm0, %v6620_v7  }
  0x64   :  { %1348 = vst.msk [vmem:[#allocation0 + $0xdc0] ss:$8 sm:$0xf] %vm963_vm0, %v6159_v46  }
  0x65   :  { %1350 = vst.msk [vmem:[#allocation0 + $0xdc0] ss:$8 sm:$0xf0] %vm963_vm0, %v6159_v46  }
  0x66   :  { %1341 = vst.msk [vmem:[#allocation0 + $0xd80] ss:$8 sm:$0xf] %vm963_vm0, %v6158_v45  }
  0x67   :  { %1343 = vst.msk [vmem:[#allocation0 + $0xd80] ss:$8 sm:$0xf0] %vm963_vm0, %v6158_v45  }
  0x68   :  { %1362 = vst.msk [vmem:[#allocation0 + $0xe40] ss:$8 sm:$0xf] %vm963_vm0, %v6155_v50  }
  0x69   :  { %1364 = vst.msk [vmem:[#allocation0 + $0xe40] ss:$8 sm:$0xf0] %vm963_vm0, %v6155_v50  }
  0x6a   :  { %1355 = vst.msk [vmem:[#allocation0 + $0xe00] ss:$8 sm:$0xf] %vm963_vm0, %v6154_v49  }
  0x6b   :  { %1357 = vst.msk [vmem:[#allocation0 + $0xe00] ss:$8 sm:$0xf0] %vm963_vm0, %v6154_v49  }
  0x6c   :  { %1250 = vst.msk [vmem:[#allocation0 + $0xa40] ss:$8 sm:$0xf] %vm963_vm0, %v6655_v20  }
  0x6d   :  { %1252 = vst.msk [vmem:[#allocation0 + $0xa40] ss:$8 sm:$0xf0] %vm963_vm0, %v6655_v20  }
  0x6e   :  { %1243 = vst.msk [vmem:[#allocation0 + $0xa00] ss:$8 sm:$0xf] %vm963_vm0, %v6653_v19  }
  0x6f   :  { %1245 = vst.msk [vmem:[#allocation0 + $0xa00] ss:$8 sm:$0xf0] %vm963_vm0, %v6653_v19  }
  0x70   :  { %1390 = vst.msk [vmem:[#allocation0 + $0xf40] ss:$8 sm:$0xf] %vm963_vm0, %v6147_v58  }
  0x71   :  { %1392 = vst.msk [vmem:[#allocation0 + $0xf40] ss:$8 sm:$0xf0] %vm963_vm0, %v6147_v58  }
  0x72   :  { %1383 = vst.msk [vmem:[#allocation0 + $0xf00] ss:$8 sm:$0xf] %vm963_vm0, %v6146_v57  }
  0x73   :  { %1385 = vst.msk [vmem:[#allocation0 + $0xf00] ss:$8 sm:$0xf0] %vm963_vm0, %v6146_v57  }
  0x74   :  { %1404 = vst.msk [vmem:[#allocation0 + $0xfc0] ss:$8 sm:$0xf] %vm963_vm0, %v6143_v62  }
  0x75   :  { %1406 = vst.msk [vmem:[#allocation0 + $0xfc0] ss:$8 sm:$0xf0] %vm963_vm0, %v6143_v62  }
  0x76   :  { %1397 = vst.msk [vmem:[#allocation0 + $0xf80] ss:$8 sm:$0xf] %vm963_vm0, %v6142_v61  }
  0x77   :  { %1399 = vst.msk [vmem:[#allocation0 + $0xf80] ss:$8 sm:$0xf0] %vm963_vm0, %v6142_v61  }
  0x78   :  { %1292 = vst.msk [vmem:[#allocation0 + $0xbc0] ss:$8 sm:$0xf] %vm963_vm0, %v6693_v32   ;;  %v6302_v59 = vpop.permute.xlu0 %6301  ;;  %v6850_v60 = vpop.permute.xlu1 %6311 }
  0x79   :  { %1294 = vst.msk [vmem:[#allocation0 + $0xbc0] ss:$8 sm:$0xf0] %vm963_vm0, %v6693_v32   ;;  %v6304_v2 = vunpack.i.h.bf16 %v6302_v59  ;;  %v6303_v3 = vunpack.i.l.bf16 %v6302_v59  ;;  %v6314_v4 = vunpack.i.h.bf16 %v6850_v60  ;;  %v6313_v5 = vunpack.i.l.bf16 %v6850_v60 }
  0x7a   :  { %1285 = vst.msk [vmem:[#allocation0 + $0xb80] ss:$8 sm:$0xf] %vm963_vm0, %v6691_v31  }
  0x7b   :  { %1287 = vst.msk [vmem:[#allocation0 + $0xb80] ss:$8 sm:$0xf0] %vm963_vm0, %v6691_v31  }
  0x7c   :  { %1334 = vst.msk [vmem:[#allocation0 + $0xd40] ss:$8 sm:$0xf] %vm963_vm0, %v6735_v44  }
  0x7d   :  { %1336 = vst.msk [vmem:[#allocation0 + $0xd40] ss:$8 sm:$0xf0] %vm963_vm0, %v6735_v44  }
  0x7e   :  { %1327 = vst.msk [vmem:[#allocation0 + $0xd00] ss:$8 sm:$0xf] %vm963_vm0, %v6733_v43  }
  0x7f   :  { %1329 = vst.msk [vmem:[#allocation0 + $0xd00] ss:$8 sm:$0xf0] %vm963_vm0, %v6733_v43  }
  0x80   :  { %1376 = vst.msk [vmem:[#allocation0 + $0xec0] ss:$8 sm:$0xf] %vm963_vm0, %v6767_v56   ;;  %v6888_v18 = vpop.permute.xlu0 %6306  ;;  %v6935_v48 = vpop.permute.xlu1 %6316 }
  0x81   :  { %1378 = vst.msk [vmem:[#allocation0 + $0xec0] ss:$8 sm:$0xf0] %vm963_vm0, %v6767_v56   ;;  %v6309_v59 = vunpack.i.h.bf16 %v6888_v18  ;;  %v6308_v60 = vunpack.i.l.bf16 %v6888_v18  ;;  %v6993_v18 = vpop.permute.xlu2 %6321 }
  0x82   :  { %1369 = vst.msk [vmem:[#allocation0 + $0xe80] ss:$8 sm:$0xf] %vm963_vm0, %v6765_v55  }
  0x83   :  { %1371 = vst.msk [vmem:[#allocation0 + $0xe80] ss:$8 sm:$0xf0] %vm963_vm0, %v6765_v55  }
  0x84   :  { %1421 = vst.msk [vmem:[#allocation0 + $0x41] ss:$8 sm:$0xf] %vm963_vm0, %v6304_v2  }
  0x85   :  { %1423 = vst.msk [vmem:[#allocation0 + $0x41] ss:$8 sm:$0xf0] %vm963_vm0, %v6304_v2  }
  0x86   :  { %1412 = vst.msk [vmem:[#allocation0 + $0x1] ss:$8 sm:$0xf] %vm963_vm0, %v6303_v3  }
  0x87   :  { %1414 = vst.msk [vmem:[#allocation0 + $0x1] ss:$8 sm:$0xf0] %vm963_vm0, %v6303_v3  }
  0x88   :  { %1457 = vst.msk [vmem:[#allocation0 + $0x141] ss:$8 sm:$0xf] %vm963_vm0, %v6314_v4  }
  0x89   :  { %1459 = vst.msk [vmem:[#allocation0 + $0x141] ss:$8 sm:$0xf0] %vm963_vm0, %v6314_v4  }
  0x8a   :  { %1448 = vst.msk [vmem:[#allocation0 + $0x101] ss:$8 sm:$0xf] %vm963_vm0, %v6313_v5  }
  0x8b   :  { %v2039_v6 = vld [vmem:[#allocation0 + $0x40] sm:$0x3]  ;;  %v2046_v7 = vld [vmem:[#allocation0 + $0x48] sm:$0x3]  ;;  %v2053_v8 = vld [vmem:[#allocation0 + $0x50] sm:$0x3] }
  0x8c   :  { %v2040_v9 = vpack.c.bf16 0.0, %v2039_v6  ;;  %v2047_v10 = vpack.c.bf16 0.0, %v2046_v7  ;;  %v2054_v11 = vpack.c.bf16 0.0, %v2053_v8  ;;  %v2060_v12 = vld [vmem:[#allocation0 + $0x58] sm:$0x3] }
  0x8d   :  { %v2061_v13 = vpack.c.bf16 0.0, %v2060_v12  ;;  %v2067_v14 = vld [vmem:[#allocation0 + $0x60] sm:$0x3]  ;;  %v2074_v15 = vld [vmem:[#allocation0 + $0x68] sm:$0x3] }
  0x8e   :  { %5636 = vst [vmem:[%s8665_s1 + $0x8] sm:$0x1] %v2040_v9  ;;  %v2068_v16 = vpack.c.bf16 0.0, %v2067_v14  ;;  %v2081_v17 = vld [vmem:[#allocation0 + $0x70] sm:$0x3]  ;;  %v2075_v19 = vpack.c.bf16 0.0, %v2074_v15 }
  0x8f   :  { %5637 = vst [vmem:[%s8665_s1 + $0x9] sm:$0x1] %v2047_v10  ;;  %v2088_v20 = vld [vmem:[#allocation0 + $0x78] sm:$0x3]  ;;  %v2082_v21 = vpack.c.bf16 0.0, %v2081_v17 }
  0x90   :  { %5638 = vst [vmem:[%s8665_s1 + $0xa] sm:$0x1] %v2054_v11  ;;  %v1984_v22 = vld [vmem:[#allocation0] sm:$0x3]  ;;  %v2089_v23 = vpack.c.bf16 0.0, %v2088_v20 }
  0x91   :  { %5639 = vst [vmem:[%s8665_s1 + $0xb] sm:$0x1] %v2061_v13  ;;  %v1990_v24 = vld [vmem:[#allocation0 + $0x8] sm:$0x3]  ;;  %v1985_v25 = vpack.c.bf16 0.0, %v1984_v22 }
  0x92   :  { %5640 = vst [vmem:[%s8665_s1 + $0xc] sm:$0x1] %v2068_v16  ;;  %v1997_v26 = vld [vmem:[#allocation0 + $0x10] sm:$0x3]  ;;  %v1991_v27 = vpack.c.bf16 0.0, %v1990_v24 }
  0x93   :  { %5641 = vst [vmem:[%s8665_s1 + $0xd] sm:$0x1] %v2075_v19  ;;  %v2004_v28 = vld [vmem:[#allocation0 + $0x18] sm:$0x3]  ;;  %v1998_v29 = vpack.c.bf16 0.0, %v1997_v26 }
  0x94   :  { %5642 = vst [vmem:[%s8665_s1 + $0xe] sm:$0x1] %v2082_v21  ;;  %v2011_v30 = vld [vmem:[#allocation0 + $0x20] sm:$0x3]  ;;  %v2005_v31 = vpack.c.bf16 0.0, %v2004_v28 }
  0x95   :  { %5643 = vst [vmem:[%s8665_s1 + $0xf] sm:$0x1] %v2089_v23  ;;  %v2018_v32 = vld [vmem:[#allocation0 + $0x28] sm:$0x3]  ;;  %v2012_v33 = vpack.c.bf16 0.0, %v2011_v30 }
  0x96   :  { %1988 = vst [vmem:[%s8665_s1] sm:$0x1] %v1985_v25  ;;  %v2025_v34 = vld [vmem:[#allocation0 + $0x30] sm:$0x3]  ;;  %v2032_v36 = vld [vmem:[#allocation0 + $0x38] sm:$0x3]  ;;  %v2019_v37 = vpack.c.bf16 0.0, %v2018_v32 }
  0x97   :  { %5629 = vst [vmem:[%s8665_s1 + $0x1] sm:$0x1] %v1991_v27  ;;  %v2263_v35 = vld [vmem:[#allocation0 + $0x140] sm:$0x3]  ;;  %v2026_v38 = vpack.c.bf16 0.0, %v2025_v34  ;;  %v2033_v40 = vpack.c.bf16 0.0, %v2032_v36  ;;  %v6319_v36 = vunpack.i.h.bf16 %v6935_v48 }
  0x98   :  { %5630 = vst [vmem:[%s8665_s1 + $0x2] sm:$0x1] %v1998_v29  ;;  %v2270_v39 = vld [vmem:[#allocation0 + $0x148] sm:$0x3]  ;;  %v2277_v41 = vld [vmem:[#allocation0 + $0x150] sm:$0x3] }
  0x99   :  { %5631 = vst [vmem:[%s8665_s1 + $0x3] sm:$0x1] %v2005_v31  ;;  %v2264_v42 = vpack.c.bf16 0.0, %v2263_v35  ;;  %v2284_v43 = vld [vmem:[#allocation0 + $0x158] sm:$0x3]  ;;  %v2271_v44 = vpack.c.bf16 0.0, %v2270_v39 }
  0x9a   :  { %5632 = vst [vmem:[%s8665_s1 + $0x4] sm:$0x1] %v2012_v33  ;;  %v2291_v45 = vld [vmem:[#allocation0 + $0x160] sm:$0x3]  ;;  %v2278_v46 = vpack.c.bf16 0.0, %v2277_v41  ;;  %v2285_v50 = vpack.c.bf16 0.0, %v2284_v43 }
  0x9b   :  { %5633 = vst [vmem:[%s8665_s1 + $0x5] sm:$0x1] %v2019_v37  ;;  %v2298_v49 = vld [vmem:[#allocation0 + $0x168] sm:$0x3]  ;;  %v2305_v51 = vld [vmem:[#allocation0 + $0x170] sm:$0x3]  ;;  %v6318_v37 = vunpack.i.l.bf16 %v6935_v48 }
  0x9c   :  { %5634 = vst [vmem:[%s8665_s1 + $0x6] sm:$0x1] %v2026_v38  ;;  %v2292_v52 = vpack.c.bf16 0.0, %v2291_v45  ;;  %v2312_v53 = vld [vmem:[#allocation0 + $0x178] sm:$0x3]  ;;  %v2299_v47 = vpack.c.bf16 0.0, %v2298_v49 }
  0x9d   :  { %5635 = vst [vmem:[%s8665_s1 + $0x7] sm:$0x1] %v2033_v40  ;;  %v2306_v54 = vpack.c.bf16 0.0, %v2305_v51  ;;  %v2207_v55 = vld [vmem:[#allocation0 + $0x100] sm:$0x3]  ;;  %v2313_v56 = vpack.c.bf16 0.0, %v2312_v53 }
  0x9e   :  { %5668 = vst [vmem:[%s8665_s1 + $0x28] sm:$0x1] %v2264_v42  ;;  %v2214_v57 = vld [vmem:[#allocation0 + $0x108] sm:$0x3]  ;;  %v2221_v58 = vld [vmem:[#allocation0 + $0x110] sm:$0x3] }
  0x9f   :  { %5669 = vst [vmem:[%s8665_s1 + $0x29] sm:$0x1] %v2271_v44  ;;  %v2208_v61 = vpack.c.bf16 0.0, %v2207_v55  ;;  %v2228_v62 = vld [vmem:[#allocation0 + $0x118] sm:$0x3]  ;;  %v2215_v63 = vpack.c.bf16 0.0, %v2214_v57 }
  0xa0   :  { %5670 = vst [vmem:[%s8665_s1 + $0x2a] sm:$0x1] %v2278_v46  ;;  %v2222_v0 = vpack.c.bf16 0.0, %v2221_v58  ;;  %v2229_v1 = vpack.c.bf16 0.0, %v2228_v62 }
  0xa1   :  { %5671 = vst [vmem:[%s8665_s1 + $0x2b] sm:$0x1] %v2285_v50 }
  0xa2   :  { %5672 = vst [vmem:[%s8665_s1 + $0x2c] sm:$0x1] %v2292_v52 }
  0xa3   :  { %5673 = vst [vmem:[%s8665_s1 + $0x2d] sm:$0x1] %v2299_v47 }
  0xa4   :  { %5674 = vst [vmem:[%s8665_s1 + $0x2e] sm:$0x1] %v2306_v54 }
  0xa5   :  { %5675 = vst [vmem:[%s8665_s1 + $0x2f] sm:$0x1] %v2313_v56 }
  0xa6   :  { %1450 = vst.msk [vmem:[#allocation0 + $0x101] ss:$8 sm:$0xf0] %vm963_vm0, %v6313_v5  }
  0xa7   :  { %5660 = vst [vmem:[%s8665_s1 + $0x20] sm:$0x1] %v2208_v61 }
  0xa8   :  { %5661 = vst [vmem:[%s8665_s1 + $0x21] sm:$0x1] %v2215_v63 }
  0xa9   :  { %5662 = vst [vmem:[%s8665_s1 + $0x22] sm:$0x1] %v2222_v0 }
  0xaa   :  { %5663 = vst [vmem:[%s8665_s1 + $0x23] sm:$0x1] %v2229_v1 }
  0xab   :  { %1439 = vst.msk [vmem:[#allocation0 + $0xc1] ss:$8 sm:$0xf] %vm963_vm0, %v6309_v59  }
  0xac   :  { %1441 = vst.msk [vmem:[#allocation0 + $0xc1] ss:$8 sm:$0xf0] %vm963_vm0, %v6309_v59  }
  0xad   :  { %v2235_v2 = vld [vmem:[#allocation0 + $0x120] sm:$0x3]  ;;  %v2242_v3 = vld [vmem:[#allocation0 + $0x128] sm:$0x3]  ;;  %v2249_v4 = vld [vmem:[#allocation0 + $0x130] sm:$0x3] }
  0xae   :  { %v2236_v5 = vpack.c.bf16 0.0, %v2235_v2  ;;  %v2243_v6 = vpack.c.bf16 0.0, %v2242_v3  ;;  %v2250_v7 = vpack.c.bf16 0.0, %v2249_v4  ;;  %v2256_v8 = vld [vmem:[#allocation0 + $0x138] sm:$0x3]  ;;  %v7073_v4 = vpop.permute.xlu2 %6326 }
  0xaf   :  { %v2257_v9 = vpack.c.bf16 0.0, %v2256_v8  ;;  %1430 = vst.msk [vmem:[#allocation0 + $0x81] ss:$8 sm:$0xf] %vm963_vm0, %v6308_v60  }
  0xb0   :  { %5664 = vst [vmem:[%s8665_s1 + $0x24] sm:$0x1] %v2236_v5 }
  0xb1   :  { %5665 = vst [vmem:[%s8665_s1 + $0x25] sm:$0x1] %v2243_v6  ;;  %v6324_v6 = vunpack.i.h.bf16 %v6993_v18 }
  0xb2   :  { %5666 = vst [vmem:[%s8665_s1 + $0x26] sm:$0x1] %v2250_v7  ;;  %v2151_v10 = vld [vmem:[#allocation0 + $0xc0] sm:$0x3]  ;;  %v2158_v11 = vld [vmem:[#allocation0 + $0xc8] sm:$0x3]  ;;  %v6323_v7 = vunpack.i.l.bf16 %v6993_v18 }
  0xb3   :  { %5667 = vst [vmem:[%s8665_s1 + $0x27] sm:$0x1] %v2257_v9  ;;  %v2152_v12 = vpack.c.bf16 0.0, %v2151_v10  ;;  %v2159_v13 = vpack.c.bf16 0.0, %v2158_v11  ;;  %v2165_v14 = vld [vmem:[#allocation0 + $0xd0] sm:$0x3] }
  0xb4   :  { %v2166_v15 = vpack.c.bf16 0.0, %v2165_v14  ;;  %v2172_v16 = vld [vmem:[#allocation0 + $0xd8] sm:$0x3]  ;;  %v2179_v17 = vld [vmem:[#allocation0 + $0xe0] sm:$0x3] }
  0xb5   :  { %5652 = vst [vmem:[%s8665_s1 + $0x18] sm:$0x1] %v2152_v12  ;;  %v2173_v19 = vpack.c.bf16 0.0, %v2172_v16  ;;  %v2180_v20 = vpack.c.bf16 0.0, %v2179_v17  ;;  %v2186_v21 = vld [vmem:[#allocation0 + $0xe8] sm:$0x3] }
  0xb6   :  { %5653 = vst [vmem:[%s8665_s1 + $0x19] sm:$0x1] %v2159_v13  ;;  %v2187_v22 = vpack.c.bf16 0.0, %v2186_v21  ;;  %v2193_v23 = vld [vmem:[#allocation0 + $0xf0] sm:$0x3] }
  0xb7   :  { %5654 = vst [vmem:[%s8665_s1 + $0x1a] sm:$0x1] %v2166_v15  ;;  %v2194_v24 = vpack.c.bf16 0.0, %v2193_v23  ;;  %v2200_v25 = vld [vmem:[#allocation0 + $0xf8] sm:$0x3] }
  0xb8   :  { %5655 = vst [vmem:[%s8665_s1 + $0x1b] sm:$0x1] %v2173_v19  ;;  %v2201_v26 = vpack.c.bf16 0.0, %v2200_v25  ;;  %v2095_v27 = vld [vmem:[#allocation0 + $0x80] sm:$0x3] }
  0xb9   :  { %5656 = vst [vmem:[%s8665_s1 + $0x1c] sm:$0x1] %v2180_v20  ;;  %v2102_v28 = vld [vmem:[#allocation0 + $0x88] sm:$0x3]  ;;  %v2096_v29 = vpack.c.bf16 0.0, %v2095_v27 }
  0xba   :  { %5657 = vst [vmem:[%s8665_s1 + $0x1d] sm:$0x1] %v2187_v22  ;;  %v2109_v30 = vld [vmem:[#allocation0 + $0x90] sm:$0x3]  ;;  %v2103_v31 = vpack.c.bf16 0.0, %v2102_v28 }
  0xbb   :  { %5658 = vst [vmem:[%s8665_s1 + $0x1e] sm:$0x1] %v2194_v24  ;;  %v2116_v32 = vld [vmem:[#allocation0 + $0x98] sm:$0x3]  ;;  %v2110_v33 = vpack.c.bf16 0.0, %v2109_v30  ;;  %v7105_v24 = vpop.permute.xlu0 %6331 }
  0xbc   :  { %5659 = vst [vmem:[%s8665_s1 + $0x1f] sm:$0x1] %v2201_v26  ;;  %v2117_v34 = vpack.c.bf16 0.0, %v2116_v32 }
  0xbd   :  { %1432 = vst.msk [vmem:[#allocation0 + $0x81] ss:$8 sm:$0xf0] %vm963_vm0, %v6308_v60  }
  0xbe   :  { %5644 = vst [vmem:[%s8665_s1 + $0x10] sm:$0x1] %v2096_v29 }
  0xbf   :  { %5645 = vst [vmem:[%s8665_s1 + $0x11] sm:$0x1] %v2103_v31 }
  0xc0   :  { %5646 = vst [vmem:[%s8665_s1 + $0x12] sm:$0x1] %v2110_v33 }
  0xc1   :  { %5647 = vst [vmem:[%s8665_s1 + $0x13] sm:$0x1] %v2117_v34 }
  0xc2   :  { %1475 = vst.msk [vmem:[#allocation0 + $0x1c1] ss:$8 sm:$0xf] %vm963_vm0, %v6319_v36  }
  0xc3   :  { %1477 = vst.msk [vmem:[#allocation0 + $0x1c1] ss:$8 sm:$0xf0] %vm963_vm0, %v6319_v36  }
  0xc4   :  { %v2123_v35 = vld [vmem:[#allocation0 + $0xa0] sm:$0x3]  ;;  %v2130_v38 = vld [vmem:[#allocation0 + $0xa8] sm:$0x3]  ;;  %v2137_v39 = vld [vmem:[#allocation0 + $0xb0] sm:$0x3] }
  0xc5   :  { %v2124_v40 = vpack.c.bf16 0.0, %v2123_v35  ;;  %v2131_v41 = vpack.c.bf16 0.0, %v2130_v38  ;;  %v2138_v42 = vpack.c.bf16 0.0, %v2137_v39  ;;  %v2144_v43 = vld [vmem:[#allocation0 + $0xb8] sm:$0x3] }
  0xc6   :  { %v2145_v44 = vpack.c.bf16 0.0, %v2144_v43  ;;  %1466 = vst.msk [vmem:[#allocation0 + $0x181] ss:$8 sm:$0xf] %vm963_vm0, %v6318_v37  }
  0xc7   :  { %5648 = vst [vmem:[%s8665_s1 + $0x14] sm:$0x1] %v2124_v40 }
  0xc8   :  { %5649 = vst [vmem:[%s8665_s1 + $0x15] sm:$0x1] %v2131_v41  ;;  %v6329_v41 = vunpack.i.h.bf16 %v7073_v4 }
  0xc9   :  { %5650 = vst [vmem:[%s8665_s1 + $0x16] sm:$0x1] %v2138_v42  ;;  %v2375_v45 = vld [vmem:[#allocation0 + $0x1c0] sm:$0x3]  ;;  %v2382_v46 = vld [vmem:[#allocation0 + $0x1c8] sm:$0x3]  ;;  %v6328_v42 = vunpack.i.l.bf16 %v7073_v4 }
  0xca   :  { %5651 = vst [vmem:[%s8665_s1 + $0x17] sm:$0x1] %v2145_v44  ;;  %v2376_v49 = vpack.c.bf16 0.0, %v2375_v45  ;;  %v2383_v50 = vpack.c.bf16 0.0, %v2382_v46  ;;  %v2389_v51 = vld [vmem:[#allocation0 + $0x1d0] sm:$0x3] }
  0xcb   :  { %v2390_v48 = vpack.c.bf16 0.0, %v2389_v51  ;;  %v2396_v52 = vld [vmem:[#allocation0 + $0x1d8] sm:$0x3]  ;;  %v2403_v53 = vld [vmem:[#allocation0 + $0x1e0] sm:$0x3] }
  0xcc   :  { %5684 = vst [vmem:[%s8665_s1 + $0x38] sm:$0x1] %v2376_v49  ;;  %v2397_v47 = vpack.c.bf16 0.0, %v2396_v52  ;;  %v2404_v54 = vpack.c.bf16 0.0, %v2403_v53  ;;  %v2410_v55 = vld [vmem:[#allocation0 + $0x1e8] sm:$0x3] }
  0xcd   :  { %5685 = vst [vmem:[%s8665_s1 + $0x39] sm:$0x1] %v2383_v50  ;;  %v2411_v56 = vpack.c.bf16 0.0, %v2410_v55  ;;  %v2417_v57 = vld [vmem:[#allocation0 + $0x1f0] sm:$0x3] }
  0xce   :  { %5686 = vst [vmem:[%s8665_s1 + $0x3a] sm:$0x1] %v2390_v48  ;;  %v2418_v58 = vpack.c.bf16 0.0, %v2417_v57  ;;  %v2424_v61 = vld [vmem:[#allocation0 + $0x1f8] sm:$0x3] }
  0xcf   :  { %5687 = vst [vmem:[%s8665_s1 + $0x3b] sm:$0x1] %v2397_v47  ;;  %v2425_v62 = vpack.c.bf16 0.0, %v2424_v61  ;;  %v2319_v63 = vld [vmem:[#allocation0 + $0x180] sm:$0x3]  ;;  %v7161_v61 = vpop.permute.xlu1 %6336 }
  0xd0   :  { %5688 = vst [vmem:[%s8665_s1 + $0x3c] sm:$0x1] %v2404_v54  ;;  %v2326_v0 = vld [vmem:[#allocation0 + $0x188] sm:$0x3]  ;;  %v2320_v1 = vpack.c.bf16 0.0, %v2319_v63 }
  0xd1   :  { %5689 = vst [vmem:[%s8665_s1 + $0x3d] sm:$0x1] %v2411_v56  ;;  %v2333_v59 = vld [vmem:[#allocation0 + $0x190] sm:$0x3]  ;;  %v2327_v60 = vpack.c.bf16 0.0, %v2326_v0 }
  0xd2   :  { %5690 = vst [vmem:[%s8665_s1 + $0x3e] sm:$0x1] %v2418_v58  ;;  %v2340_v2 = vld [vmem:[#allocation0 + $0x198] sm:$0x3]  ;;  %v2334_v3 = vpack.c.bf16 0.0, %v2333_v59 }
  0xd3   :  { %5691 = vst [vmem:[%s8665_s1 + $0x3f] sm:$0x1] %v2425_v62  ;;  %v2341_v5 = vpack.c.bf16 0.0, %v2340_v2 }
  0xd4   :  { %1468 = vst.msk [vmem:[#allocation0 + $0x181] ss:$8 sm:$0xf0] %vm963_vm0, %v6318_v37  }
  0xd5   :  { %5676 = vst [vmem:[%s8665_s1 + $0x30] sm:$0x1] %v2320_v1 }
  0xd6   :  { %5677 = vst [vmem:[%s8665_s1 + $0x31] sm:$0x1] %v2327_v60 }
  0xd7   :  { %5678 = vst [vmem:[%s8665_s1 + $0x32] sm:$0x1] %v2334_v3 }
  0xd8   :  { %5679 = vst [vmem:[%s8665_s1 + $0x33] sm:$0x1] %v2341_v5 }
  0xd9   :  { %1493 = vst.msk [vmem:[#allocation0 + $0x241] ss:$8 sm:$0xf] %vm963_vm0, %v6324_v6  }
  0xda   :  { %1495 = vst.msk [vmem:[#allocation0 + $0x241] ss:$8 sm:$0xf0] %vm963_vm0, %v6324_v6  }
  0xdb   :  { %v2347_v8 = vld [vmem:[#allocation0 + $0x1a0] sm:$0x3]  ;;  %v2354_v9 = vld [vmem:[#allocation0 + $0x1a8] sm:$0x3]  ;;  %v2361_v10 = vld [vmem:[#allocation0 + $0x1b0] sm:$0x3] }
  0xdc   :  { %v2348_v11 = vpack.c.bf16 0.0, %v2347_v8  ;;  %v2355_v12 = vpack.c.bf16 0.0, %v2354_v9  ;;  %v2362_v13 = vpack.c.bf16 0.0, %v2361_v10  ;;  %v2368_v14 = vld [vmem:[#allocation0 + $0x1b8] sm:$0x3] }
  0xdd   :  { %v2369_v15 = vpack.c.bf16 0.0, %v2368_v14  ;;  %1484 = vst.msk [vmem:[#allocation0 + $0x201] ss:$8 sm:$0xf] %vm963_vm0, %v6323_v7  }
  0xde   :  { %5680 = vst [vmem:[%s8665_s1 + $0x34] sm:$0x1] %v2348_v11 }
  0xdf   :  { %5681 = vst [vmem:[%s8665_s1 + $0x35] sm:$0x1] %v2355_v12  ;;  %v6334_v12 = vunpack.i.h.bf16 %v7105_v24 }
  0xe0   :  { %5682 = vst [vmem:[%s8665_s1 + $0x36] sm:$0x1] %v2362_v13  ;;  %v2487_v16 = vld [vmem:[#allocation0 + $0x240] sm:$0x3]  ;;  %v2494_v17 = vld [vmem:[#allocation0 + $0x248] sm:$0x3]  ;;  %v6333_v13 = vunpack.i.l.bf16 %v7105_v24 }
  0xe1   :  { %5683 = vst [vmem:[%s8665_s1 + $0x37] sm:$0x1] %v2369_v15  ;;  %v2488_v18 = vpack.c.bf16 0.0, %v2487_v16  ;;  %v2495_v19 = vpack.c.bf16 0.0, %v2494_v17  ;;  %v2501_v20 = vld [vmem:[#allocation0 + $0x250] sm:$0x3] }
  0xe2   :  { %v2502_v21 = vpack.c.bf16 0.0, %v2501_v20  ;;  %v2508_v22 = vld [vmem:[#allocation0 + $0x258] sm:$0x3]  ;;  %v2515_v23 = vld [vmem:[#allocation0 + $0x260] sm:$0x3] }
  0xe3   :  { %5700 = vst [vmem:[%s8665_s1 + $0x48] sm:$0x1] %v2488_v18  ;;  %v2509_v25 = vpack.c.bf16 0.0, %v2508_v22  ;;  %v2516_v26 = vpack.c.bf16 0.0, %v2515_v23  ;;  %v2522_v27 = vld [vmem:[#allocation0 + $0x268] sm:$0x3] }
  0xe4   :  { %5701 = vst [vmem:[%s8665_s1 + $0x49] sm:$0x1] %v2495_v19  ;;  %v2523_v28 = vpack.c.bf16 0.0, %v2522_v27  ;;  %v2529_v29 = vld [vmem:[#allocation0 + $0x270] sm:$0x3] }
  0xe5   :  { %5702 = vst [vmem:[%s8665_s1 + $0x4a] sm:$0x1] %v2502_v21  ;;  %v2530_v30 = vpack.c.bf16 0.0, %v2529_v29  ;;  %v2536_v31 = vld [vmem:[#allocation0 + $0x278] sm:$0x3] }
  0xe6   :  { %5703 = vst [vmem:[%s8665_s1 + $0x4b] sm:$0x1] %v2509_v25  ;;  %v2537_v32 = vpack.c.bf16 0.0, %v2536_v31  ;;  %v2431_v33 = vld [vmem:[#allocation0 + $0x200] sm:$0x3] }
  0xe7   :  { %5704 = vst [vmem:[%s8665_s1 + $0x4c] sm:$0x1] %v2516_v26  ;;  %v2438_v34 = vld [vmem:[#allocation0 + $0x208] sm:$0x3]  ;;  %v2432_v36 = vpack.c.bf16 0.0, %v2431_v33 }
  0xe8   :  { %5705 = vst [vmem:[%s8665_s1 + $0x4d] sm:$0x1] %v2523_v28  ;;  %v2445_v37 = vld [vmem:[#allocation0 + $0x210] sm:$0x3]  ;;  %v2439_v35 = vpack.c.bf16 0.0, %v2438_v34 }
  0xe9   :  { %5706 = vst [vmem:[%s8665_s1 + $0x4e] sm:$0x1] %v2530_v30  ;;  %v2452_v38 = vld [vmem:[#allocation0 + $0x218] sm:$0x3]  ;;  %v2446_v39 = vpack.c.bf16 0.0, %v2445_v37 }
  0xea   :  { %5707 = vst [vmem:[%s8665_s1 + $0x4f] sm:$0x1] %v2537_v32  ;;  %v2453_v40 = vpack.c.bf16 0.0, %v2452_v38 }
  0xeb   :  { %1486 = vst.msk [vmem:[#allocation0 + $0x201] ss:$8 sm:$0xf0] %vm963_vm0, %v6323_v7  }
  0xec   :  { %5692 = vst [vmem:[%s8665_s1 + $0x40] sm:$0x1] %v2432_v36 }
  0xed   :  { %5693 = vst [vmem:[%s8665_s1 + $0x41] sm:$0x1] %v2439_v35 }
  0xee   :  { %5694 = vst [vmem:[%s8665_s1 + $0x42] sm:$0x1] %v2446_v39 }
  0xef   :  { %5695 = vst [vmem:[%s8665_s1 + $0x43] sm:$0x1] %v2453_v40 }
  0xf0   :  { %1511 = vst.msk [vmem:[#allocation0 + $0x2c1] ss:$8 sm:$0xf] %vm963_vm0, %v6329_v41  }
  0xf1   :  { %1513 = vst.msk [vmem:[#allocation0 + $0x2c1] ss:$8 sm:$0xf0] %vm963_vm0, %v6329_v41  }
  0xf2   :  { %v2459_v43 = vld [vmem:[#allocation0 + $0x220] sm:$0x3]  ;;  %v2466_v44 = vld [vmem:[#allocation0 + $0x228] sm:$0x3]  ;;  %v2473_v45 = vld [vmem:[#allocation0 + $0x230] sm:$0x3] }
  0xf3   :  { %v2460_v46 = vpack.c.bf16 0.0, %v2459_v43  ;;  %v2467_v49 = vpack.c.bf16 0.0, %v2466_v44  ;;  %v2474_v50 = vpack.c.bf16 0.0, %v2473_v45  ;;  %v2480_v51 = vld [vmem:[#allocation0 + $0x238] sm:$0x3]  ;;  %v7241_v45 = vpop.permute.xlu2 %6341 }
  0xf4   :  { %v2481_v48 = vpack.c.bf16 0.0, %v2480_v51  ;;  %1502 = vst.msk [vmem:[#allocation0 + $0x281] ss:$8 sm:$0xf] %vm963_vm0, %v6328_v42  }
  0xf5   :  { %5696 = vst [vmem:[%s8665_s1 + $0x44] sm:$0x1] %v2460_v46 }
  0xf6   :  { %5697 = vst [vmem:[%s8665_s1 + $0x45] sm:$0x1] %v2467_v49  ;;  %v6339_v49 = vunpack.i.h.bf16 %v7161_v61 }
  0xf7   :  { %5698 = vst [vmem:[%s8665_s1 + $0x46] sm:$0x1] %v2474_v50  ;;  %v2599_v52 = vld [vmem:[#allocation0 + $0x2c0] sm:$0x3]  ;;  %v2606_v53 = vld [vmem:[#allocation0 + $0x2c8] sm:$0x3]  ;;  %v6338_v50 = vunpack.i.l.bf16 %v7161_v61 }
  0xf8   :  { %5699 = vst [vmem:[%s8665_s1 + $0x47] sm:$0x1] %v2481_v48  ;;  %v2600_v47 = vpack.c.bf16 0.0, %v2599_v52  ;;  %v2607_v54 = vpack.c.bf16 0.0, %v2606_v53  ;;  %v2613_v55 = vld [vmem:[#allocation0 + $0x2d0] sm:$0x3] }
  0xf9   :  { %v2614_v56 = vpack.c.bf16 0.0, %v2613_v55  ;;  %v2620_v57 = vld [vmem:[#allocation0 + $0x2d8] sm:$0x3]  ;;  %v2627_v58 = vld [vmem:[#allocation0 + $0x2e0] sm:$0x3] }
  0xfa   :  { %5716 = vst [vmem:[%s8665_s1 + $0x58] sm:$0x1] %v2600_v47  ;;  %v2621_v62 = vpack.c.bf16 0.0, %v2620_v57  ;;  %v2628_v63 = vpack.c.bf16 0.0, %v2627_v58  ;;  %v2634_v0 = vld [vmem:[#allocation0 + $0x2e8] sm:$0x3] }
  0xfb   :  { %5717 = vst [vmem:[%s8665_s1 + $0x59] sm:$0x1] %v2607_v54  ;;  %v2635_v1 = vpack.c.bf16 0.0, %v2634_v0  ;;  %v2641_v59 = vld [vmem:[#allocation0 + $0x2f0] sm:$0x3] }
  0xfc   :  { %5718 = vst [vmem:[%s8665_s1 + $0x5a] sm:$0x1] %v2614_v56  ;;  %v2642_v60 = vpack.c.bf16 0.0, %v2641_v59  ;;  %v2648_v2 = vld [vmem:[#allocation0 + $0x2f8] sm:$0x3] }
  0xfd   :  { %5719 = vst [vmem:[%s8665_s1 + $0x5b] sm:$0x1] %v2621_v62  ;;  %v2649_v3 = vpack.c.bf16 0.0, %v2648_v2  ;;  %v2543_v4 = vld [vmem:[#allocation0 + $0x280] sm:$0x3] }
  0xfe   :  { %5720 = vst [vmem:[%s8665_s1 + $0x5c] sm:$0x1] %v2628_v63  ;;  %v2550_v5 = vld [vmem:[#allocation0 + $0x288] sm:$0x3]  ;;  %v2544_v6 = vpack.c.bf16 0.0, %v2543_v4 }
  0xff   :  { %5721 = vst [vmem:[%s8665_s1 + $0x5d] sm:$0x1] %v2635_v1  ;;  %v2557_v7 = vld [vmem:[#allocation0 + $0x290] sm:$0x3]  ;;  %v2551_v8 = vpack.c.bf16 0.0, %v2550_v5 }
 0x100   :  { %5722 = vst [vmem:[%s8665_s1 + $0x5e] sm:$0x1] %v2642_v60  ;;  %v2564_v9 = vld [vmem:[#allocation0 + $0x298] sm:$0x3]  ;;  %v2558_v10 = vpack.c.bf16 0.0, %v2557_v7  ;;  %v7273_v60 = vpop.permute.xlu0 %6346 }
 0x101   :  { %5723 = vst [vmem:[%s8665_s1 + $0x5f] sm:$0x1] %v2649_v3  ;;  %v2565_v11 = vpack.c.bf16 0.0, %v2564_v9 }
 0x102   :  { %1504 = vst.msk [vmem:[#allocation0 + $0x281] ss:$8 sm:$0xf0] %vm963_vm0, %v6328_v42  }
 0x103   :  { %5708 = vst [vmem:[%s8665_s1 + $0x50] sm:$0x1] %v2544_v6 }
 0x104   :  { %5709 = vst [vmem:[%s8665_s1 + $0x51] sm:$0x1] %v2551_v8 }
 0x105   :  { %5710 = vst [vmem:[%s8665_s1 + $0x52] sm:$0x1] %v2558_v10 }
 0x106   :  { %5711 = vst [vmem:[%s8665_s1 + $0x53] sm:$0x1] %v2565_v11 }
 0x107   :  { %1529 = vst.msk [vmem:[#allocation0 + $0x341] ss:$8 sm:$0xf] %vm963_vm0, %v6334_v12  }
 0x108   :  { %1531 = vst.msk [vmem:[#allocation0 + $0x341] ss:$8 sm:$0xf0] %vm963_vm0, %v6334_v12  }
 0x109   :  { %v2571_v14 = vld [vmem:[#allocation0 + $0x2a0] sm:$0x3]  ;;  %v2578_v15 = vld [vmem:[#allocation0 + $0x2a8] sm:$0x3]  ;;  %v2585_v16 = vld [vmem:[#allocation0 + $0x2b0] sm:$0x3] }
 0x10a   :  { %v2572_v17 = vpack.c.bf16 0.0, %v2571_v14  ;;  %v2579_v18 = vpack.c.bf16 0.0, %v2578_v15  ;;  %v2586_v19 = vpack.c.bf16 0.0, %v2585_v16  ;;  %v2592_v20 = vld [vmem:[#allocation0 + $0x2b8] sm:$0x3] }
 0x10b   :  { %v2593_v21 = vpack.c.bf16 0.0, %v2592_v20  ;;  %1520 = vst.msk [vmem:[#allocation0 + $0x301] ss:$8 sm:$0xf] %vm963_vm0, %v6333_v13  }
 0x10c   :  { %5712 = vst [vmem:[%s8665_s1 + $0x54] sm:$0x1] %v2572_v17 }
 0x10d   :  { %5713 = vst [vmem:[%s8665_s1 + $0x55] sm:$0x1] %v2579_v18  ;;  %v6344_v18 = vunpack.i.h.bf16 %v7241_v45 }
 0x10e   :  { %5714 = vst [vmem:[%s8665_s1 + $0x56] sm:$0x1] %v2586_v19  ;;  %v2711_v22 = vld [vmem:[#allocation0 + $0x340] sm:$0x3]  ;;  %v2718_v23 = vld [vmem:[#allocation0 + $0x348] sm:$0x3]  ;;  %v6343_v19 = vunpack.i.l.bf16 %v7241_v45 }
 0x10f   :  { %5715 = vst [vmem:[%s8665_s1 + $0x57] sm:$0x1] %v2593_v21  ;;  %v2712_v24 = vpack.c.bf16 0.0, %v2711_v22  ;;  %v2719_v25 = vpack.c.bf16 0.0, %v2718_v23  ;;  %v2725_v26 = vld [vmem:[#allocation0 + $0x350] sm:$0x3] }
 0x110   :  { %v2726_v27 = vpack.c.bf16 0.0, %v2725_v26  ;;  %v2732_v28 = vld [vmem:[#allocation0 + $0x358] sm:$0x3]  ;;  %v2739_v29 = vld [vmem:[#allocation0 + $0x360] sm:$0x3] }
 0x111   :  { %5732 = vst [vmem:[%s8665_s1 + $0x68] sm:$0x1] %v2712_v24  ;;  %v2733_v30 = vpack.c.bf16 0.0, %v2732_v28  ;;  %v2740_v31 = vpack.c.bf16 0.0, %v2739_v29  ;;  %v2746_v32 = vld [vmem:[#allocation0 + $0x368] sm:$0x3] }
 0x112   :  { %5733 = vst [vmem:[%s8665_s1 + $0x69] sm:$0x1] %v2719_v25  ;;  %v2747_v33 = vpack.c.bf16 0.0, %v2746_v32  ;;  %v2753_v34 = vld [vmem:[#allocation0 + $0x370] sm:$0x3] }
 0x113   :  { %5734 = vst [vmem:[%s8665_s1 + $0x6a] sm:$0x1] %v2726_v27  ;;  %v2754_v36 = vpack.c.bf16 0.0, %v2753_v34  ;;  %v2760_v37 = vld [vmem:[#allocation0 + $0x378] sm:$0x3] }
 0x114   :  { %5735 = vst [vmem:[%s8665_s1 + $0x6b] sm:$0x1] %v2733_v30  ;;  %v2761_v35 = vpack.c.bf16 0.0, %v2760_v37  ;;  %v2655_v38 = vld [vmem:[#allocation0 + $0x300] sm:$0x3]  ;;  %v7329_v37 = vpop.permute.xlu1 %6351 }
 0x115   :  { %5736 = vst [vmem:[%s8665_s1 + $0x6c] sm:$0x1] %v2740_v31  ;;  %v2662_v39 = vld [vmem:[#allocation0 + $0x308] sm:$0x3]  ;;  %v2656_v40 = vpack.c.bf16 0.0, %v2655_v38 }
 0x116   :  { %5737 = vst [vmem:[%s8665_s1 + $0x6d] sm:$0x1] %v2747_v33  ;;  %v2669_v41 = vld [vmem:[#allocation0 + $0x310] sm:$0x3]  ;;  %v2663_v42 = vpack.c.bf16 0.0, %v2662_v39 }
 0x117   :  { %5738 = vst [vmem:[%s8665_s1 + $0x6e] sm:$0x1] %v2754_v36  ;;  %v2676_v43 = vld [vmem:[#allocation0 + $0x318] sm:$0x3]  ;;  %v2670_v44 = vpack.c.bf16 0.0, %v2669_v41 }
 0x118   :  { %5739 = vst [vmem:[%s8665_s1 + $0x6f] sm:$0x1] %v2761_v35  ;;  %v2677_v46 = vpack.c.bf16 0.0, %v2676_v43 }
 0x119   :  { %1522 = vst.msk [vmem:[#allocation0 + $0x301] ss:$8 sm:$0xf0] %vm963_vm0, %v6333_v13  }
 0x11a   :  { %5724 = vst [vmem:[%s8665_s1 + $0x60] sm:$0x1] %v2656_v40 }
 0x11b   :  { %5725 = vst [vmem:[%s8665_s1 + $0x61] sm:$0x1] %v2663_v42 }
 0x11c   :  { %5726 = vst [vmem:[%s8665_s1 + $0x62] sm:$0x1] %v2670_v44 }
 0x11d   :  { %5727 = vst [vmem:[%s8665_s1 + $0x63] sm:$0x1] %v2677_v46 }
 0x11e   :  { %1547 = vst.msk [vmem:[#allocation0 + $0x3c1] ss:$8 sm:$0xf] %vm963_vm0, %v6339_v49  }
 0x11f   :  { %1549 = vst.msk [vmem:[#allocation0 + $0x3c1] ss:$8 sm:$0xf0] %vm963_vm0, %v6339_v49  }
 0x120   :  { %v2683_v51 = vld [vmem:[#allocation0 + $0x320] sm:$0x3]  ;;  %v2690_v48 = vld [vmem:[#allocation0 + $0x328] sm:$0x3]  ;;  %v2697_v52 = vld [vmem:[#allocation0 + $0x330] sm:$0x3] }
 0x121   :  { %v2684_v53 = vpack.c.bf16 0.0, %v2683_v51  ;;  %v2691_v47 = vpack.c.bf16 0.0, %v2690_v48  ;;  %v2698_v54 = vpack.c.bf16 0.0, %v2697_v52  ;;  %v2704_v55 = vld [vmem:[#allocation0 + $0x338] sm:$0x3] }
 0x122   :  { %v2705_v56 = vpack.c.bf16 0.0, %v2704_v55  ;;  %1538 = vst.msk [vmem:[#allocation0 + $0x381] ss:$8 sm:$0xf] %vm963_vm0, %v6338_v50  }
 0x123   :  { %5728 = vst [vmem:[%s8665_s1 + $0x64] sm:$0x1] %v2684_v53 }
 0x124   :  { %5729 = vst [vmem:[%s8665_s1 + $0x65] sm:$0x1] %v2691_v47  ;;  %v6349_v47 = vunpack.i.h.bf16 %v7273_v60 }
 0x125   :  { %5730 = vst [vmem:[%s8665_s1 + $0x66] sm:$0x1] %v2698_v54  ;;  %v2823_v57 = vld [vmem:[#allocation0 + $0x3c0] sm:$0x3]  ;;  %v2830_v58 = vld [vmem:[#allocation0 + $0x3c8] sm:$0x3]  ;;  %v6348_v54 = vunpack.i.l.bf16 %v7273_v60 }
 0x126   :  { %5731 = vst [vmem:[%s8665_s1 + $0x67] sm:$0x1] %v2705_v56  ;;  %v2824_v61 = vpack.c.bf16 0.0, %v2823_v57  ;;  %v2831_v62 = vpack.c.bf16 0.0, %v2830_v58  ;;  %v2837_v63 = vld [vmem:[#allocation0 + $0x3d0] sm:$0x3] }
 0x127   :  { %v2838_v0 = vpack.c.bf16 0.0, %v2837_v63  ;;  %v2844_v1 = vld [vmem:[#allocation0 + $0x3d8] sm:$0x3]  ;;  %v2851_v59 = vld [vmem:[#allocation0 + $0x3e0] sm:$0x3] }
 0x128   :  { %5748 = vst [vmem:[%s8665_s1 + $0x78] sm:$0x1] %v2824_v61  ;;  %v2845_v2 = vpack.c.bf16 0.0, %v2844_v1  ;;  %v2852_v3 = vpack.c.bf16 0.0, %v2851_v59  ;;  %v2858_v4 = vld [vmem:[#allocation0 + $0x3e8] sm:$0x3] }
 0x129   :  { %5749 = vst [vmem:[%s8665_s1 + $0x79] sm:$0x1] %v2831_v62  ;;  %v2859_v5 = vpack.c.bf16 0.0, %v2858_v4  ;;  %v2865_v6 = vld [vmem:[#allocation0 + $0x3f0] sm:$0x3] }
 0x12a   :  { %5750 = vst [vmem:[%s8665_s1 + $0x7a] sm:$0x1] %v2838_v0  ;;  %v2866_v7 = vpack.c.bf16 0.0, %v2865_v6  ;;  %v2872_v8 = vld [vmem:[#allocation0 + $0x3f8] sm:$0x3] }
 0x12b   :  { %5751 = vst [vmem:[%s8665_s1 + $0x7b] sm:$0x1] %v2845_v2  ;;  %v2873_v9 = vpack.c.bf16 0.0, %v2872_v8  ;;  %v2767_v10 = vld [vmem:[#allocation0 + $0x380] sm:$0x3] }
 0x12c   :  { %5752 = vst [vmem:[%s8665_s1 + $0x7c] sm:$0x1] %v2852_v3  ;;  %v2774_v11 = vld [vmem:[#allocation0 + $0x388] sm:$0x3]  ;;  %v2768_v12 = vpack.c.bf16 0.0, %v2767_v10 }
 0x12d   :  { %5753 = vst [vmem:[%s8665_s1 + $0x7d] sm:$0x1] %v2859_v5  ;;  %v2781_v13 = vld [vmem:[#allocation0 + $0x390] sm:$0x3]  ;;  %v2775_v14 = vpack.c.bf16 0.0, %v2774_v11 }
 0x12e   :  { %5754 = vst [vmem:[%s8665_s1 + $0x7e] sm:$0x1] %v2866_v7  ;;  %v2788_v15 = vld [vmem:[#allocation0 + $0x398] sm:$0x3]  ;;  %v2782_v16 = vpack.c.bf16 0.0, %v2781_v13 }
 0x12f   :  { %5755 = vst [vmem:[%s8665_s1 + $0x7f] sm:$0x1] %v2873_v9  ;;  %v2789_v17 = vpack.c.bf16 0.0, %v2788_v15 }
 0x130   :  { %1540 = vst.msk [vmem:[#allocation0 + $0x381] ss:$8 sm:$0xf0] %vm963_vm0, %v6338_v50  }
 0x131   :  { %5740 = vst [vmem:[%s8665_s1 + $0x70] sm:$0x1] %v2768_v12 }
 0x132   :  { %5741 = vst [vmem:[%s8665_s1 + $0x71] sm:$0x1] %v2775_v14 }
 0x133   :  { %5742 = vst [vmem:[%s8665_s1 + $0x72] sm:$0x1] %v2782_v16 }
 0x134   :  { %5743 = vst [vmem:[%s8665_s1 + $0x73] sm:$0x1] %v2789_v17 }
 0x135   :  { %1565 = vst.msk [vmem:[#allocation0 + $0x441] ss:$8 sm:$0xf] %vm963_vm0, %v6344_v18  }
 0x136   :  { %1567 = vst.msk [vmem:[#allocation0 + $0x441] ss:$8 sm:$0xf0] %vm963_vm0, %v6344_v18  }
 0x137   :  { %v2795_v20 = vld [vmem:[#allocation0 + $0x3a0] sm:$0x3]  ;;  %v2802_v21 = vld [vmem:[#allocation0 + $0x3a8] sm:$0x3]  ;;  %v2809_v22 = vld [vmem:[#allocation0 + $0x3b0] sm:$0x3] }
 0x138   :  { %v2796_v23 = vpack.c.bf16 0.0, %v2795_v20  ;;  %v2803_v24 = vpack.c.bf16 0.0, %v2802_v21  ;;  %v2810_v25 = vpack.c.bf16 0.0, %v2809_v22  ;;  %v2816_v26 = vld [vmem:[#allocation0 + $0x3b8] sm:$0x3]  ;;  %v7409_v22 = vpop.permute.xlu2 %6356 }
 0x139   :  { %v2817_v27 = vpack.c.bf16 0.0, %v2816_v26  ;;  %1556 = vst.msk [vmem:[#allocation0 + $0x401] ss:$8 sm:$0xf] %vm963_vm0, %v6343_v19  }
 0x13a   :  { %5744 = vst [vmem:[%s8665_s1 + $0x74] sm:$0x1] %v2796_v23 }
 0x13b   :  { %5745 = vst [vmem:[%s8665_s1 + $0x75] sm:$0x1] %v2803_v24  ;;  %v6354_v24 = vunpack.i.h.bf16 %v7329_v37 }
 0x13c   :  { %5746 = vst [vmem:[%s8665_s1 + $0x76] sm:$0x1] %v2810_v25  ;;  %v2935_v28 = vld [vmem:[#allocation0 + $0x440] sm:$0x3]  ;;  %v2942_v29 = vld [vmem:[#allocation0 + $0x448] sm:$0x3]  ;;  %v6353_v25 = vunpack.i.l.bf16 %v7329_v37 }
 0x13d   :  { %5747 = vst [vmem:[%s8665_s1 + $0x77] sm:$0x1] %v2817_v27  ;;  %v2936_v30 = vpack.c.bf16 0.0, %v2935_v28  ;;  %v2943_v31 = vpack.c.bf16 0.0, %v2942_v29  ;;  %v2949_v32 = vld [vmem:[#allocation0 + $0x450] sm:$0x3] }
 0x13e   :  { %v2950_v33 = vpack.c.bf16 0.0, %v2949_v32  ;;  %v2956_v34 = vld [vmem:[#allocation0 + $0x458] sm:$0x3]  ;;  %v2963_v36 = vld [vmem:[#allocation0 + $0x460] sm:$0x3] }
 0x13f   :  { %5764 = vst [vmem:[%s8665_s1 + $0x88] sm:$0x1] %v2936_v30  ;;  %v2957_v35 = vpack.c.bf16 0.0, %v2956_v34  ;;  %v2964_v38 = vpack.c.bf16 0.0, %v2963_v36  ;;  %v2970_v39 = vld [vmem:[#allocation0 + $0x468] sm:$0x3] }
 0x140   :  { %5765 = vst [vmem:[%s8665_s1 + $0x89] sm:$0x1] %v2943_v31  ;;  %v2971_v40 = vpack.c.bf16 0.0, %v2970_v39  ;;  %v2977_v41 = vld [vmem:[#allocation0 + $0x470] sm:$0x3] }
 0x141   :  { %5766 = vst [vmem:[%s8665_s1 + $0x8a] sm:$0x1] %v2950_v33  ;;  %v2978_v42 = vpack.c.bf16 0.0, %v2977_v41  ;;  %v2984_v43 = vld [vmem:[#allocation0 + $0x478] sm:$0x3] }
 0x142   :  { %5767 = vst [vmem:[%s8665_s1 + $0x8b] sm:$0x1] %v2957_v35  ;;  %v2985_v44 = vpack.c.bf16 0.0, %v2984_v43  ;;  %v2879_v45 = vld [vmem:[#allocation0 + $0x400] sm:$0x3] }
 0x143   :  { %5768 = vst [vmem:[%s8665_s1 + $0x8c] sm:$0x1] %v2964_v38  ;;  %v2886_v46 = vld [vmem:[#allocation0 + $0x408] sm:$0x3]  ;;  %v2880_v49 = vpack.c.bf16 0.0, %v2879_v45 }
 0x144   :  { %5769 = vst [vmem:[%s8665_s1 + $0x8d] sm:$0x1] %v2971_v40  ;;  %v2893_v50 = vld [vmem:[#allocation0 + $0x410] sm:$0x3]  ;;  %v2887_v51 = vpack.c.bf16 0.0, %v2886_v46 }
 0x145   :  { %5770 = vst [vmem:[%s8665_s1 + $0x8e] sm:$0x1] %v2978_v42  ;;  %v2900_v48 = vld [vmem:[#allocation0 + $0x418] sm:$0x3]  ;;  %v2894_v52 = vpack.c.bf16 0.0, %v2893_v50  ;;  %v7441_v42 = vpop.permute.xlu0 %6361 }
 0x146   :  { %5771 = vst [vmem:[%s8665_s1 + $0x8f] sm:$0x1] %v2985_v44  ;;  %v2901_v53 = vpack.c.bf16 0.0, %v2900_v48 }
 0x147   :  { %1558 = vst.msk [vmem:[#allocation0 + $0x401] ss:$8 sm:$0xf0] %vm963_vm0, %v6343_v19  }
 0x148   :  { %5756 = vst [vmem:[%s8665_s1 + $0x80] sm:$0x1] %v2880_v49 }
 0x149   :  { %5757 = vst [vmem:[%s8665_s1 + $0x81] sm:$0x1] %v2887_v51 }
 0x14a   :  { %5758 = vst [vmem:[%s8665_s1 + $0x82] sm:$0x1] %v2894_v52 }
 0x14b   :  { %5759 = vst [vmem:[%s8665_s1 + $0x83] sm:$0x1] %v2901_v53 }
 0x14c   :  { %1583 = vst.msk [vmem:[#allocation0 + $0x4c1] ss:$8 sm:$0xf] %vm963_vm0, %v6349_v47  }
 0x14d   :  { %1585 = vst.msk [vmem:[#allocation0 + $0x4c1] ss:$8 sm:$0xf0] %vm963_vm0, %v6349_v47  }
 0x14e   :  { %v2907_v55 = vld [vmem:[#allocation0 + $0x420] sm:$0x3]  ;;  %v2914_v56 = vld [vmem:[#allocation0 + $0x428] sm:$0x3]  ;;  %v2921_v57 = vld [vmem:[#allocation0 + $0x430] sm:$0x3] }
 0x14f   :  { %v2908_v58 = vpack.c.bf16 0.0, %v2907_v55  ;;  %v2915_v61 = vpack.c.bf16 0.0, %v2914_v56  ;;  %v2922_v62 = vpack.c.bf16 0.0, %v2921_v57  ;;  %v2928_v63 = vld [vmem:[#allocation0 + $0x438] sm:$0x3] }
 0x150   :  { %v2929_v0 = vpack.c.bf16 0.0, %v2928_v63  ;;  %1574 = vst.msk [vmem:[#allocation0 + $0x481] ss:$8 sm:$0xf] %vm963_vm0, %v6348_v54  }
 0x151   :  { %5760 = vst [vmem:[%s8665_s1 + $0x84] sm:$0x1] %v2908_v58 }
 0x152   :  { %5761 = vst [vmem:[%s8665_s1 + $0x85] sm:$0x1] %v2915_v61  ;;  %v6359_v61 = vunpack.i.h.bf16 %v7409_v22 }
 0x153   :  { %5762 = vst [vmem:[%s8665_s1 + $0x86] sm:$0x1] %v2922_v62  ;;  %v3047_v1 = vld [vmem:[#allocation0 + $0x4c0] sm:$0x3]  ;;  %v3054_v59 = vld [vmem:[#allocation0 + $0x4c8] sm:$0x3]  ;;  %v6358_v62 = vunpack.i.l.bf16 %v7409_v22 }
 0x154   :  { %5763 = vst [vmem:[%s8665_s1 + $0x87] sm:$0x1] %v2929_v0  ;;  %v3048_v60 = vpack.c.bf16 0.0, %v3047_v1  ;;  %v3055_v2 = vpack.c.bf16 0.0, %v3054_v59  ;;  %v3061_v3 = vld [vmem:[#allocation0 + $0x4d0] sm:$0x3] }
 0x155   :  { %v3062_v4 = vpack.c.bf16 0.0, %v3061_v3  ;;  %v3068_v5 = vld [vmem:[#allocation0 + $0x4d8] sm:$0x3]  ;;  %v3075_v6 = vld [vmem:[#allocation0 + $0x4e0] sm:$0x3] }
 0x156   :  { %5780 = vst [vmem:[%s8665_s1 + $0x98] sm:$0x1] %v3048_v60  ;;  %v3069_v7 = vpack.c.bf16 0.0, %v3068_v5  ;;  %v3076_v8 = vpack.c.bf16 0.0, %v3075_v6  ;;  %v3082_v9 = vld [vmem:[#allocation0 + $0x4e8] sm:$0x3] }
 0x157   :  { %5781 = vst [vmem:[%s8665_s1 + $0x99] sm:$0x1] %v3055_v2  ;;  %v3083_v10 = vpack.c.bf16 0.0, %v3082_v9  ;;  %v3089_v11 = vld [vmem:[#allocation0 + $0x4f0] sm:$0x3] }
 0x158   :  { %5782 = vst [vmem:[%s8665_s1 + $0x9a] sm:$0x1] %v3062_v4  ;;  %v3090_v12 = vpack.c.bf16 0.0, %v3089_v11  ;;  %v3096_v13 = vld [vmem:[#allocation0 + $0x4f8] sm:$0x3] }
 0x159   :  { %5783 = vst [vmem:[%s8665_s1 + $0x9b] sm:$0x1] %v3069_v7  ;;  %v3097_v14 = vpack.c.bf16 0.0, %v3096_v13  ;;  %v2991_v15 = vld [vmem:[#allocation0 + $0x480] sm:$0x3]  ;;  %v7497_v13 = vpop.permute.xlu1 %6366 }
 0x15a   :  { %5784 = vst [vmem:[%s8665_s1 + $0x9c] sm:$0x1] %v3076_v8  ;;  %v2998_v16 = vld [vmem:[#allocation0 + $0x488] sm:$0x3]  ;;  %v2992_v17 = vpack.c.bf16 0.0, %v2991_v15 }
 0x15b   :  { %5785 = vst [vmem:[%s8665_s1 + $0x9d] sm:$0x1] %v3083_v10  ;;  %v3005_v18 = vld [vmem:[#allocation0 + $0x490] sm:$0x3]  ;;  %v2999_v19 = vpack.c.bf16 0.0, %v2998_v16 }
 0x15c   :  { %5786 = vst [vmem:[%s8665_s1 + $0x9e] sm:$0x1] %v3090_v12  ;;  %v3012_v20 = vld [vmem:[#allocation0 + $0x498] sm:$0x3]  ;;  %v3006_v21 = vpack.c.bf16 0.0, %v3005_v18 }
 0x15d   :  { %5787 = vst [vmem:[%s8665_s1 + $0x9f] sm:$0x1] %v3097_v14  ;;  %v3013_v23 = vpack.c.bf16 0.0, %v3012_v20 }
 0x15e   :  { %1576 = vst.msk [vmem:[#allocation0 + $0x481] ss:$8 sm:$0xf0] %vm963_vm0, %v6348_v54  }
 0x15f   :  { %5772 = vst [vmem:[%s8665_s1 + $0x90] sm:$0x1] %v2992_v17 }
 0x160   :  { %5773 = vst [vmem:[%s8665_s1 + $0x91] sm:$0x1] %v2999_v19 }
 0x161   :  { %5774 = vst [vmem:[%s8665_s1 + $0x92] sm:$0x1] %v3006_v21 }
 0x162   :  { %5775 = vst [vmem:[%s8665_s1 + $0x93] sm:$0x1] %v3013_v23 }
 0x163   :  { %1601 = vst.msk [vmem:[#allocation0 + $0x541] ss:$8 sm:$0xf] %vm963_vm0, %v6354_v24  }
 0x164   :  { %1603 = vst.msk [vmem:[#allocation0 + $0x541] ss:$8 sm:$0xf0] %vm963_vm0, %v6354_v24  }
 0x165   :  { %v3019_v26 = vld [vmem:[#allocation0 + $0x4a0] sm:$0x3]  ;;  %v3026_v27 = vld [vmem:[#allocation0 + $0x4a8] sm:$0x3]  ;;  %v3033_v28 = vld [vmem:[#allocation0 + $0x4b0] sm:$0x3] }
 0x166   :  { %v3020_v29 = vpack.c.bf16 0.0, %v3019_v26  ;;  %v3027_v30 = vpack.c.bf16 0.0, %v3026_v27  ;;  %v3034_v31 = vpack.c.bf16 0.0, %v3033_v28  ;;  %v3040_v32 = vld [vmem:[#allocation0 + $0x4b8] sm:$0x3] }
 0x167   :  { %v3041_v33 = vpack.c.bf16 0.0, %v3040_v32  ;;  %1592 = vst.msk [vmem:[#allocation0 + $0x501] ss:$8 sm:$0xf] %vm963_vm0, %v6353_v25  }
 0x168   :  { %5776 = vst [vmem:[%s8665_s1 + $0x94] sm:$0x1] %v3020_v29 }
 0x169   :  { %5777 = vst [vmem:[%s8665_s1 + $0x95] sm:$0x1] %v3027_v30  ;;  %v6364_v30 = vunpack.i.h.bf16 %v7441_v42 }
 0x16a   :  { %5778 = vst [vmem:[%s8665_s1 + $0x96] sm:$0x1] %v3034_v31  ;;  %v3159_v34 = vld [vmem:[#allocation0 + $0x540] sm:$0x3]  ;;  %v3166_v36 = vld [vmem:[#allocation0 + $0x548] sm:$0x3]  ;;  %v6363_v31 = vunpack.i.l.bf16 %v7441_v42 }
 0x16b   :  { %5779 = vst [vmem:[%s8665_s1 + $0x97] sm:$0x1] %v3041_v33  ;;  %v3160_v37 = vpack.c.bf16 0.0, %v3159_v34  ;;  %v3167_v35 = vpack.c.bf16 0.0, %v3166_v36  ;;  %v3173_v38 = vld [vmem:[#allocation0 + $0x550] sm:$0x3] }
 0x16c   :  { %v3174_v39 = vpack.c.bf16 0.0, %v3173_v38  ;;  %v3180_v40 = vld [vmem:[#allocation0 + $0x558] sm:$0x3]  ;;  %v3187_v41 = vld [vmem:[#allocation0 + $0x560] sm:$0x3] }
 0x16d   :  { %5796 = vst [vmem:[%s8665_s1 + $0xa8] sm:$0x1] %v3160_v37  ;;  %v3181_v43 = vpack.c.bf16 0.0, %v3180_v40  ;;  %v3188_v44 = vpack.c.bf16 0.0, %v3187_v41  ;;  %v3194_v45 = vld [vmem:[#allocation0 + $0x568] sm:$0x3] }
 0x16e   :  { %5797 = vst [vmem:[%s8665_s1 + $0xa9] sm:$0x1] %v3167_v35  ;;  %v3195_v46 = vpack.c.bf16 0.0, %v3194_v45  ;;  %v3201_v49 = vld [vmem:[#allocation0 + $0x570] sm:$0x3] }
 0x16f   :  { %5798 = vst [vmem:[%s8665_s1 + $0xaa] sm:$0x1] %v3174_v39  ;;  %v3202_v50 = vpack.c.bf16 0.0, %v3201_v49  ;;  %v3208_v51 = vld [vmem:[#allocation0 + $0x578] sm:$0x3] }
 0x170   :  { %5799 = vst [vmem:[%s8665_s1 + $0xab] sm:$0x1] %v3181_v43  ;;  %v3209_v48 = vpack.c.bf16 0.0, %v3208_v51  ;;  %v3103_v52 = vld [vmem:[#allocation0 + $0x500] sm:$0x3] }
 0x171   :  { %5800 = vst [vmem:[%s8665_s1 + $0xac] sm:$0x1] %v3188_v44  ;;  %v3110_v53 = vld [vmem:[#allocation0 + $0x508] sm:$0x3]  ;;  %v3104_v47 = vpack.c.bf16 0.0, %v3103_v52 }
 0x172   :  { %5801 = vst [vmem:[%s8665_s1 + $0xad] sm:$0x1] %v3195_v46  ;;  %v3117_v54 = vld [vmem:[#allocation0 + $0x510] sm:$0x3]  ;;  %v3111_v55 = vpack.c.bf16 0.0, %v3110_v53 }
 0x173   :  { %5802 = vst [vmem:[%s8665_s1 + $0xae] sm:$0x1] %v3202_v50  ;;  %v3124_v56 = vld [vmem:[#allocation0 + $0x518] sm:$0x3]  ;;  %v3118_v57 = vpack.c.bf16 0.0, %v3117_v54 }
 0x174   :  { %5803 = vst [vmem:[%s8665_s1 + $0xaf] sm:$0x1] %v3209_v48  ;;  %v3125_v58 = vpack.c.bf16 0.0, %v3124_v56 }
 0x175   :  { %1594 = vst.msk [vmem:[#allocation0 + $0x501] ss:$8 sm:$0xf0] %vm963_vm0, %v6353_v25  }
 0x176   :  { %5788 = vst [vmem:[%s8665_s1 + $0xa0] sm:$0x1] %v3104_v47 }
 0x177   :  { %5789 = vst [vmem:[%s8665_s1 + $0xa1] sm:$0x1] %v3111_v55 }
 0x178   :  { %5790 = vst [vmem:[%s8665_s1 + $0xa2] sm:$0x1] %v3118_v57 }
 0x179   :  { %5791 = vst [vmem:[%s8665_s1 + $0xa3] sm:$0x1] %v3125_v58 }
 0x17a   :  { %1619 = vst.msk [vmem:[#allocation0 + $0x5c1] ss:$8 sm:$0xf] %vm963_vm0, %v6359_v61  }
 0x17b   :  { %1621 = vst.msk [vmem:[#allocation0 + $0x5c1] ss:$8 sm:$0xf0] %vm963_vm0, %v6359_v61  }
 0x17c   :  { %v3131_v63 = vld [vmem:[#allocation0 + $0x520] sm:$0x3]  ;;  %v3138_v0 = vld [vmem:[#allocation0 + $0x528] sm:$0x3]  ;;  %v3145_v1 = vld [vmem:[#allocation0 + $0x530] sm:$0x3] }
 0x17d   :  { %v3132_v59 = vpack.c.bf16 0.0, %v3131_v63  ;;  %v3139_v60 = vpack.c.bf16 0.0, %v3138_v0  ;;  %v3146_v2 = vpack.c.bf16 0.0, %v3145_v1  ;;  %v3152_v3 = vld [vmem:[#allocation0 + $0x538] sm:$0x3]  ;;  %v7577_v1 = vpop.permute.xlu2 %6371 }
 0x17e   :  { %v3153_v4 = vpack.c.bf16 0.0, %v3152_v3  ;;  %1610 = vst.msk [vmem:[#allocation0 + $0x581] ss:$8 sm:$0xf] %vm963_vm0, %v6358_v62  }
 0x17f   :  { %5792 = vst [vmem:[%s8665_s1 + $0xa4] sm:$0x1] %v3132_v59 }
 0x180   :  { %5793 = vst [vmem:[%s8665_s1 + $0xa5] sm:$0x1] %v3139_v60  ;;  %v6369_v60 = vunpack.i.h.bf16 %v7497_v13 }
 0x181   :  { %5794 = vst [vmem:[%s8665_s1 + $0xa6] sm:$0x1] %v3146_v2  ;;  %v3271_v5 = vld [vmem:[#allocation0 + $0x5c0] sm:$0x3]  ;;  %v3278_v6 = vld [vmem:[#allocation0 + $0x5c8] sm:$0x3]  ;;  %v6368_v2 = vunpack.i.l.bf16 %v7497_v13 }
 0x182   :  { %5795 = vst [vmem:[%s8665_s1 + $0xa7] sm:$0x1] %v3153_v4  ;;  %v3272_v7 = vpack.c.bf16 0.0, %v3271_v5  ;;  %v3279_v8 = vpack.c.bf16 0.0, %v3278_v6  ;;  %v3285_v9 = vld [vmem:[#allocation0 + $0x5d0] sm:$0x3] }
 0x183   :  { %v3286_v10 = vpack.c.bf16 0.0, %v3285_v9  ;;  %v3292_v11 = vld [vmem:[#allocation0 + $0x5d8] sm:$0x3]  ;;  %v3299_v12 = vld [vmem:[#allocation0 + $0x5e0] sm:$0x3] }
 0x184   :  { %5812 = vst [vmem:[%s8665_s1 + $0xb8] sm:$0x1] %v3272_v7  ;;  %v3293_v14 = vpack.c.bf16 0.0, %v3292_v11  ;;  %v3300_v15 = vpack.c.bf16 0.0, %v3299_v12  ;;  %v3306_v16 = vld [vmem:[#allocation0 + $0x5e8] sm:$0x3] }
 0x185   :  { %5813 = vst [vmem:[%s8665_s1 + $0xb9] sm:$0x1] %v3279_v8  ;;  %v3307_v17 = vpack.c.bf16 0.0, %v3306_v16  ;;  %v3313_v18 = vld [vmem:[#allocation0 + $0x5f0] sm:$0x3] }
 0x186   :  { %5814 = vst [vmem:[%s8665_s1 + $0xba] sm:$0x1] %v3286_v10  ;;  %v3314_v19 = vpack.c.bf16 0.0, %v3313_v18  ;;  %v3320_v20 = vld [vmem:[#allocation0 + $0x5f8] sm:$0x3] }
 0x187   :  { %5815 = vst [vmem:[%s8665_s1 + $0xbb] sm:$0x1] %v3293_v14  ;;  %v3321_v21 = vpack.c.bf16 0.0, %v3320_v20  ;;  %v3215_v22 = vld [vmem:[#allocation0 + $0x580] sm:$0x3] }
 0x188   :  { %5816 = vst [vmem:[%s8665_s1 + $0xbc] sm:$0x1] %v3300_v15  ;;  %v3222_v23 = vld [vmem:[#allocation0 + $0x588] sm:$0x3]  ;;  %v3216_v24 = vpack.c.bf16 0.0, %v3215_v22 }
 0x189   :  { %5817 = vst [vmem:[%s8665_s1 + $0xbd] sm:$0x1] %v3307_v17  ;;  %v3229_v25 = vld [vmem:[#allocation0 + $0x590] sm:$0x3]  ;;  %v3223_v26 = vpack.c.bf16 0.0, %v3222_v23 }
 0x18a   :  { %5818 = vst [vmem:[%s8665_s1 + $0xbe] sm:$0x1] %v3314_v19  ;;  %v3236_v27 = vld [vmem:[#allocation0 + $0x598] sm:$0x3]  ;;  %v3230_v28 = vpack.c.bf16 0.0, %v3229_v25  ;;  %v7609_v19 = vpop.permute.xlu0 %6376 }
 0x18b   :  { %5819 = vst [vmem:[%s8665_s1 + $0xbf] sm:$0x1] %v3321_v21  ;;  %v3237_v29 = vpack.c.bf16 0.0, %v3236_v27 }
 0x18c   :  { %1612 = vst.msk [vmem:[#allocation0 + $0x581] ss:$8 sm:$0xf0] %vm963_vm0, %v6358_v62  }
 0x18d   :  { %5804 = vst [vmem:[%s8665_s1 + $0xb0] sm:$0x1] %v3216_v24 }
 0x18e   :  { %5805 = vst [vmem:[%s8665_s1 + $0xb1] sm:$0x1] %v3223_v26 }
 0x18f   :  { %5806 = vst [vmem:[%s8665_s1 + $0xb2] sm:$0x1] %v3230_v28 }
 0x190   :  { %5807 = vst [vmem:[%s8665_s1 + $0xb3] sm:$0x1] %v3237_v29 }
 0x191   :  { %1637 = vst.msk [vmem:[#allocation0 + $0x641] ss:$8 sm:$0xf] %vm963_vm0, %v6364_v30  }
 0x192   :  { %1639 = vst.msk [vmem:[#allocation0 + $0x641] ss:$8 sm:$0xf0] %vm963_vm0, %v6364_v30  }
 0x193   :  { %v3243_v32 = vld [vmem:[#allocation0 + $0x5a0] sm:$0x3]  ;;  %v3250_v33 = vld [vmem:[#allocation0 + $0x5a8] sm:$0x3]  ;;  %v3257_v34 = vld [vmem:[#allocation0 + $0x5b0] sm:$0x3] }
 0x194   :  { %v3244_v36 = vpack.c.bf16 0.0, %v3243_v32  ;;  %v3251_v37 = vpack.c.bf16 0.0, %v3250_v33  ;;  %v3258_v35 = vpack.c.bf16 0.0, %v3257_v34  ;;  %v3264_v38 = vld [vmem:[#allocation0 + $0x5b8] sm:$0x3] }
 0x195   :  { %v3265_v39 = vpack.c.bf16 0.0, %v3264_v38  ;;  %1628 = vst.msk [vmem:[#allocation0 + $0x601] ss:$8 sm:$0xf] %vm963_vm0, %v6363_v31  }
 0x196   :  { %5808 = vst [vmem:[%s8665_s1 + $0xb4] sm:$0x1] %v3244_v36 }
 0x197   :  { %5809 = vst [vmem:[%s8665_s1 + $0xb5] sm:$0x1] %v3251_v37  ;;  %v6374_v37 = vunpack.i.h.bf16 %v7577_v1 }
 0x198   :  { %5810 = vst [vmem:[%s8665_s1 + $0xb6] sm:$0x1] %v3258_v35  ;;  %v3383_v40 = vld [vmem:[#allocation0 + $0x640] sm:$0x3]  ;;  %v3390_v41 = vld [vmem:[#allocation0 + $0x648] sm:$0x3]  ;;  %v6373_v35 = vunpack.i.l.bf16 %v7577_v1 }
 0x199   :  { %5811 = vst [vmem:[%s8665_s1 + $0xb7] sm:$0x1] %v3265_v39  ;;  %v3384_v42 = vpack.c.bf16 0.0, %v3383_v40  ;;  %v3391_v43 = vpack.c.bf16 0.0, %v3390_v41  ;;  %v3397_v44 = vld [vmem:[#allocation0 + $0x650] sm:$0x3] }
 0x19a   :  { %v3398_v45 = vpack.c.bf16 0.0, %v3397_v44  ;;  %v3404_v46 = vld [vmem:[#allocation0 + $0x658] sm:$0x3]  ;;  %v3411_v49 = vld [vmem:[#allocation0 + $0x660] sm:$0x3] }
 0x19b   :  { %5828 = vst [vmem:[%s8665_s1 + $0xc8] sm:$0x1] %v3384_v42  ;;  %v3405_v50 = vpack.c.bf16 0.0, %v3404_v46  ;;  %v3412_v51 = vpack.c.bf16 0.0, %v3411_v49  ;;  %v3418_v48 = vld [vmem:[#allocation0 + $0x668] sm:$0x3] }
 0x19c   :  { %5829 = vst [vmem:[%s8665_s1 + $0xc9] sm:$0x1] %v3391_v43  ;;  %v3419_v52 = vpack.c.bf16 0.0, %v3418_v48  ;;  %v3425_v53 = vld [vmem:[#allocation0 + $0x670] sm:$0x3] }
 0x19d   :  { %5830 = vst [vmem:[%s8665_s1 + $0xca] sm:$0x1] %v3398_v45  ;;  %v3426_v47 = vpack.c.bf16 0.0, %v3425_v53  ;;  %v3432_v54 = vld [vmem:[#allocation0 + $0x678] sm:$0x3] }
 0x19e   :  { %5831 = vst [vmem:[%s8665_s1 + $0xcb] sm:$0x1] %v3405_v50  ;;  %v3433_v55 = vpack.c.bf16 0.0, %v3432_v54  ;;  %v3327_v56 = vld [vmem:[#allocation0 + $0x600] sm:$0x3]  ;;  %v7665_v54 = vpop.permute.xlu1 %6381 }
 0x19f   :  { %5832 = vst [vmem:[%s8665_s1 + $0xcc] sm:$0x1] %v3412_v51  ;;  %v3334_v57 = vld [vmem:[#allocation0 + $0x608] sm:$0x3]  ;;  %v3328_v58 = vpack.c.bf16 0.0, %v3327_v56 }
 0x1a0   :  { %5833 = vst [vmem:[%s8665_s1 + $0xcd] sm:$0x1] %v3419_v52  ;;  %v3341_v61 = vld [vmem:[#allocation0 + $0x610] sm:$0x3]  ;;  %v3335_v62 = vpack.c.bf16 0.0, %v3334_v57 }
 0x1a1   :  { %5834 = vst [vmem:[%s8665_s1 + $0xce] sm:$0x1] %v3426_v47  ;;  %v3348_v63 = vld [vmem:[#allocation0 + $0x618] sm:$0x3]  ;;  %v3342_v0 = vpack.c.bf16 0.0, %v3341_v61 }
 0x1a2   :  { %5835 = vst [vmem:[%s8665_s1 + $0xcf] sm:$0x1] %v3433_v55  ;;  %v3349_v59 = vpack.c.bf16 0.0, %v3348_v63 }
 0x1a3   :  { %1630 = vst.msk [vmem:[#allocation0 + $0x601] ss:$8 sm:$0xf0] %vm963_vm0, %v6363_v31  }
 0x1a4   :  { %5820 = vst [vmem:[%s8665_s1 + $0xc0] sm:$0x1] %v3328_v58 }
 0x1a5   :  { %5821 = vst [vmem:[%s8665_s1 + $0xc1] sm:$0x1] %v3335_v62 }
 0x1a6   :  { %5822 = vst [vmem:[%s8665_s1 + $0xc2] sm:$0x1] %v3342_v0 }
 0x1a7   :  { %5823 = vst [vmem:[%s8665_s1 + $0xc3] sm:$0x1] %v3349_v59 }
 0x1a8   :  { %1655 = vst.msk [vmem:[#allocation0 + $0x6c1] ss:$8 sm:$0xf] %vm963_vm0, %v6369_v60  }
 0x1a9   :  { %1657 = vst.msk [vmem:[#allocation0 + $0x6c1] ss:$8 sm:$0xf0] %vm963_vm0, %v6369_v60  }
 0x1aa   :  { %v3355_v3 = vld [vmem:[#allocation0 + $0x620] sm:$0x3]  ;;  %v3362_v4 = vld [vmem:[#allocation0 + $0x628] sm:$0x3]  ;;  %v3369_v5 = vld [vmem:[#allocation0 + $0x630] sm:$0x3] }
 0x1ab   :  { %v3356_v6 = vpack.c.bf16 0.0, %v3355_v3  ;;  %v3363_v7 = vpack.c.bf16 0.0, %v3362_v4  ;;  %v3370_v8 = vpack.c.bf16 0.0, %v3369_v5  ;;  %v3376_v9 = vld [vmem:[#allocation0 + $0x638] sm:$0x3] }
 0x1ac   :  { %v3377_v10 = vpack.c.bf16 0.0, %v3376_v9  ;;  %1646 = vst.msk [vmem:[#allocation0 + $0x681] ss:$8 sm:$0xf] %vm963_vm0, %v6368_v2  }
 0x1ad   :  { %5824 = vst [vmem:[%s8665_s1 + $0xc4] sm:$0x1] %v3356_v6 }
 0x1ae   :  { %5825 = vst [vmem:[%s8665_s1 + $0xc5] sm:$0x1] %v3363_v7  ;;  %v6379_v7 = vunpack.i.h.bf16 %v7609_v19 }
 0x1af   :  { %5826 = vst [vmem:[%s8665_s1 + $0xc6] sm:$0x1] %v3370_v8  ;;  %v3495_v11 = vld [vmem:[#allocation0 + $0x6c0] sm:$0x3]  ;;  %v3502_v12 = vld [vmem:[#allocation0 + $0x6c8] sm:$0x3]  ;;  %v6378_v8 = vunpack.i.l.bf16 %v7609_v19 }
 0x1b0   :  { %5827 = vst [vmem:[%s8665_s1 + $0xc7] sm:$0x1] %v3377_v10  ;;  %v3496_v13 = vpack.c.bf16 0.0, %v3495_v11  ;;  %v3503_v14 = vpack.c.bf16 0.0, %v3502_v12  ;;  %v3509_v15 = vld [vmem:[#allocation0 + $0x6d0] sm:$0x3] }
 0x1b1   :  { %v3510_v16 = vpack.c.bf16 0.0, %v3509_v15  ;;  %v3516_v17 = vld [vmem:[#allocation0 + $0x6d8] sm:$0x3]  ;;  %v3523_v18 = vld [vmem:[#allocation0 + $0x6e0] sm:$0x3] }
 0x1b2   :  { %5844 = vst [vmem:[%s8665_s1 + $0xd8] sm:$0x1] %v3496_v13  ;;  %v3517_v20 = vpack.c.bf16 0.0, %v3516_v17  ;;  %v3524_v21 = vpack.c.bf16 0.0, %v3523_v18  ;;  %v3530_v22 = vld [vmem:[#allocation0 + $0x6e8] sm:$0x3] }
 0x1b3   :  { %5845 = vst [vmem:[%s8665_s1 + $0xd9] sm:$0x1] %v3503_v14  ;;  %v3531_v23 = vpack.c.bf16 0.0, %v3530_v22  ;;  %v3537_v24 = vld [vmem:[#allocation0 + $0x6f0] sm:$0x3] }
 0x1b4   :  { %5846 = vst [vmem:[%s8665_s1 + $0xda] sm:$0x1] %v3510_v16  ;;  %v3538_v25 = vpack.c.bf16 0.0, %v3537_v24  ;;  %v3544_v26 = vld [vmem:[#allocation0 + $0x6f8] sm:$0x3] }
 0x1b5   :  { %5847 = vst [vmem:[%s8665_s1 + $0xdb] sm:$0x1] %v3517_v20  ;;  %v3545_v27 = vpack.c.bf16 0.0, %v3544_v26  ;;  %v3439_v28 = vld [vmem:[#allocation0 + $0x680] sm:$0x3] }
 0x1b6   :  { %5848 = vst [vmem:[%s8665_s1 + $0xdc] sm:$0x1] %v3524_v21  ;;  %v3446_v29 = vld [vmem:[#allocation0 + $0x688] sm:$0x3]  ;;  %v3440_v30 = vpack.c.bf16 0.0, %v3439_v28 }
 0x1b7   :  { %5849 = vst [vmem:[%s8665_s1 + $0xdd] sm:$0x1] %v3531_v23  ;;  %v3453_v31 = vld [vmem:[#allocation0 + $0x690] sm:$0x3]  ;;  %v3447_v32 = vpack.c.bf16 0.0, %v3446_v29 }
 0x1b8   :  { %5850 = vst [vmem:[%s8665_s1 + $0xde] sm:$0x1] %v3538_v25  ;;  %v3460_v33 = vld [vmem:[#allocation0 + $0x698] sm:$0x3]  ;;  %v3454_v34 = vpack.c.bf16 0.0, %v3453_v31 }
 0x1b9   :  { %5851 = vst [vmem:[%s8665_s1 + $0xdf] sm:$0x1] %v3545_v27  ;;  %v3461_v36 = vpack.c.bf16 0.0, %v3460_v33 }
 0x1ba   :  { %1648 = vst.msk [vmem:[#allocation0 + $0x681] ss:$8 sm:$0xf0] %vm963_vm0, %v6368_v2  }
 0x1bb   :  { %5836 = vst [vmem:[%s8665_s1 + $0xd0] sm:$0x1] %v3440_v30 }
 0x1bc   :  { %5837 = vst [vmem:[%s8665_s1 + $0xd1] sm:$0x1] %v3447_v32 }
 0x1bd   :  { %5838 = vst [vmem:[%s8665_s1 + $0xd2] sm:$0x1] %v3454_v34 }
 0x1be   :  { %5839 = vst [vmem:[%s8665_s1 + $0xd3] sm:$0x1] %v3461_v36 }
 0x1bf   :  { %1673 = vst.msk [vmem:[#allocation0 + $0x741] ss:$8 sm:$0xf] %vm963_vm0, %v6374_v37  }
 0x1c0   :  { %1675 = vst.msk [vmem:[#allocation0 + $0x741] ss:$8 sm:$0xf0] %vm963_vm0, %v6374_v37  }
 0x1c1   :  { %v3467_v38 = vld [vmem:[#allocation0 + $0x6a0] sm:$0x3]  ;;  %v3474_v39 = vld [vmem:[#allocation0 + $0x6a8] sm:$0x3]  ;;  %v3481_v40 = vld [vmem:[#allocation0 + $0x6b0] sm:$0x3] }
 0x1c2   :  { %v3468_v41 = vpack.c.bf16 0.0, %v3467_v38  ;;  %v3475_v42 = vpack.c.bf16 0.0, %v3474_v39  ;;  %v3482_v43 = vpack.c.bf16 0.0, %v3481_v40  ;;  %v3488_v44 = vld [vmem:[#allocation0 + $0x6b8] sm:$0x3]  ;;  %v7745_v40 = vpop.permute.xlu2 %6386 }
 0x1c3   :  { %v3489_v45 = vpack.c.bf16 0.0, %v3488_v44  ;;  %1664 = vst.msk [vmem:[#allocation0 + $0x701] ss:$8 sm:$0xf] %vm963_vm0, %v6373_v35  }
 0x1c4   :  { %5840 = vst [vmem:[%s8665_s1 + $0xd4] sm:$0x1] %v3468_v41 }
 0x1c5   :  { %5841 = vst [vmem:[%s8665_s1 + $0xd5] sm:$0x1] %v3475_v42  ;;  %v6384_v42 = vunpack.i.h.bf16 %v7665_v54 }
 0x1c6   :  { %5842 = vst [vmem:[%s8665_s1 + $0xd6] sm:$0x1] %v3482_v43  ;;  %v3607_v46 = vld [vmem:[#allocation0 + $0x740] sm:$0x3]  ;;  %v3614_v49 = vld [vmem:[#allocation0 + $0x748] sm:$0x3]  ;;  %v6383_v43 = vunpack.i.l.bf16 %v7665_v54 }
 0x1c7   :  { %5843 = vst [vmem:[%s8665_s1 + $0xd7] sm:$0x1] %v3489_v45  ;;  %v3608_v50 = vpack.c.bf16 0.0, %v3607_v46  ;;  %v3615_v51 = vpack.c.bf16 0.0, %v3614_v49  ;;  %v3621_v48 = vld [vmem:[#allocation0 + $0x750] sm:$0x3] }
 0x1c8   :  { %v3622_v52 = vpack.c.bf16 0.0, %v3621_v48  ;;  %v3628_v53 = vld [vmem:[#allocation0 + $0x758] sm:$0x3]  ;;  %v3635_v47 = vld [vmem:[#allocation0 + $0x760] sm:$0x3] }
 0x1c9   :  { %5860 = vst [vmem:[%s8665_s1 + $0xe8] sm:$0x1] %v3608_v50  ;;  %v3629_v55 = vpack.c.bf16 0.0, %v3628_v53  ;;  %v3636_v56 = vpack.c.bf16 0.0, %v3635_v47  ;;  %v3642_v57 = vld [vmem:[#allocation0 + $0x768] sm:$0x3] }
 0x1ca   :  { %5861 = vst [vmem:[%s8665_s1 + $0xe9] sm:$0x1] %v3615_v51  ;;  %v3643_v58 = vpack.c.bf16 0.0, %v3642_v57  ;;  %v3649_v61 = vld [vmem:[#allocation0 + $0x770] sm:$0x3] }
 0x1cb   :  { %5862 = vst [vmem:[%s8665_s1 + $0xea] sm:$0x1] %v3622_v52  ;;  %v3650_v62 = vpack.c.bf16 0.0, %v3649_v61  ;;  %v3656_v63 = vld [vmem:[#allocation0 + $0x778] sm:$0x3] }
 0x1cc   :  { %5863 = vst [vmem:[%s8665_s1 + $0xeb] sm:$0x1] %v3629_v55  ;;  %v3657_v0 = vpack.c.bf16 0.0, %v3656_v63  ;;  %v3551_v1 = vld [vmem:[#allocation0 + $0x700] sm:$0x3] }
 0x1cd   :  { %5864 = vst [vmem:[%s8665_s1 + $0xec] sm:$0x1] %v3636_v56  ;;  %v3558_v59 = vld [vmem:[#allocation0 + $0x708] sm:$0x3]  ;;  %v3552_v60 = vpack.c.bf16 0.0, %v3551_v1 }
 0x1ce   :  { %5865 = vst [vmem:[%s8665_s1 + $0xed] sm:$0x1] %v3643_v58  ;;  %v3565_v2 = vld [vmem:[#allocation0 + $0x710] sm:$0x3]  ;;  %v3559_v3 = vpack.c.bf16 0.0, %v3558_v59 }
 0x1cf   :  { %5866 = vst [vmem:[%s8665_s1 + $0xee] sm:$0x1] %v3650_v62  ;;  %v3572_v4 = vld [vmem:[#allocation0 + $0x718] sm:$0x3]  ;;  %v3566_v5 = vpack.c.bf16 0.0, %v3565_v2  ;;  %v7777_v62 = vpop.permute.xlu0 %6391 }
 0x1d0   :  { %5867 = vst [vmem:[%s8665_s1 + $0xef] sm:$0x1] %v3657_v0  ;;  %v3573_v6 = vpack.c.bf16 0.0, %v3572_v4 }
 0x1d1   :  { %1666 = vst.msk [vmem:[#allocation0 + $0x701] ss:$8 sm:$0xf0] %vm963_vm0, %v6373_v35  }
 0x1d2   :  { %5852 = vst [vmem:[%s8665_s1 + $0xe0] sm:$0x1] %v3552_v60 }
 0x1d3   :  { %5853 = vst [vmem:[%s8665_s1 + $0xe1] sm:$0x1] %v3559_v3 }
 0x1d4   :  { %5854 = vst [vmem:[%s8665_s1 + $0xe2] sm:$0x1] %v3566_v5 }
 0x1d5   :  { %5855 = vst [vmem:[%s8665_s1 + $0xe3] sm:$0x1] %v3573_v6 }
 0x1d6   :  { %1691 = vst.msk [vmem:[#allocation0 + $0x7c1] ss:$8 sm:$0xf] %vm963_vm0, %v6379_v7  }
 0x1d7   :  { %1693 = vst.msk [vmem:[#allocation0 + $0x7c1] ss:$8 sm:$0xf0] %vm963_vm0, %v6379_v7  }
 0x1d8   :  { %v3579_v9 = vld [vmem:[#allocation0 + $0x720] sm:$0x3]  ;;  %v3586_v10 = vld [vmem:[#allocation0 + $0x728] sm:$0x3]  ;;  %v3593_v11 = vld [vmem:[#allocation0 + $0x730] sm:$0x3] }
 0x1d9   :  { %v3580_v12 = vpack.c.bf16 0.0, %v3579_v9  ;;  %v3587_v13 = vpack.c.bf16 0.0, %v3586_v10  ;;  %v3594_v14 = vpack.c.bf16 0.0, %v3593_v11  ;;  %v3600_v15 = vld [vmem:[#allocation0 + $0x738] sm:$0x3] }
 0x1da   :  { %v3601_v16 = vpack.c.bf16 0.0, %v3600_v15  ;;  %1682 = vst.msk [vmem:[#allocation0 + $0x781] ss:$8 sm:$0xf] %vm963_vm0, %v6378_v8  }
 0x1db   :  { %5856 = vst [vmem:[%s8665_s1 + $0xe4] sm:$0x1] %v3580_v12 }
 0x1dc   :  { %5857 = vst [vmem:[%s8665_s1 + $0xe5] sm:$0x1] %v3587_v13  ;;  %v6389_v13 = vunpack.i.h.bf16 %v7745_v40 }
 0x1dd   :  { %5858 = vst [vmem:[%s8665_s1 + $0xe6] sm:$0x1] %v3594_v14  ;;  %v3719_v17 = vld [vmem:[#allocation0 + $0x7c0] sm:$0x3]  ;;  %v3726_v18 = vld [vmem:[#allocation0 + $0x7c8] sm:$0x3]  ;;  %v6388_v14 = vunpack.i.l.bf16 %v7745_v40 }
 0x1de   :  { %5859 = vst [vmem:[%s8665_s1 + $0xe7] sm:$0x1] %v3601_v16  ;;  %v3720_v19 = vpack.c.bf16 0.0, %v3719_v17  ;;  %v3727_v20 = vpack.c.bf16 0.0, %v3726_v18  ;;  %v3733_v21 = vld [vmem:[#allocation0 + $0x7d0] sm:$0x3] }
 0x1df   :  { %v3734_v22 = vpack.c.bf16 0.0, %v3733_v21  ;;  %v3740_v23 = vld [vmem:[#allocation0 + $0x7d8] sm:$0x3]  ;;  %v3747_v24 = vld [vmem:[#allocation0 + $0x7e0] sm:$0x3] }
 0x1e0   :  { %5876 = vst [vmem:[%s8665_s1 + $0xf8] sm:$0x1] %v3720_v19  ;;  %v3741_v25 = vpack.c.bf16 0.0, %v3740_v23  ;;  %v3748_v26 = vpack.c.bf16 0.0, %v3747_v24  ;;  %v3754_v27 = vld [vmem:[#allocation0 + $0x7e8] sm:$0x3] }
 0x1e1   :  { %5877 = vst [vmem:[%s8665_s1 + $0xf9] sm:$0x1] %v3727_v20  ;;  %v3755_v28 = vpack.c.bf16 0.0, %v3754_v27  ;;  %v3761_v29 = vld [vmem:[#allocation0 + $0x7f0] sm:$0x3] }
 0x1e2   :  { %5878 = vst [vmem:[%s8665_s1 + $0xfa] sm:$0x1] %v3734_v22  ;;  %v3762_v30 = vpack.c.bf16 0.0, %v3761_v29  ;;  %v3768_v31 = vld [vmem:[#allocation0 + $0x7f8] sm:$0x3] }
 0x1e3   :  { %5879 = vst [vmem:[%s8665_s1 + $0xfb] sm:$0x1] %v3741_v25  ;;  %v3769_v32 = vpack.c.bf16 0.0, %v3768_v31  ;;  %v3663_v33 = vld [vmem:[#allocation0 + $0x780] sm:$0x3]  ;;  %v7833_v31 = vpop.permute.xlu1 %6396 }
 0x1e4   :  { %5880 = vst [vmem:[%s8665_s1 + $0xfc] sm:$0x1] %v3748_v26  ;;  %v3670_v34 = vld [vmem:[#allocation0 + $0x788] sm:$0x3]  ;;  %v3664_v36 = vpack.c.bf16 0.0, %v3663_v33 }
 0x1e5   :  { %5881 = vst [vmem:[%s8665_s1 + $0xfd] sm:$0x1] %v3755_v28  ;;  %v3677_v37 = vld [vmem:[#allocation0 + $0x790] sm:$0x3]  ;;  %v3671_v35 = vpack.c.bf16 0.0, %v3670_v34 }
 0x1e6   :  { %5882 = vst [vmem:[%s8665_s1 + $0xfe] sm:$0x1] %v3762_v30  ;;  %v3684_v38 = vld [vmem:[#allocation0 + $0x798] sm:$0x3]  ;;  %v3678_v39 = vpack.c.bf16 0.0, %v3677_v37 }
 0x1e7   :  { %5883 = vst [vmem:[%s8665_s1 + $0xff] sm:$0x1] %v3769_v32  ;;  %v3685_v41 = vpack.c.bf16 0.0, %v3684_v38 }
 0x1e8   :  { %1684 = vst.msk [vmem:[#allocation0 + $0x781] ss:$8 sm:$0xf0] %vm963_vm0, %v6378_v8  }
 0x1e9   :  { %5868 = vst [vmem:[%s8665_s1 + $0xf0] sm:$0x1] %v3664_v36 }
 0x1ea   :  { %5869 = vst [vmem:[%s8665_s1 + $0xf1] sm:$0x1] %v3671_v35 }
 0x1eb   :  { %5870 = vst [vmem:[%s8665_s1 + $0xf2] sm:$0x1] %v3678_v39 }
 0x1ec   :  { %5871 = vst [vmem:[%s8665_s1 + $0xf3] sm:$0x1] %v3685_v41 }
 0x1ed   :  { %1709 = vst.msk [vmem:[#allocation0 + $0x841] ss:$8 sm:$0xf] %vm963_vm0, %v6384_v42  }
 0x1ee   :  { %1711 = vst.msk [vmem:[#allocation0 + $0x841] ss:$8 sm:$0xf0] %vm963_vm0, %v6384_v42  }
 0x1ef   :  { %v3691_v44 = vld [vmem:[#allocation0 + $0x7a0] sm:$0x3]  ;;  %v3698_v45 = vld [vmem:[#allocation0 + $0x7a8] sm:$0x3]  ;;  %v3705_v46 = vld [vmem:[#allocation0 + $0x7b0] sm:$0x3] }
 0x1f0   :  { %v3692_v49 = vpack.c.bf16 0.0, %v3691_v44  ;;  %v3699_v50 = vpack.c.bf16 0.0, %v3698_v45  ;;  %v3706_v51 = vpack.c.bf16 0.0, %v3705_v46  ;;  %v3712_v48 = vld [vmem:[#allocation0 + $0x7b8] sm:$0x3] }
 0x1f1   :  { %v3713_v52 = vpack.c.bf16 0.0, %v3712_v48  ;;  %1700 = vst.msk [vmem:[#allocation0 + $0x801] ss:$8 sm:$0xf] %vm963_vm0, %v6383_v43  }
 0x1f2   :  { %5872 = vst [vmem:[%s8665_s1 + $0xf4] sm:$0x1] %v3692_v49 }
 0x1f3   :  { %5873 = vst [vmem:[%s8665_s1 + $0xf5] sm:$0x1] %v3699_v50  ;;  %v6394_v50 = vunpack.i.h.bf16 %v7777_v62 }
 0x1f4   :  { %5874 = vst [vmem:[%s8665_s1 + $0xf6] sm:$0x1] %v3706_v51  ;;  %v3831_v53 = vld [vmem:[#allocation0 + $0x840] sm:$0x3]  ;;  %v3838_v47 = vld [vmem:[#allocation0 + $0x848] sm:$0x3]  ;;  %v6393_v51 = vunpack.i.l.bf16 %v7777_v62 }
 0x1f5   :  { %5875 = vst [vmem:[%s8665_s1 + $0xf7] sm:$0x1] %v3713_v52  ;;  %v3832_v54 = vpack.c.bf16 0.0, %v3831_v53  ;;  %v3839_v55 = vpack.c.bf16 0.0, %v3838_v47  ;;  %v3845_v56 = vld [vmem:[#allocation0 + $0x850] sm:$0x3] }
 0x1f6   :  { %v3846_v57 = vpack.c.bf16 0.0, %v3845_v56  ;;  %v3852_v58 = vld [vmem:[#allocation0 + $0x858] sm:$0x3]  ;;  %v3859_v61 = vld [vmem:[#allocation0 + $0x860] sm:$0x3] }
 0x1f7   :  { %5892 = vst [vmem:[%s8665_s1 + $0x108] sm:$0x1] %v3832_v54  ;;  %v3853_v63 = vpack.c.bf16 0.0, %v3852_v58  ;;  %v3860_v0 = vpack.c.bf16 0.0, %v3859_v61  ;;  %v3866_v1 = vld [vmem:[#allocation0 + $0x868] sm:$0x3] }
 0x1f8   :  { %5893 = vst [vmem:[%s8665_s1 + $0x109] sm:$0x1] %v3839_v55  ;;  %v3867_v59 = vpack.c.bf16 0.0, %v3866_v1  ;;  %v3873_v60 = vld [vmem:[#allocation0 + $0x870] sm:$0x3] }
 0x1f9   :  { %5894 = vst [vmem:[%s8665_s1 + $0x10a] sm:$0x1] %v3846_v57  ;;  %v3874_v2 = vpack.c.bf16 0.0, %v3873_v60  ;;  %v3880_v3 = vld [vmem:[#allocation0 + $0x878] sm:$0x3] }
 0x1fa   :  { %5895 = vst [vmem:[%s8665_s1 + $0x10b] sm:$0x1] %v3853_v63  ;;  %v3881_v4 = vpack.c.bf16 0.0, %v3880_v3  ;;  %v3775_v5 = vld [vmem:[#allocation0 + $0x800] sm:$0x3] }
 0x1fb   :  { %5896 = vst [vmem:[%s8665_s1 + $0x10c] sm:$0x1] %v3860_v0  ;;  %v3782_v6 = vld [vmem:[#allocation0 + $0x808] sm:$0x3]  ;;  %v3776_v7 = vpack.c.bf16 0.0, %v3775_v5 }
 0x1fc   :  { %5897 = vst [vmem:[%s8665_s1 + $0x10d] sm:$0x1] %v3867_v59  ;;  %v3789_v8 = vld [vmem:[#allocation0 + $0x810] sm:$0x3]  ;;  %v3783_v9 = vpack.c.bf16 0.0, %v3782_v6 }
 0x1fd   :  { %5898 = vst [vmem:[%s8665_s1 + $0x10e] sm:$0x1] %v3874_v2  ;;  %v3796_v10 = vld [vmem:[#allocation0 + $0x818] sm:$0x3]  ;;  %v3790_v11 = vpack.c.bf16 0.0, %v3789_v8 }
 0x1fe   :  { %5899 = vst [vmem:[%s8665_s1 + $0x10f] sm:$0x1] %v3881_v4  ;;  %v3797_v12 = vpack.c.bf16 0.0, %v3796_v10 }
 0x1ff   :  { %1702 = vst.msk [vmem:[#allocation0 + $0x801] ss:$8 sm:$0xf0] %vm963_vm0, %v6383_v43  }
 0x200   :  { %5884 = vst [vmem:[%s8665_s1 + $0x100] sm:$0x1] %v3776_v7 }
 0x201   :  { %5885 = vst [vmem:[%s8665_s1 + $0x101] sm:$0x1] %v3783_v9 }
 0x202   :  { %5886 = vst [vmem:[%s8665_s1 + $0x102] sm:$0x1] %v3790_v11 }
 0x203   :  { %5887 = vst [vmem:[%s8665_s1 + $0x103] sm:$0x1] %v3797_v12 }
 0x204   :  { %1727 = vst.msk [vmem:[#allocation0 + $0x8c1] ss:$8 sm:$0xf] %vm963_vm0, %v6389_v13  }
 0x205   :  { %1729 = vst.msk [vmem:[#allocation0 + $0x8c1] ss:$8 sm:$0xf0] %vm963_vm0, %v6389_v13  }
 0x206   :  { %v3803_v15 = vld [vmem:[#allocation0 + $0x820] sm:$0x3]  ;;  %v3810_v16 = vld [vmem:[#allocation0 + $0x828] sm:$0x3]  ;;  %v3817_v17 = vld [vmem:[#allocation0 + $0x830] sm:$0x3] }
 0x207   :  { %v3804_v18 = vpack.c.bf16 0.0, %v3803_v15  ;;  %v3811_v19 = vpack.c.bf16 0.0, %v3810_v16  ;;  %v3818_v20 = vpack.c.bf16 0.0, %v3817_v17  ;;  %v3824_v21 = vld [vmem:[#allocation0 + $0x838] sm:$0x3]  ;;  %v7913_v17 = vpop.permute.xlu2 %6401 }
 0x208   :  { %v3825_v22 = vpack.c.bf16 0.0, %v3824_v21  ;;  %1718 = vst.msk [vmem:[#allocation0 + $0x881] ss:$8 sm:$0xf] %vm963_vm0, %v6388_v14  }
 0x209   :  { %5888 = vst [vmem:[%s8665_s1 + $0x104] sm:$0x1] %v3804_v18 }
 0x20a   :  { %5889 = vst [vmem:[%s8665_s1 + $0x105] sm:$0x1] %v3811_v19  ;;  %v6399_v19 = vunpack.i.h.bf16 %v7833_v31 }
 0x20b   :  { %5890 = vst [vmem:[%s8665_s1 + $0x106] sm:$0x1] %v3818_v20  ;;  %v3943_v23 = vld [vmem:[#allocation0 + $0x8c0] sm:$0x3]  ;;  %v3950_v24 = vld [vmem:[#allocation0 + $0x8c8] sm:$0x3]  ;;  %v6398_v20 = vunpack.i.l.bf16 %v7833_v31 }
 0x20c   :  { %5891 = vst [vmem:[%s8665_s1 + $0x107] sm:$0x1] %v3825_v22  ;;  %v3944_v25 = vpack.c.bf16 0.0, %v3943_v23  ;;  %v3951_v26 = vpack.c.bf16 0.0, %v3950_v24  ;;  %v3957_v27 = vld [vmem:[#allocation0 + $0x8d0] sm:$0x3] }
 0x20d   :  { %v3958_v28 = vpack.c.bf16 0.0, %v3957_v27  ;;  %v3964_v29 = vld [vmem:[#allocation0 + $0x8d8] sm:$0x3]  ;;  %v3971_v30 = vld [vmem:[#allocation0 + $0x8e0] sm:$0x3] }
 0x20e   :  { %5908 = vst [vmem:[%s8665_s1 + $0x118] sm:$0x1] %v3944_v25  ;;  %v3965_v32 = vpack.c.bf16 0.0, %v3964_v29  ;;  %v3972_v33 = vpack.c.bf16 0.0, %v3971_v30  ;;  %v3978_v34 = vld [vmem:[#allocation0 + $0x8e8] sm:$0x3] }
 0x20f   :  { %5909 = vst [vmem:[%s8665_s1 + $0x119] sm:$0x1] %v3951_v26  ;;  %v3979_v36 = vpack.c.bf16 0.0, %v3978_v34  ;;  %v3985_v37 = vld [vmem:[#allocation0 + $0x8f0] sm:$0x3] }
 0x210   :  { %5910 = vst [vmem:[%s8665_s1 + $0x11a] sm:$0x1] %v3958_v28  ;;  %v3986_v35 = vpack.c.bf16 0.0, %v3985_v37  ;;  %v3992_v38 = vld [vmem:[#allocation0 + $0x8f8] sm:$0x3] }
 0x211   :  { %5911 = vst [vmem:[%s8665_s1 + $0x11b] sm:$0x1] %v3965_v32  ;;  %v3993_v39 = vpack.c.bf16 0.0, %v3992_v38  ;;  %v3887_v40 = vld [vmem:[#allocation0 + $0x880] sm:$0x3] }
 0x212   :  { %5912 = vst [vmem:[%s8665_s1 + $0x11c] sm:$0x1] %v3972_v33  ;;  %v3894_v41 = vld [vmem:[#allocation0 + $0x888] sm:$0x3]  ;;  %v3888_v42 = vpack.c.bf16 0.0, %v3887_v40 }
 0x213   :  { %5913 = vst [vmem:[%s8665_s1 + $0x11d] sm:$0x1] %v3979_v36  ;;  %v3901_v43 = vld [vmem:[#allocation0 + $0x890] sm:$0x3]  ;;  %v3895_v44 = vpack.c.bf16 0.0, %v3894_v41 }
 0x214   :  { %5914 = vst [vmem:[%s8665_s1 + $0x11e] sm:$0x1] %v3986_v35  ;;  %v3908_v45 = vld [vmem:[#allocation0 + $0x898] sm:$0x3]  ;;  %v3902_v46 = vpack.c.bf16 0.0, %v3901_v43  ;;  %v7945_v35 = vpop.permute.xlu0 %6406 }
 0x215   :  { %5915 = vst [vmem:[%s8665_s1 + $0x11f] sm:$0x1] %v3993_v39  ;;  %v3909_v49 = vpack.c.bf16 0.0, %v3908_v45 }
 0x216   :  { %1720 = vst.msk [vmem:[#allocation0 + $0x881] ss:$8 sm:$0xf0] %vm963_vm0, %v6388_v14  }
 0x217   :  { %5900 = vst [vmem:[%s8665_s1 + $0x110] sm:$0x1] %v3888_v42 }
 0x218   :  { %5901 = vst [vmem:[%s8665_s1 + $0x111] sm:$0x1] %v3895_v44 }
 0x219   :  { %5902 = vst [vmem:[%s8665_s1 + $0x112] sm:$0x1] %v3902_v46 }
 0x21a   :  { %5903 = vst [vmem:[%s8665_s1 + $0x113] sm:$0x1] %v3909_v49 }
 0x21b   :  { %1745 = vst.msk [vmem:[#allocation0 + $0x941] ss:$8 sm:$0xf] %vm963_vm0, %v6394_v50  }
 0x21c   :  { %1747 = vst.msk [vmem:[#allocation0 + $0x941] ss:$8 sm:$0xf0] %vm963_vm0, %v6394_v50  }
 0x21d   :  { %v3915_v48 = vld [vmem:[#allocation0 + $0x8a0] sm:$0x3]  ;;  %v3922_v52 = vld [vmem:[#allocation0 + $0x8a8] sm:$0x3]  ;;  %v3929_v53 = vld [vmem:[#allocation0 + $0x8b0] sm:$0x3] }
 0x21e   :  { %v3916_v47 = vpack.c.bf16 0.0, %v3915_v48  ;;  %v3923_v54 = vpack.c.bf16 0.0, %v3922_v52  ;;  %v3930_v55 = vpack.c.bf16 0.0, %v3929_v53  ;;  %v3936_v56 = vld [vmem:[#allocation0 + $0x8b8] sm:$0x3] }
 0x21f   :  { %v3937_v57 = vpack.c.bf16 0.0, %v3936_v56  ;;  %1736 = vst.msk [vmem:[#allocation0 + $0x901] ss:$8 sm:$0xf] %vm963_vm0, %v6393_v51  }
 0x220   :  { %5904 = vst [vmem:[%s8665_s1 + $0x114] sm:$0x1] %v3916_v47 }
 0x221   :  { %5905 = vst [vmem:[%s8665_s1 + $0x115] sm:$0x1] %v3923_v54  ;;  %v6404_v54 = vunpack.i.h.bf16 %v7913_v17 }
 0x222   :  { %5906 = vst [vmem:[%s8665_s1 + $0x116] sm:$0x1] %v3930_v55  ;;  %v4055_v58 = vld [vmem:[#allocation0 + $0x940] sm:$0x3]  ;;  %v4062_v61 = vld [vmem:[#allocation0 + $0x948] sm:$0x3]  ;;  %v6403_v55 = vunpack.i.l.bf16 %v7913_v17 }
 0x223   :  { %5907 = vst [vmem:[%s8665_s1 + $0x117] sm:$0x1] %v3937_v57  ;;  %v4056_v62 = vpack.c.bf16 0.0, %v4055_v58  ;;  %v4063_v63 = vpack.c.bf16 0.0, %v4062_v61  ;;  %v4069_v0 = vld [vmem:[#allocation0 + $0x950] sm:$0x3] }
 0x224   :  { %v4070_v1 = vpack.c.bf16 0.0, %v4069_v0  ;;  %v4076_v59 = vld [vmem:[#allocation0 + $0x958] sm:$0x3]  ;;  %v4083_v60 = vld [vmem:[#allocation0 + $0x960] sm:$0x3] }
 0x225   :  { %5924 = vst [vmem:[%s8665_s1 + $0x128] sm:$0x1] %v4056_v62  ;;  %v4077_v2 = vpack.c.bf16 0.0, %v4076_v59  ;;  %v4084_v3 = vpack.c.bf16 0.0, %v4083_v60  ;;  %v4090_v4 = vld [vmem:[#allocation0 + $0x968] sm:$0x3] }
 0x226   :  { %5925 = vst [vmem:[%s8665_s1 + $0x129] sm:$0x1] %v4063_v63  ;;  %v4091_v5 = vpack.c.bf16 0.0, %v4090_v4  ;;  %v4097_v6 = vld [vmem:[#allocation0 + $0x970] sm:$0x3] }
 0x227   :  { %5926 = vst [vmem:[%s8665_s1 + $0x12a] sm:$0x1] %v4070_v1  ;;  %v4098_v7 = vpack.c.bf16 0.0, %v4097_v6  ;;  %v4104_v8 = vld [vmem:[#allocation0 + $0x978] sm:$0x3] }
 0x228   :  { %5927 = vst [vmem:[%s8665_s1 + $0x12b] sm:$0x1] %v4077_v2  ;;  %v4105_v9 = vpack.c.bf16 0.0, %v4104_v8  ;;  %v3999_v10 = vld [vmem:[#allocation0 + $0x900] sm:$0x3]  ;;  %v8001_v8 = vpop.permute.xlu1 %6411 }
 0x229   :  { %5928 = vst [vmem:[%s8665_s1 + $0x12c] sm:$0x1] %v4084_v3  ;;  %v4006_v11 = vld [vmem:[#allocation0 + $0x908] sm:$0x3]  ;;  %v4000_v12 = vpack.c.bf16 0.0, %v3999_v10 }
 0x22a   :  { %5929 = vst [vmem:[%s8665_s1 + $0x12d] sm:$0x1] %v4091_v5  ;;  %v4013_v13 = vld [vmem:[#allocation0 + $0x910] sm:$0x3]  ;;  %v4007_v14 = vpack.c.bf16 0.0, %v4006_v11 }
 0x22b   :  { %5930 = vst [vmem:[%s8665_s1 + $0x12e] sm:$0x1] %v4098_v7  ;;  %v4020_v15 = vld [vmem:[#allocation0 + $0x918] sm:$0x3]  ;;  %v4014_v16 = vpack.c.bf16 0.0, %v4013_v13 }
 0x22c   :  { %5931 = vst [vmem:[%s8665_s1 + $0x12f] sm:$0x1] %v4105_v9  ;;  %v4021_v18 = vpack.c.bf16 0.0, %v4020_v15 }
 0x22d   :  { %1738 = vst.msk [vmem:[#allocation0 + $0x901] ss:$8 sm:$0xf0] %vm963_vm0, %v6393_v51  }
 0x22e   :  { %5916 = vst [vmem:[%s8665_s1 + $0x120] sm:$0x1] %v4000_v12 }
 0x22f   :  { %5917 = vst [vmem:[%s8665_s1 + $0x121] sm:$0x1] %v4007_v14 }
 0x230   :  { %5918 = vst [vmem:[%s8665_s1 + $0x122] sm:$0x1] %v4014_v16 }
 0x231   :  { %5919 = vst [vmem:[%s8665_s1 + $0x123] sm:$0x1] %v4021_v18 }
 0x232   :  { %1763 = vst.msk [vmem:[#allocation0 + $0x9c1] ss:$8 sm:$0xf] %vm963_vm0, %v6399_v19  }
 0x233   :  { %1765 = vst.msk [vmem:[#allocation0 + $0x9c1] ss:$8 sm:$0xf0] %vm963_vm0, %v6399_v19  }
 0x234   :  { %v4027_v21 = vld [vmem:[#allocation0 + $0x920] sm:$0x3]  ;;  %v4034_v22 = vld [vmem:[#allocation0 + $0x928] sm:$0x3]  ;;  %v4041_v23 = vld [vmem:[#allocation0 + $0x930] sm:$0x3] }
 0x235   :  { %v4028_v24 = vpack.c.bf16 0.0, %v4027_v21  ;;  %v4035_v25 = vpack.c.bf16 0.0, %v4034_v22  ;;  %v4042_v26 = vpack.c.bf16 0.0, %v4041_v23  ;;  %v4048_v27 = vld [vmem:[#allocation0 + $0x938] sm:$0x3] }
 0x236   :  { %v4049_v28 = vpack.c.bf16 0.0, %v4048_v27  ;;  %1754 = vst.msk [vmem:[#allocation0 + $0x981] ss:$8 sm:$0xf] %vm963_vm0, %v6398_v20  }
 0x237   :  { %5920 = vst [vmem:[%s8665_s1 + $0x124] sm:$0x1] %v4028_v24 }
 0x238   :  { %5921 = vst [vmem:[%s8665_s1 + $0x125] sm:$0x1] %v4035_v25  ;;  %v6409_v25 = vunpack.i.h.bf16 %v7945_v35 }
 0x239   :  { %5922 = vst [vmem:[%s8665_s1 + $0x126] sm:$0x1] %v4042_v26  ;;  %v4167_v29 = vld [vmem:[#allocation0 + $0x9c0] sm:$0x3]  ;;  %v4174_v30 = vld [vmem:[#allocation0 + $0x9c8] sm:$0x3]  ;;  %v6408_v26 = vunpack.i.l.bf16 %v7945_v35 }
 0x23a   :  { %5923 = vst [vmem:[%s8665_s1 + $0x127] sm:$0x1] %v4049_v28  ;;  %v4168_v31 = vpack.c.bf16 0.0, %v4167_v29  ;;  %v4175_v32 = vpack.c.bf16 0.0, %v4174_v30  ;;  %v4181_v33 = vld [vmem:[#allocation0 + $0x9d0] sm:$0x3] }
 0x23b   :  { %v4182_v34 = vpack.c.bf16 0.0, %v4181_v33  ;;  %v4188_v36 = vld [vmem:[#allocation0 + $0x9d8] sm:$0x3]  ;;  %v4195_v37 = vld [vmem:[#allocation0 + $0x9e0] sm:$0x3] }
 0x23c   :  { %5940 = vst [vmem:[%s8665_s1 + $0x138] sm:$0x1] %v4168_v31  ;;  %v4189_v38 = vpack.c.bf16 0.0, %v4188_v36  ;;  %v4196_v39 = vpack.c.bf16 0.0, %v4195_v37  ;;  %v4202_v40 = vld [vmem:[#allocation0 + $0x9e8] sm:$0x3] }
 0x23d   :  { %5941 = vst [vmem:[%s8665_s1 + $0x139] sm:$0x1] %v4175_v32  ;;  %v4203_v41 = vpack.c.bf16 0.0, %v4202_v40  ;;  %v4209_v42 = vld [vmem:[#allocation0 + $0x9f0] sm:$0x3] }
 0x23e   :  { %5942 = vst [vmem:[%s8665_s1 + $0x13a] sm:$0x1] %v4182_v34  ;;  %v4210_v43 = vpack.c.bf16 0.0, %v4209_v42  ;;  %v4216_v44 = vld [vmem:[#allocation0 + $0x9f8] sm:$0x3] }
 0x23f   :  { %5943 = vst [vmem:[%s8665_s1 + $0x13b] sm:$0x1] %v4189_v38  ;;  %v4217_v45 = vpack.c.bf16 0.0, %v4216_v44  ;;  %v4111_v46 = vld [vmem:[#allocation0 + $0x980] sm:$0x3] }
 0x240   :  { %5944 = vst [vmem:[%s8665_s1 + $0x13c] sm:$0x1] %v4196_v39  ;;  %v4118_v49 = vld [vmem:[#allocation0 + $0x988] sm:$0x3]  ;;  %v4112_v50 = vpack.c.bf16 0.0, %v4111_v46 }
 0x241   :  { %5945 = vst [vmem:[%s8665_s1 + $0x13d] sm:$0x1] %v4203_v41  ;;  %v4125_v51 = vld [vmem:[#allocation0 + $0x990] sm:$0x3]  ;;  %v4119_v48 = vpack.c.bf16 0.0, %v4118_v49 }
 0x242   :  { %5946 = vst [vmem:[%s8665_s1 + $0x13e] sm:$0x1] %v4210_v43  ;;  %v4132_v52 = vld [vmem:[#allocation0 + $0x998] sm:$0x3]  ;;  %v4126_v53 = vpack.c.bf16 0.0, %v4125_v51 }
 0x243   :  { %5947 = vst [vmem:[%s8665_s1 + $0x13f] sm:$0x1] %v4217_v45  ;;  %v4133_v47 = vpack.c.bf16 0.0, %v4132_v52 }
 0x244   :  { %1756 = vst.msk [vmem:[#allocation0 + $0x981] ss:$8 sm:$0xf0] %vm963_vm0, %v6398_v20  }
 0x245   :  { %5932 = vst [vmem:[%s8665_s1 + $0x130] sm:$0x1] %v4112_v50 }
 0x246   :  { %5933 = vst [vmem:[%s8665_s1 + $0x131] sm:$0x1] %v4119_v48 }
 0x247   :  { %5934 = vst [vmem:[%s8665_s1 + $0x132] sm:$0x1] %v4126_v53 }
 0x248   :  { %5935 = vst [vmem:[%s8665_s1 + $0x133] sm:$0x1] %v4133_v47 }
 0x249   :  { %1781 = vst.msk [vmem:[#allocation0 + $0xa41] ss:$8 sm:$0xf] %vm963_vm0, %v6404_v54  }
 0x24a   :  { %1783 = vst.msk [vmem:[#allocation0 + $0xa41] ss:$8 sm:$0xf0] %vm963_vm0, %v6404_v54  }
 0x24b   :  { %v4139_v56 = vld [vmem:[#allocation0 + $0x9a0] sm:$0x3]  ;;  %v4146_v57 = vld [vmem:[#allocation0 + $0x9a8] sm:$0x3]  ;;  %v4153_v58 = vld [vmem:[#allocation0 + $0x9b0] sm:$0x3] }
 0x24c   :  { %v4140_v61 = vpack.c.bf16 0.0, %v4139_v56  ;;  %v4147_v62 = vpack.c.bf16 0.0, %v4146_v57  ;;  %v4154_v63 = vpack.c.bf16 0.0, %v4153_v58  ;;  %v4160_v0 = vld [vmem:[#allocation0 + $0x9b8] sm:$0x3]  ;;  %v8081_v58 = vpop.permute.xlu2 %6416 }
 0x24d   :  { %v4161_v1 = vpack.c.bf16 0.0, %v4160_v0  ;;  %1772 = vst.msk [vmem:[#allocation0 + $0xa01] ss:$8 sm:$0xf] %vm963_vm0, %v6403_v55  }
 0x24e   :  { %5936 = vst [vmem:[%s8665_s1 + $0x134] sm:$0x1] %v4140_v61 }
 0x24f   :  { %5937 = vst [vmem:[%s8665_s1 + $0x135] sm:$0x1] %v4147_v62  ;;  %v6414_v62 = vunpack.i.h.bf16 %v8001_v8 }
 0x250   :  { %5938 = vst [vmem:[%s8665_s1 + $0x136] sm:$0x1] %v4154_v63  ;;  %v4279_v59 = vld [vmem:[#allocation0 + $0xa40] sm:$0x3]  ;;  %v4286_v60 = vld [vmem:[#allocation0 + $0xa48] sm:$0x3]  ;;  %v6413_v63 = vunpack.i.l.bf16 %v8001_v8 }
 0x251   :  { %5939 = vst [vmem:[%s8665_s1 + $0x137] sm:$0x1] %v4161_v1  ;;  %v4280_v2 = vpack.c.bf16 0.0, %v4279_v59  ;;  %v4287_v3 = vpack.c.bf16 0.0, %v4286_v60  ;;  %v4293_v4 = vld [vmem:[#allocation0 + $0xa50] sm:$0x3] }
 0x252   :  { %v4294_v5 = vpack.c.bf16 0.0, %v4293_v4  ;;  %v4300_v6 = vld [vmem:[#allocation0 + $0xa58] sm:$0x3]  ;;  %v4307_v7 = vld [vmem:[#allocation0 + $0xa60] sm:$0x3] }
 0x253   :  { %5956 = vst [vmem:[%s8665_s1 + $0x148] sm:$0x1] %v4280_v2  ;;  %v4301_v9 = vpack.c.bf16 0.0, %v4300_v6  ;;  %v4308_v10 = vpack.c.bf16 0.0, %v4307_v7  ;;  %v4314_v11 = vld [vmem:[#allocation0 + $0xa68] sm:$0x3] }
 0x254   :  { %5957 = vst [vmem:[%s8665_s1 + $0x149] sm:$0x1] %v4287_v3  ;;  %v4315_v12 = vpack.c.bf16 0.0, %v4314_v11  ;;  %v4321_v13 = vld [vmem:[#allocation0 + $0xa70] sm:$0x3] }
 0x255   :  { %5958 = vst [vmem:[%s8665_s1 + $0x14a] sm:$0x1] %v4294_v5  ;;  %v4322_v14 = vpack.c.bf16 0.0, %v4321_v13  ;;  %v4328_v15 = vld [vmem:[#allocation0 + $0xa78] sm:$0x3] }
 0x256   :  { %5959 = vst [vmem:[%s8665_s1 + $0x14b] sm:$0x1] %v4301_v9  ;;  %v4329_v16 = vpack.c.bf16 0.0, %v4328_v15  ;;  %v4223_v17 = vld [vmem:[#allocation0 + $0xa00] sm:$0x3] }
 0x257   :  { %5960 = vst [vmem:[%s8665_s1 + $0x14c] sm:$0x1] %v4308_v10  ;;  %v4230_v18 = vld [vmem:[#allocation0 + $0xa08] sm:$0x3]  ;;  %v4224_v19 = vpack.c.bf16 0.0, %v4223_v17 }
 0x258   :  { %5961 = vst [vmem:[%s8665_s1 + $0x14d] sm:$0x1] %v4315_v12  ;;  %v4237_v20 = vld [vmem:[#allocation0 + $0xa10] sm:$0x3]  ;;  %v4231_v21 = vpack.c.bf16 0.0, %v4230_v18 }
 0x259   :  { %5962 = vst [vmem:[%s8665_s1 + $0x14e] sm:$0x1] %v4322_v14  ;;  %v4244_v22 = vld [vmem:[#allocation0 + $0xa18] sm:$0x3]  ;;  %v4238_v23 = vpack.c.bf16 0.0, %v4237_v20  ;;  %v8113_v14 = vpop.permute.xlu0 %6421 }
 0x25a   :  { %5963 = vst [vmem:[%s8665_s1 + $0x14f] sm:$0x1] %v4329_v16  ;;  %v4245_v24 = vpack.c.bf16 0.0, %v4244_v22 }
 0x25b   :  { %1774 = vst.msk [vmem:[#allocation0 + $0xa01] ss:$8 sm:$0xf0] %vm963_vm0, %v6403_v55  }
 0x25c   :  { %5948 = vst [vmem:[%s8665_s1 + $0x140] sm:$0x1] %v4224_v19 }
 0x25d   :  { %5949 = vst [vmem:[%s8665_s1 + $0x141] sm:$0x1] %v4231_v21 }
 0x25e   :  { %5950 = vst [vmem:[%s8665_s1 + $0x142] sm:$0x1] %v4238_v23 }
 0x25f   :  { %5951 = vst [vmem:[%s8665_s1 + $0x143] sm:$0x1] %v4245_v24 }
 0x260   :  { %1799 = vst.msk [vmem:[#allocation0 + $0xac1] ss:$8 sm:$0xf] %vm963_vm0, %v6409_v25  }
 0x261   :  { %1801 = vst.msk [vmem:[#allocation0 + $0xac1] ss:$8 sm:$0xf0] %vm963_vm0, %v6409_v25  }
 0x262   :  { %v4251_v27 = vld [vmem:[#allocation0 + $0xa20] sm:$0x3]  ;;  %v4258_v28 = vld [vmem:[#allocation0 + $0xa28] sm:$0x3]  ;;  %v4265_v29 = vld [vmem:[#allocation0 + $0xa30] sm:$0x3] }
 0x263   :  { %v4252_v30 = vpack.c.bf16 0.0, %v4251_v27  ;;  %v4259_v31 = vpack.c.bf16 0.0, %v4258_v28  ;;  %v4266_v32 = vpack.c.bf16 0.0, %v4265_v29  ;;  %v4272_v33 = vld [vmem:[#allocation0 + $0xa38] sm:$0x3] }
 0x264   :  { %v4273_v34 = vpack.c.bf16 0.0, %v4272_v33  ;;  %1790 = vst.msk [vmem:[#allocation0 + $0xa81] ss:$8 sm:$0xf] %vm963_vm0, %v6408_v26  }
 0x265   :  { %5952 = vst [vmem:[%s8665_s1 + $0x144] sm:$0x1] %v4252_v30 }
 0x266   :  { %5953 = vst [vmem:[%s8665_s1 + $0x145] sm:$0x1] %v4259_v31  ;;  %v6419_v31 = vunpack.i.h.bf16 %v8081_v58 }
 0x267   :  { %5954 = vst [vmem:[%s8665_s1 + $0x146] sm:$0x1] %v4266_v32  ;;  %v4391_v36 = vld [vmem:[#allocation0 + $0xac0] sm:$0x3]  ;;  %v4398_v37 = vld [vmem:[#allocation0 + $0xac8] sm:$0x3]  ;;  %v6418_v32 = vunpack.i.l.bf16 %v8081_v58 }
 0x268   :  { %5955 = vst [vmem:[%s8665_s1 + $0x147] sm:$0x1] %v4273_v34  ;;  %v4392_v35 = vpack.c.bf16 0.0, %v4391_v36  ;;  %v4399_v38 = vpack.c.bf16 0.0, %v4398_v37  ;;  %v4405_v39 = vld [vmem:[#allocation0 + $0xad0] sm:$0x3] }
 0x269   :  { %v4406_v40 = vpack.c.bf16 0.0, %v4405_v39  ;;  %v4412_v41 = vld [vmem:[#allocation0 + $0xad8] sm:$0x3]  ;;  %v4419_v42 = vld [vmem:[#allocation0 + $0xae0] sm:$0x3] }
 0x26a   :  { %5972 = vst [vmem:[%s8665_s1 + $0x158] sm:$0x1] %v4392_v35  ;;  %v4413_v43 = vpack.c.bf16 0.0, %v4412_v41  ;;  %v4420_v44 = vpack.c.bf16 0.0, %v4419_v42  ;;  %v4426_v45 = vld [vmem:[#allocation0 + $0xae8] sm:$0x3] }
 0x26b   :  { %5973 = vst [vmem:[%s8665_s1 + $0x159] sm:$0x1] %v4399_v38  ;;  %v4427_v46 = vpack.c.bf16 0.0, %v4426_v45  ;;  %v4433_v49 = vld [vmem:[#allocation0 + $0xaf0] sm:$0x3] }
 0x26c   :  { %5974 = vst [vmem:[%s8665_s1 + $0x15a] sm:$0x1] %v4406_v40  ;;  %v4434_v50 = vpack.c.bf16 0.0, %v4433_v49  ;;  %v4440_v51 = vld [vmem:[#allocation0 + $0xaf8] sm:$0x3] }
 0x26d   :  { %5975 = vst [vmem:[%s8665_s1 + $0x15b] sm:$0x1] %v4413_v43  ;;  %v4441_v48 = vpack.c.bf16 0.0, %v4440_v51  ;;  %v4335_v52 = vld [vmem:[#allocation0 + $0xa80] sm:$0x3]  ;;  %v8169_v51 = vpop.permute.xlu1 %6426 }
 0x26e   :  { %5976 = vst [vmem:[%s8665_s1 + $0x15c] sm:$0x1] %v4420_v44  ;;  %v4342_v53 = vld [vmem:[#allocation0 + $0xa88] sm:$0x3]  ;;  %v4336_v47 = vpack.c.bf16 0.0, %v4335_v52 }
 0x26f   :  { %5977 = vst [vmem:[%s8665_s1 + $0x15d] sm:$0x1] %v4427_v46  ;;  %v4349_v54 = vld [vmem:[#allocation0 + $0xa90] sm:$0x3]  ;;  %v4343_v55 = vpack.c.bf16 0.0, %v4342_v53 }
 0x270   :  { %5978 = vst [vmem:[%s8665_s1 + $0x15e] sm:$0x1] %v4434_v50  ;;  %v4356_v56 = vld [vmem:[#allocation0 + $0xa98] sm:$0x3]  ;;  %v4350_v57 = vpack.c.bf16 0.0, %v4349_v54 }
 0x271   :  { %5979 = vst [vmem:[%s8665_s1 + $0x15f] sm:$0x1] %v4441_v48  ;;  %v4357_v61 = vpack.c.bf16 0.0, %v4356_v56 }
 0x272   :  { %1792 = vst.msk [vmem:[#allocation0 + $0xa81] ss:$8 sm:$0xf0] %vm963_vm0, %v6408_v26  }
 0x273   :  { %5964 = vst [vmem:[%s8665_s1 + $0x150] sm:$0x1] %v4336_v47 }
 0x274   :  { %5965 = vst [vmem:[%s8665_s1 + $0x151] sm:$0x1] %v4343_v55 }
 0x275   :  { %5966 = vst [vmem:[%s8665_s1 + $0x152] sm:$0x1] %v4350_v57 }
 0x276   :  { %5967 = vst [vmem:[%s8665_s1 + $0x153] sm:$0x1] %v4357_v61 }
 0x277   :  { %1817 = vst.msk [vmem:[#allocation0 + $0xb41] ss:$8 sm:$0xf] %vm963_vm0, %v6414_v62  }
 0x278   :  { %1819 = vst.msk [vmem:[#allocation0 + $0xb41] ss:$8 sm:$0xf0] %vm963_vm0, %v6414_v62  }
 0x279   :  { %v4363_v0 = vld [vmem:[#allocation0 + $0xaa0] sm:$0x3]  ;;  %v4370_v1 = vld [vmem:[#allocation0 + $0xaa8] sm:$0x3]  ;;  %v4377_v59 = vld [vmem:[#allocation0 + $0xab0] sm:$0x3] }
 0x27a   :  { %v4364_v60 = vpack.c.bf16 0.0, %v4363_v0  ;;  %v4371_v2 = vpack.c.bf16 0.0, %v4370_v1  ;;  %v4378_v3 = vpack.c.bf16 0.0, %v4377_v59  ;;  %v4384_v4 = vld [vmem:[#allocation0 + $0xab8] sm:$0x3] }
 0x27b   :  { %v4385_v5 = vpack.c.bf16 0.0, %v4384_v4  ;;  %1808 = vst.msk [vmem:[#allocation0 + $0xb01] ss:$8 sm:$0xf] %vm963_vm0, %v6413_v63  }
 0x27c   :  { %5968 = vst [vmem:[%s8665_s1 + $0x154] sm:$0x1] %v4364_v60 }
 0x27d   :  { %5969 = vst [vmem:[%s8665_s1 + $0x155] sm:$0x1] %v4371_v2  ;;  %v6424_v2 = vunpack.i.h.bf16 %v8113_v14 }
 0x27e   :  { %5970 = vst [vmem:[%s8665_s1 + $0x156] sm:$0x1] %v4378_v3  ;;  %v4503_v6 = vld [vmem:[#allocation0 + $0xb40] sm:$0x3]  ;;  %v4510_v7 = vld [vmem:[#allocation0 + $0xb48] sm:$0x3]  ;;  %v6423_v3 = vunpack.i.l.bf16 %v8113_v14 }
 0x27f   :  { %5971 = vst [vmem:[%s8665_s1 + $0x157] sm:$0x1] %v4385_v5  ;;  %v4504_v8 = vpack.c.bf16 0.0, %v4503_v6  ;;  %v4511_v9 = vpack.c.bf16 0.0, %v4510_v7  ;;  %v4517_v10 = vld [vmem:[#allocation0 + $0xb50] sm:$0x3] }
 0x280   :  { %v4518_v11 = vpack.c.bf16 0.0, %v4517_v10  ;;  %v4524_v12 = vld [vmem:[#allocation0 + $0xb58] sm:$0x3]  ;;  %v4531_v13 = vld [vmem:[#allocation0 + $0xb60] sm:$0x3] }
 0x281   :  { %5988 = vst [vmem:[%s8665_s1 + $0x168] sm:$0x1] %v4504_v8  ;;  %v4525_v15 = vpack.c.bf16 0.0, %v4524_v12  ;;  %v4532_v16 = vpack.c.bf16 0.0, %v4531_v13  ;;  %v4538_v17 = vld [vmem:[#allocation0 + $0xb68] sm:$0x3] }
 0x282   :  { %5989 = vst [vmem:[%s8665_s1 + $0x169] sm:$0x1] %v4511_v9  ;;  %v4539_v18 = vpack.c.bf16 0.0, %v4538_v17  ;;  %v4545_v19 = vld [vmem:[#allocation0 + $0xb70] sm:$0x3] }
 0x283   :  { %5990 = vst [vmem:[%s8665_s1 + $0x16a] sm:$0x1] %v4518_v11  ;;  %v4546_v20 = vpack.c.bf16 0.0, %v4545_v19  ;;  %v4552_v21 = vld [vmem:[#allocation0 + $0xb78] sm:$0x3] }
 0x284   :  { %5991 = vst [vmem:[%s8665_s1 + $0x16b] sm:$0x1] %v4525_v15  ;;  %v4553_v22 = vpack.c.bf16 0.0, %v4552_v21  ;;  %v4447_v23 = vld [vmem:[#allocation0 + $0xb00] sm:$0x3] }
 0x285   :  { %5992 = vst [vmem:[%s8665_s1 + $0x16c] sm:$0x1] %v4532_v16  ;;  %v4454_v24 = vld [vmem:[#allocation0 + $0xb08] sm:$0x3]  ;;  %v4448_v25 = vpack.c.bf16 0.0, %v4447_v23 }
 0x286   :  { %5993 = vst [vmem:[%s8665_s1 + $0x16d] sm:$0x1] %v4539_v18  ;;  %v4461_v26 = vld [vmem:[#allocation0 + $0xb10] sm:$0x3]  ;;  %v4455_v27 = vpack.c.bf16 0.0, %v4454_v24 }
 0x287   :  { %5994 = vst [vmem:[%s8665_s1 + $0x16e] sm:$0x1] %v4546_v20  ;;  %v4468_v28 = vld [vmem:[#allocation0 + $0xb18] sm:$0x3]  ;;  %v4462_v29 = vpack.c.bf16 0.0, %v4461_v26 }
 0x288   :  { %5995 = vst [vmem:[%s8665_s1 + $0x16f] sm:$0x1] %v4553_v22  ;;  %v4469_v30 = vpack.c.bf16 0.0, %v4468_v28 }
 0x289   :  { %1810 = vst.msk [vmem:[#allocation0 + $0xb01] ss:$8 sm:$0xf0] %vm963_vm0, %v6413_v63  }
 0x28a   :  { %5980 = vst [vmem:[%s8665_s1 + $0x160] sm:$0x1] %v4448_v25 }
 0x28b   :  { %5981 = vst [vmem:[%s8665_s1 + $0x161] sm:$0x1] %v4455_v27 }
 0x28c   :  { %5982 = vst [vmem:[%s8665_s1 + $0x162] sm:$0x1] %v4462_v29 }
 0x28d   :  { %5983 = vst [vmem:[%s8665_s1 + $0x163] sm:$0x1] %v4469_v30 }
 0x28e   :  { %1835 = vst.msk [vmem:[#allocation0 + $0xbc1] ss:$8 sm:$0xf] %vm963_vm0, %v6419_v31  }
 0x28f   :  { %1837 = vst.msk [vmem:[#allocation0 + $0xbc1] ss:$8 sm:$0xf0] %vm963_vm0, %v6419_v31  }
 0x290   :  { %v4475_v33 = vld [vmem:[#allocation0 + $0xb20] sm:$0x3]  ;;  %v4482_v34 = vld [vmem:[#allocation0 + $0xb28] sm:$0x3]  ;;  %v4489_v36 = vld [vmem:[#allocation0 + $0xb30] sm:$0x3] }
 0x291   :  { %v4476_v37 = vpack.c.bf16 0.0, %v4475_v33  ;;  %v4483_v35 = vpack.c.bf16 0.0, %v4482_v34  ;;  %v4490_v38 = vpack.c.bf16 0.0, %v4489_v36  ;;  %v4496_v39 = vld [vmem:[#allocation0 + $0xb38] sm:$0x3]  ;;  %v8249_v36 = vpop.permute.xlu2 %6431 }
 0x292   :  { %v4497_v40 = vpack.c.bf16 0.0, %v4496_v39  ;;  %1826 = vst.msk [vmem:[#allocation0 + $0xb81] ss:$8 sm:$0xf] %vm963_vm0, %v6418_v32  }
 0x293   :  { %5984 = vst [vmem:[%s8665_s1 + $0x164] sm:$0x1] %v4476_v37 }
 0x294   :  { %5985 = vst [vmem:[%s8665_s1 + $0x165] sm:$0x1] %v4483_v35  ;;  %v6429_v35 = vunpack.i.h.bf16 %v8169_v51 }
 0x295   :  { %5986 = vst [vmem:[%s8665_s1 + $0x166] sm:$0x1] %v4490_v38  ;;  %v4615_v41 = vld [vmem:[#allocation0 + $0xbc0] sm:$0x3]  ;;  %v4622_v42 = vld [vmem:[#allocation0 + $0xbc8] sm:$0x3]  ;;  %v6428_v38 = vunpack.i.l.bf16 %v8169_v51 }
 0x296   :  { %5987 = vst [vmem:[%s8665_s1 + $0x167] sm:$0x1] %v4497_v40  ;;  %v4616_v43 = vpack.c.bf16 0.0, %v4615_v41  ;;  %v4623_v44 = vpack.c.bf16 0.0, %v4622_v42  ;;  %v4629_v45 = vld [vmem:[#allocation0 + $0xbd0] sm:$0x3] }
 0x297   :  { %v4630_v46 = vpack.c.bf16 0.0, %v4629_v45  ;;  %v4636_v49 = vld [vmem:[#allocation0 + $0xbd8] sm:$0x3]  ;;  %v4643_v50 = vld [vmem:[#allocation0 + $0xbe0] sm:$0x3] }
 0x298   :  { %6004 = vst [vmem:[%s8665_s1 + $0x178] sm:$0x1] %v4616_v43  ;;  %v4637_v48 = vpack.c.bf16 0.0, %v4636_v49  ;;  %v4644_v52 = vpack.c.bf16 0.0, %v4643_v50  ;;  %v4650_v53 = vld [vmem:[#allocation0 + $0xbe8] sm:$0x3] }
 0x299   :  { %6005 = vst [vmem:[%s8665_s1 + $0x179] sm:$0x1] %v4623_v44  ;;  %v4651_v47 = vpack.c.bf16 0.0, %v4650_v53  ;;  %v4657_v54 = vld [vmem:[#allocation0 + $0xbf0] sm:$0x3] }
 0x29a   :  { %6006 = vst [vmem:[%s8665_s1 + $0x17a] sm:$0x1] %v4630_v46  ;;  %v4658_v55 = vpack.c.bf16 0.0, %v4657_v54  ;;  %v4664_v56 = vld [vmem:[#allocation0 + $0xbf8] sm:$0x3] }
 0x29b   :  { %6007 = vst [vmem:[%s8665_s1 + $0x17b] sm:$0x1] %v4637_v48  ;;  %v4665_v57 = vpack.c.bf16 0.0, %v4664_v56  ;;  %v4559_v58 = vld [vmem:[#allocation0 + $0xb80] sm:$0x3] }
 0x29c   :  { %6008 = vst [vmem:[%s8665_s1 + $0x17c] sm:$0x1] %v4644_v52  ;;  %v4566_v61 = vld [vmem:[#allocation0 + $0xb88] sm:$0x3]  ;;  %v4560_v62 = vpack.c.bf16 0.0, %v4559_v58 }
 0x29d   :  { %6009 = vst [vmem:[%s8665_s1 + $0x17d] sm:$0x1] %v4651_v47  ;;  %v4573_v63 = vld [vmem:[#allocation0 + $0xb90] sm:$0x3]  ;;  %v4567_v0 = vpack.c.bf16 0.0, %v4566_v61 }
 0x29e   :  { %6010 = vst [vmem:[%s8665_s1 + $0x17e] sm:$0x1] %v4658_v55  ;;  %v4580_v1 = vld [vmem:[#allocation0 + $0xb98] sm:$0x3]  ;;  %v4574_v59 = vpack.c.bf16 0.0, %v4573_v63  ;;  %v8281_v55 = vpop.permute.xlu0 %6436 }
 0x29f   :  { %6011 = vst [vmem:[%s8665_s1 + $0x17f] sm:$0x1] %v4665_v57  ;;  %v4581_v60 = vpack.c.bf16 0.0, %v4580_v1 }
 0x2a0   :  { %1828 = vst.msk [vmem:[#allocation0 + $0xb81] ss:$8 sm:$0xf0] %vm963_vm0, %v6418_v32  }
 0x2a1   :  { %5996 = vst [vmem:[%s8665_s1 + $0x170] sm:$0x1] %v4560_v62 }
 0x2a2   :  { %5997 = vst [vmem:[%s8665_s1 + $0x171] sm:$0x1] %v4567_v0 }
 0x2a3   :  { %5998 = vst [vmem:[%s8665_s1 + $0x172] sm:$0x1] %v4574_v59 }
 0x2a4   :  { %5999 = vst [vmem:[%s8665_s1 + $0x173] sm:$0x1] %v4581_v60 }
 0x2a5   :  { %1853 = vst.msk [vmem:[#allocation0 + $0xc41] ss:$8 sm:$0xf] %vm963_vm0, %v6424_v2  }
 0x2a6   :  { %1855 = vst.msk [vmem:[#allocation0 + $0xc41] ss:$8 sm:$0xf0] %vm963_vm0, %v6424_v2  }
 0x2a7   :  { %v4587_v4 = vld [vmem:[#allocation0 + $0xba0] sm:$0x3]  ;;  %v4594_v5 = vld [vmem:[#allocation0 + $0xba8] sm:$0x3]  ;;  %v4601_v6 = vld [vmem:[#allocation0 + $0xbb0] sm:$0x3] }
 0x2a8   :  { %v4588_v7 = vpack.c.bf16 0.0, %v4587_v4  ;;  %v4595_v8 = vpack.c.bf16 0.0, %v4594_v5  ;;  %v4602_v9 = vpack.c.bf16 0.0, %v4601_v6  ;;  %v4608_v10 = vld [vmem:[#allocation0 + $0xbb8] sm:$0x3] }
 0x2a9   :  { %v4609_v11 = vpack.c.bf16 0.0, %v4608_v10  ;;  %1844 = vst.msk [vmem:[#allocation0 + $0xc01] ss:$8 sm:$0xf] %vm963_vm0, %v6423_v3  }
 0x2aa   :  { %6000 = vst [vmem:[%s8665_s1 + $0x174] sm:$0x1] %v4588_v7 }
 0x2ab   :  { %6001 = vst [vmem:[%s8665_s1 + $0x175] sm:$0x1] %v4595_v8  ;;  %v6434_v8 = vunpack.i.h.bf16 %v8249_v36 }
 0x2ac   :  { %6002 = vst [vmem:[%s8665_s1 + $0x176] sm:$0x1] %v4602_v9  ;;  %v4727_v12 = vld [vmem:[#allocation0 + $0xc40] sm:$0x3]  ;;  %v4734_v13 = vld [vmem:[#allocation0 + $0xc48] sm:$0x3]  ;;  %v6433_v9 = vunpack.i.l.bf16 %v8249_v36 }
 0x2ad   :  { %6003 = vst [vmem:[%s8665_s1 + $0x177] sm:$0x1] %v4609_v11  ;;  %v4728_v14 = vpack.c.bf16 0.0, %v4727_v12  ;;  %v4735_v15 = vpack.c.bf16 0.0, %v4734_v13  ;;  %v4741_v16 = vld [vmem:[#allocation0 + $0xc50] sm:$0x3] }
 0x2ae   :  { %v4742_v17 = vpack.c.bf16 0.0, %v4741_v16  ;;  %v4748_v18 = vld [vmem:[#allocation0 + $0xc58] sm:$0x3]  ;;  %v4755_v19 = vld [vmem:[#allocation0 + $0xc60] sm:$0x3] }
 0x2af   :  { %6020 = vst [vmem:[%s8665_s1 + $0x188] sm:$0x1] %v4728_v14  ;;  %v4749_v20 = vpack.c.bf16 0.0, %v4748_v18  ;;  %v4756_v21 = vpack.c.bf16 0.0, %v4755_v19  ;;  %v4762_v22 = vld [vmem:[#allocation0 + $0xc68] sm:$0x3] }
 0x2b0   :  { %6021 = vst [vmem:[%s8665_s1 + $0x189] sm:$0x1] %v4735_v15  ;;  %v4763_v23 = vpack.c.bf16 0.0, %v4762_v22  ;;  %v4769_v24 = vld [vmem:[#allocation0 + $0xc70] sm:$0x3] }
 0x2b1   :  { %6022 = vst [vmem:[%s8665_s1 + $0x18a] sm:$0x1] %v4742_v17  ;;  %v4770_v25 = vpack.c.bf16 0.0, %v4769_v24  ;;  %v4776_v26 = vld [vmem:[#allocation0 + $0xc78] sm:$0x3] }
 0x2b2   :  { %6023 = vst [vmem:[%s8665_s1 + $0x18b] sm:$0x1] %v4749_v20  ;;  %v4777_v27 = vpack.c.bf16 0.0, %v4776_v26  ;;  %v4671_v28 = vld [vmem:[#allocation0 + $0xc00] sm:$0x3]  ;;  %v8337_v26 = vpop.permute.xlu1 %6441 }
 0x2b3   :  { %6024 = vst [vmem:[%s8665_s1 + $0x18c] sm:$0x1] %v4756_v21  ;;  %v4678_v29 = vld [vmem:[#allocation0 + $0xc08] sm:$0x3]  ;;  %v4672_v30 = vpack.c.bf16 0.0, %v4671_v28 }
 0x2b4   :  { %6025 = vst [vmem:[%s8665_s1 + $0x18d] sm:$0x1] %v4763_v23  ;;  %v4685_v31 = vld [vmem:[#allocation0 + $0xc10] sm:$0x3]  ;;  %v4679_v32 = vpack.c.bf16 0.0, %v4678_v29 }
 0x2b5   :  { %6026 = vst [vmem:[%s8665_s1 + $0x18e] sm:$0x1] %v4770_v25  ;;  %v4692_v33 = vld [vmem:[#allocation0 + $0xc18] sm:$0x3]  ;;  %v4686_v34 = vpack.c.bf16 0.0, %v4685_v31 }
 0x2b6   :  { %6027 = vst [vmem:[%s8665_s1 + $0x18f] sm:$0x1] %v4777_v27  ;;  %v4693_v37 = vpack.c.bf16 0.0, %v4692_v33 }
 0x2b7   :  { %1846 = vst.msk [vmem:[#allocation0 + $0xc01] ss:$8 sm:$0xf0] %vm963_vm0, %v6423_v3  }
 0x2b8   :  { %6012 = vst [vmem:[%s8665_s1 + $0x180] sm:$0x1] %v4672_v30 }
 0x2b9   :  { %6013 = vst [vmem:[%s8665_s1 + $0x181] sm:$0x1] %v4679_v32 }
 0x2ba   :  { %6014 = vst [vmem:[%s8665_s1 + $0x182] sm:$0x1] %v4686_v34 }
 0x2bb   :  { %6015 = vst [vmem:[%s8665_s1 + $0x183] sm:$0x1] %v4693_v37 }
 0x2bc   :  { %1871 = vst.msk [vmem:[#allocation0 + $0xcc1] ss:$8 sm:$0xf] %vm963_vm0, %v6429_v35  }
 0x2bd   :  { %1873 = vst.msk [vmem:[#allocation0 + $0xcc1] ss:$8 sm:$0xf0] %vm963_vm0, %v6429_v35  }
 0x2be   :  { %v4699_v39 = vld [vmem:[#allocation0 + $0xc20] sm:$0x3]  ;;  %v4706_v40 = vld [vmem:[#allocation0 + $0xc28] sm:$0x3]  ;;  %v4713_v41 = vld [vmem:[#allocation0 + $0xc30] sm:$0x3] }
 0x2bf   :  { %v4700_v42 = vpack.c.bf16 0.0, %v4699_v39  ;;  %v4707_v43 = vpack.c.bf16 0.0, %v4706_v40  ;;  %v4714_v44 = vpack.c.bf16 0.0, %v4713_v41  ;;  %v4720_v45 = vld [vmem:[#allocation0 + $0xc38] sm:$0x3] }
 0x2c0   :  { %v4721_v46 = vpack.c.bf16 0.0, %v4720_v45  ;;  %1862 = vst.msk [vmem:[#allocation0 + $0xc81] ss:$8 sm:$0xf] %vm963_vm0, %v6428_v38  }
 0x2c1   :  { %6016 = vst [vmem:[%s8665_s1 + $0x184] sm:$0x1] %v4700_v42 }
 0x2c2   :  { %6017 = vst [vmem:[%s8665_s1 + $0x185] sm:$0x1] %v4707_v43  ;;  %v6439_v43 = vunpack.i.h.bf16 %v8281_v55 }
 0x2c3   :  { %6018 = vst [vmem:[%s8665_s1 + $0x186] sm:$0x1] %v4714_v44  ;;  %v4839_v49 = vld [vmem:[#allocation0 + $0xcc0] sm:$0x3]  ;;  %v4846_v50 = vld [vmem:[#allocation0 + $0xcc8] sm:$0x3]  ;;  %v6438_v44 = vunpack.i.l.bf16 %v8281_v55 }
 0x2c4   :  { %6019 = vst [vmem:[%s8665_s1 + $0x187] sm:$0x1] %v4721_v46  ;;  %v4840_v51 = vpack.c.bf16 0.0, %v4839_v49  ;;  %v4847_v48 = vpack.c.bf16 0.0, %v4846_v50  ;;  %v4853_v52 = vld [vmem:[#allocation0 + $0xcd0] sm:$0x3] }
 0x2c5   :  { %v4854_v53 = vpack.c.bf16 0.0, %v4853_v52  ;;  %v4860_v47 = vld [vmem:[#allocation0 + $0xcd8] sm:$0x3]  ;;  %v4867_v54 = vld [vmem:[#allocation0 + $0xce0] sm:$0x3] }
 0x2c6   :  { %6036 = vst [vmem:[%s8665_s1 + $0x198] sm:$0x1] %v4840_v51  ;;  %v4861_v56 = vpack.c.bf16 0.0, %v4860_v47  ;;  %v4868_v57 = vpack.c.bf16 0.0, %v4867_v54  ;;  %v4874_v58 = vld [vmem:[#allocation0 + $0xce8] sm:$0x3] }
 0x2c7   :  { %6037 = vst [vmem:[%s8665_s1 + $0x199] sm:$0x1] %v4847_v48  ;;  %v4875_v61 = vpack.c.bf16 0.0, %v4874_v58  ;;  %v4881_v62 = vld [vmem:[#allocation0 + $0xcf0] sm:$0x3] }
 0x2c8   :  { %6038 = vst [vmem:[%s8665_s1 + $0x19a] sm:$0x1] %v4854_v53  ;;  %v4882_v63 = vpack.c.bf16 0.0, %v4881_v62  ;;  %v4888_v0 = vld [vmem:[#allocation0 + $0xcf8] sm:$0x3] }
 0x2c9   :  { %6039 = vst [vmem:[%s8665_s1 + $0x19b] sm:$0x1] %v4861_v56  ;;  %v4889_v1 = vpack.c.bf16 0.0, %v4888_v0  ;;  %v4783_v59 = vld [vmem:[#allocation0 + $0xc80] sm:$0x3] }
 0x2ca   :  { %6040 = vst [vmem:[%s8665_s1 + $0x19c] sm:$0x1] %v4868_v57  ;;  %v4790_v60 = vld [vmem:[#allocation0 + $0xc88] sm:$0x3]  ;;  %v4784_v2 = vpack.c.bf16 0.0, %v4783_v59 }
 0x2cb   :  { %6041 = vst [vmem:[%s8665_s1 + $0x19d] sm:$0x1] %v4875_v61  ;;  %v4797_v3 = vld [vmem:[#allocation0 + $0xc90] sm:$0x3]  ;;  %v4791_v4 = vpack.c.bf16 0.0, %v4790_v60 }
 0x2cc   :  { %6042 = vst [vmem:[%s8665_s1 + $0x19e] sm:$0x1] %v4882_v63  ;;  %v4804_v5 = vld [vmem:[#allocation0 + $0xc98] sm:$0x3]  ;;  %v4798_v6 = vpack.c.bf16 0.0, %v4797_v3 }
 0x2cd   :  { %6043 = vst [vmem:[%s8665_s1 + $0x19f] sm:$0x1] %v4889_v1  ;;  %v4805_v7 = vpack.c.bf16 0.0, %v4804_v5 }
 0x2ce   :  { %1864 = vst.msk [vmem:[#allocation0 + $0xc81] ss:$8 sm:$0xf0] %vm963_vm0, %v6428_v38  }
 0x2cf   :  { %6028 = vst [vmem:[%s8665_s1 + $0x190] sm:$0x1] %v4784_v2 }
 0x2d0   :  { %6029 = vst [vmem:[%s8665_s1 + $0x191] sm:$0x1] %v4791_v4 }
 0x2d1   :  { %6030 = vst [vmem:[%s8665_s1 + $0x192] sm:$0x1] %v4798_v6 }
 0x2d2   :  { %6031 = vst [vmem:[%s8665_s1 + $0x193] sm:$0x1] %v4805_v7 }
 0x2d3   :  { %1889 = vst.msk [vmem:[#allocation0 + $0xd41] ss:$8 sm:$0xf] %vm963_vm0, %v6434_v8  }
 0x2d4   :  { %1891 = vst.msk [vmem:[#allocation0 + $0xd41] ss:$8 sm:$0xf0] %vm963_vm0, %v6434_v8  }
 0x2d5   :  { %v4811_v10 = vld [vmem:[#allocation0 + $0xca0] sm:$0x3]  ;;  %v4818_v11 = vld [vmem:[#allocation0 + $0xca8] sm:$0x3]  ;;  %v4825_v12 = vld [vmem:[#allocation0 + $0xcb0] sm:$0x3] }
 0x2d6   :  { %v4812_v13 = vpack.c.bf16 0.0, %v4811_v10  ;;  %v4819_v14 = vpack.c.bf16 0.0, %v4818_v11  ;;  %v4826_v15 = vpack.c.bf16 0.0, %v4825_v12  ;;  %v4832_v16 = vld [vmem:[#allocation0 + $0xcb8] sm:$0x3]  ;;  %v8417_v12 = vpop.permute.xlu2 %6446 }
 0x2d7   :  { %v4833_v17 = vpack.c.bf16 0.0, %v4832_v16  ;;  %1880 = vst.msk [vmem:[#allocation0 + $0xd01] ss:$8 sm:$0xf] %vm963_vm0, %v6433_v9  }
 0x2d8   :  { %6032 = vst [vmem:[%s8665_s1 + $0x194] sm:$0x1] %v4812_v13 }
 0x2d9   :  { %6033 = vst [vmem:[%s8665_s1 + $0x195] sm:$0x1] %v4819_v14  ;;  %v6444_v14 = vunpack.i.h.bf16 %v8337_v26 }
 0x2da   :  { %6034 = vst [vmem:[%s8665_s1 + $0x196] sm:$0x1] %v4826_v15  ;;  %v4951_v18 = vld [vmem:[#allocation0 + $0xd40] sm:$0x3]  ;;  %v4958_v19 = vld [vmem:[#allocation0 + $0xd48] sm:$0x3]  ;;  %v6443_v15 = vunpack.i.l.bf16 %v8337_v26 }
 0x2db   :  { %6035 = vst [vmem:[%s8665_s1 + $0x197] sm:$0x1] %v4833_v17  ;;  %v4952_v20 = vpack.c.bf16 0.0, %v4951_v18  ;;  %v4959_v21 = vpack.c.bf16 0.0, %v4958_v19  ;;  %v4965_v22 = vld [vmem:[#allocation0 + $0xd50] sm:$0x3] }
 0x2dc   :  { %v4966_v23 = vpack.c.bf16 0.0, %v4965_v22  ;;  %v4972_v24 = vld [vmem:[#allocation0 + $0xd58] sm:$0x3]  ;;  %v4979_v25 = vld [vmem:[#allocation0 + $0xd60] sm:$0x3] }
 0x2dd   :  { %6052 = vst [vmem:[%s8665_s1 + $0x1a8] sm:$0x1] %v4952_v20  ;;  %v4973_v27 = vpack.c.bf16 0.0, %v4972_v24  ;;  %v4980_v28 = vpack.c.bf16 0.0, %v4979_v25  ;;  %v4986_v29 = vld [vmem:[#allocation0 + $0xd68] sm:$0x3] }
 0x2de   :  { %6053 = vst [vmem:[%s8665_s1 + $0x1a9] sm:$0x1] %v4959_v21  ;;  %v4987_v30 = vpack.c.bf16 0.0, %v4986_v29  ;;  %v4993_v31 = vld [vmem:[#allocation0 + $0xd70] sm:$0x3] }
 0x2df   :  { %6054 = vst [vmem:[%s8665_s1 + $0x1aa] sm:$0x1] %v4966_v23  ;;  %v4994_v32 = vpack.c.bf16 0.0, %v4993_v31  ;;  %v5000_v33 = vld [vmem:[#allocation0 + $0xd78] sm:$0x3] }
 0x2e0   :  { %6055 = vst [vmem:[%s8665_s1 + $0x1ab] sm:$0x1] %v4973_v27  ;;  %v5001_v34 = vpack.c.bf16 0.0, %v5000_v33  ;;  %v4895_v36 = vld [vmem:[#allocation0 + $0xd00] sm:$0x3] }
 0x2e1   :  { %6056 = vst [vmem:[%s8665_s1 + $0x1ac] sm:$0x1] %v4980_v28  ;;  %v4902_v37 = vld [vmem:[#allocation0 + $0xd08] sm:$0x3]  ;;  %v4896_v35 = vpack.c.bf16 0.0, %v4895_v36 }
 0x2e2   :  { %6057 = vst [vmem:[%s8665_s1 + $0x1ad] sm:$0x1] %v4987_v30  ;;  %v4909_v38 = vld [vmem:[#allocation0 + $0xd10] sm:$0x3]  ;;  %v4903_v39 = vpack.c.bf16 0.0, %v4902_v37 }
 0x2e3   :  { %6058 = vst [vmem:[%s8665_s1 + $0x1ae] sm:$0x1] %v4994_v32  ;;  %v4916_v40 = vld [vmem:[#allocation0 + $0xd18] sm:$0x3]  ;;  %v4910_v41 = vpack.c.bf16 0.0, %v4909_v38  ;;  %v8449_v32 = vpop.permute.xlu0 %6451 }
 0x2e4   :  { %6059 = vst [vmem:[%s8665_s1 + $0x1af] sm:$0x1] %v5001_v34  ;;  %v4917_v42 = vpack.c.bf16 0.0, %v4916_v40 }
 0x2e5   :  { %1882 = vst.msk [vmem:[#allocation0 + $0xd01] ss:$8 sm:$0xf0] %vm963_vm0, %v6433_v9  }
 0x2e6   :  { %6044 = vst [vmem:[%s8665_s1 + $0x1a0] sm:$0x1] %v4896_v35 }
 0x2e7   :  { %6045 = vst [vmem:[%s8665_s1 + $0x1a1] sm:$0x1] %v4903_v39 }
 0x2e8   :  { %6046 = vst [vmem:[%s8665_s1 + $0x1a2] sm:$0x1] %v4910_v41 }
 0x2e9   :  { %6047 = vst [vmem:[%s8665_s1 + $0x1a3] sm:$0x1] %v4917_v42 }
 0x2ea   :  { %1907 = vst.msk [vmem:[#allocation0 + $0xdc1] ss:$8 sm:$0xf] %vm963_vm0, %v6439_v43  }
 0x2eb   :  { %1909 = vst.msk [vmem:[#allocation0 + $0xdc1] ss:$8 sm:$0xf0] %vm963_vm0, %v6439_v43  }
 0x2ec   :  { %v4923_v45 = vld [vmem:[#allocation0 + $0xd20] sm:$0x3]  ;;  %v4930_v46 = vld [vmem:[#allocation0 + $0xd28] sm:$0x3]  ;;  %v4937_v49 = vld [vmem:[#allocation0 + $0xd30] sm:$0x3] }
 0x2ed   :  { %v4924_v50 = vpack.c.bf16 0.0, %v4923_v45  ;;  %v4931_v51 = vpack.c.bf16 0.0, %v4930_v46  ;;  %v4938_v48 = vpack.c.bf16 0.0, %v4937_v49  ;;  %v4944_v52 = vld [vmem:[#allocation0 + $0xd38] sm:$0x3] }
 0x2ee   :  { %v4945_v53 = vpack.c.bf16 0.0, %v4944_v52  ;;  %1898 = vst.msk [vmem:[#allocation0 + $0xd81] ss:$8 sm:$0xf] %vm963_vm0, %v6438_v44  }
 0x2ef   :  { %6048 = vst [vmem:[%s8665_s1 + $0x1a4] sm:$0x1] %v4924_v50 }
 0x2f0   :  { %6049 = vst [vmem:[%s8665_s1 + $0x1a5] sm:$0x1] %v4931_v51  ;;  %v6449_v51 = vunpack.i.h.bf16 %v8417_v12 }
 0x2f1   :  { %6050 = vst [vmem:[%s8665_s1 + $0x1a6] sm:$0x1] %v4938_v48  ;;  %v5063_v47 = vld [vmem:[#allocation0 + $0xdc0] sm:$0x3]  ;;  %v5070_v54 = vld [vmem:[#allocation0 + $0xdc8] sm:$0x3]  ;;  %v6448_v48 = vunpack.i.l.bf16 %v8417_v12 }
 0x2f2   :  { %6051 = vst [vmem:[%s8665_s1 + $0x1a7] sm:$0x1] %v4945_v53  ;;  %v5064_v55 = vpack.c.bf16 0.0, %v5063_v47  ;;  %v5071_v56 = vpack.c.bf16 0.0, %v5070_v54  ;;  %v5077_v57 = vld [vmem:[#allocation0 + $0xdd0] sm:$0x3] }
 0x2f3   :  { %v5078_v58 = vpack.c.bf16 0.0, %v5077_v57  ;;  %v5084_v61 = vld [vmem:[#allocation0 + $0xdd8] sm:$0x3]  ;;  %v5091_v62 = vld [vmem:[#allocation0 + $0xde0] sm:$0x3] }
 0x2f4   :  { %6068 = vst [vmem:[%s8665_s1 + $0x1b8] sm:$0x1] %v5064_v55  ;;  %v5085_v63 = vpack.c.bf16 0.0, %v5084_v61  ;;  %v5092_v0 = vpack.c.bf16 0.0, %v5091_v62  ;;  %v5098_v1 = vld [vmem:[#allocation0 + $0xde8] sm:$0x3] }
 0x2f5   :  { %6069 = vst [vmem:[%s8665_s1 + $0x1b9] sm:$0x1] %v5071_v56  ;;  %v5099_v59 = vpack.c.bf16 0.0, %v5098_v1  ;;  %v5105_v60 = vld [vmem:[#allocation0 + $0xdf0] sm:$0x3] }
 0x2f6   :  { %6070 = vst [vmem:[%s8665_s1 + $0x1ba] sm:$0x1] %v5078_v58  ;;  %v5106_v2 = vpack.c.bf16 0.0, %v5105_v60  ;;  %v5112_v3 = vld [vmem:[#allocation0 + $0xdf8] sm:$0x3] }
 0x2f7   :  { %6071 = vst [vmem:[%s8665_s1 + $0x1bb] sm:$0x1] %v5085_v63  ;;  %v5113_v4 = vpack.c.bf16 0.0, %v5112_v3  ;;  %v5007_v5 = vld [vmem:[#allocation0 + $0xd80] sm:$0x3]  ;;  %v8505_v3 = vpop.permute.xlu1 %6456 }
 0x2f8   :  { %6072 = vst [vmem:[%s8665_s1 + $0x1bc] sm:$0x1] %v5092_v0  ;;  %v5014_v6 = vld [vmem:[#allocation0 + $0xd88] sm:$0x3]  ;;  %v5008_v7 = vpack.c.bf16 0.0, %v5007_v5 }
 0x2f9   :  { %6073 = vst [vmem:[%s8665_s1 + $0x1bd] sm:$0x1] %v5099_v59  ;;  %v5021_v8 = vld [vmem:[#allocation0 + $0xd90] sm:$0x3]  ;;  %v5015_v9 = vpack.c.bf16 0.0, %v5014_v6 }
 0x2fa   :  { %6074 = vst [vmem:[%s8665_s1 + $0x1be] sm:$0x1] %v5106_v2  ;;  %v5028_v10 = vld [vmem:[#allocation0 + $0xd98] sm:$0x3]  ;;  %v5022_v11 = vpack.c.bf16 0.0, %v5021_v8 }
 0x2fb   :  { %6075 = vst [vmem:[%s8665_s1 + $0x1bf] sm:$0x1] %v5113_v4  ;;  %v5029_v13 = vpack.c.bf16 0.0, %v5028_v10 }
 0x2fc   :  { %1900 = vst.msk [vmem:[#allocation0 + $0xd81] ss:$8 sm:$0xf0] %vm963_vm0, %v6438_v44  }
 0x2fd   :  { %6060 = vst [vmem:[%s8665_s1 + $0x1b0] sm:$0x1] %v5008_v7 }
 0x2fe   :  { %6061 = vst [vmem:[%s8665_s1 + $0x1b1] sm:$0x1] %v5015_v9 }
 0x2ff   :  { %6062 = vst [vmem:[%s8665_s1 + $0x1b2] sm:$0x1] %v5022_v11 }
 0x300   :  { %6063 = vst [vmem:[%s8665_s1 + $0x1b3] sm:$0x1] %v5029_v13 }
 0x301   :  { %1925 = vst.msk [vmem:[#allocation0 + $0xe41] ss:$8 sm:$0xf] %vm963_vm0, %v6444_v14  }
 0x302   :  { %1927 = vst.msk [vmem:[#allocation0 + $0xe41] ss:$8 sm:$0xf0] %vm963_vm0, %v6444_v14  }
 0x303   :  { %v5035_v16 = vld [vmem:[#allocation0 + $0xda0] sm:$0x3]  ;;  %v5042_v17 = vld [vmem:[#allocation0 + $0xda8] sm:$0x3]  ;;  %v5049_v18 = vld [vmem:[#allocation0 + $0xdb0] sm:$0x3] }
 0x304   :  { %v5036_v19 = vpack.c.bf16 0.0, %v5035_v16  ;;  %v5043_v20 = vpack.c.bf16 0.0, %v5042_v17  ;;  %v5050_v21 = vpack.c.bf16 0.0, %v5049_v18  ;;  %v5056_v22 = vld [vmem:[#allocation0 + $0xdb8] sm:$0x3] }
 0x305   :  { %v5057_v23 = vpack.c.bf16 0.0, %v5056_v22  ;;  %1916 = vst.msk [vmem:[#allocation0 + $0xe01] ss:$8 sm:$0xf] %vm963_vm0, %v6443_v15  }
 0x306   :  { %6064 = vst [vmem:[%s8665_s1 + $0x1b4] sm:$0x1] %v5036_v19 }
 0x307   :  { %6065 = vst [vmem:[%s8665_s1 + $0x1b5] sm:$0x1] %v5043_v20  ;;  %v6454_v20 = vunpack.i.h.bf16 %v8449_v32 }
 0x308   :  { %6066 = vst [vmem:[%s8665_s1 + $0x1b6] sm:$0x1] %v5050_v21  ;;  %v5175_v24 = vld [vmem:[#allocation0 + $0xe40] sm:$0x3]  ;;  %v5182_v25 = vld [vmem:[#allocation0 + $0xe48] sm:$0x3]  ;;  %v6453_v21 = vunpack.i.l.bf16 %v8449_v32 }
 0x309   :  { %6067 = vst [vmem:[%s8665_s1 + $0x1b7] sm:$0x1] %v5057_v23  ;;  %v5176_v26 = vpack.c.bf16 0.0, %v5175_v24  ;;  %v5183_v27 = vpack.c.bf16 0.0, %v5182_v25  ;;  %v5189_v28 = vld [vmem:[#allocation0 + $0xe50] sm:$0x3] }
 0x30a   :  { %v5190_v29 = vpack.c.bf16 0.0, %v5189_v28  ;;  %v5196_v30 = vld [vmem:[#allocation0 + $0xe58] sm:$0x3]  ;;  %v5203_v31 = vld [vmem:[#allocation0 + $0xe60] sm:$0x3] }
 0x30b   :  { %6084 = vst [vmem:[%s8665_s1 + $0x1c8] sm:$0x1] %v5176_v26  ;;  %v5197_v33 = vpack.c.bf16 0.0, %v5196_v30  ;;  %v5204_v34 = vpack.c.bf16 0.0, %v5203_v31  ;;  %v5210_v36 = vld [vmem:[#allocation0 + $0xe68] sm:$0x3] }
 0x30c   :  { %6085 = vst [vmem:[%s8665_s1 + $0x1c9] sm:$0x1] %v5183_v27  ;;  %v5211_v37 = vpack.c.bf16 0.0, %v5210_v36  ;;  %v5217_v35 = vld [vmem:[#allocation0 + $0xe70] sm:$0x3] }
 0x30d   :  { %6086 = vst [vmem:[%s8665_s1 + $0x1ca] sm:$0x1] %v5190_v29  ;;  %v5218_v38 = vpack.c.bf16 0.0, %v5217_v35  ;;  %v5224_v39 = vld [vmem:[#allocation0 + $0xe78] sm:$0x3] }
 0x30e   :  { %6087 = vst [vmem:[%s8665_s1 + $0x1cb] sm:$0x1] %v5197_v33  ;;  %v5225_v40 = vpack.c.bf16 0.0, %v5224_v39  ;;  %v5119_v41 = vld [vmem:[#allocation0 + $0xe00] sm:$0x3] }
 0x30f   :  { %6088 = vst [vmem:[%s8665_s1 + $0x1cc] sm:$0x1] %v5204_v34  ;;  %v5126_v42 = vld [vmem:[#allocation0 + $0xe08] sm:$0x3]  ;;  %v5120_v43 = vpack.c.bf16 0.0, %v5119_v41 }
 0x310   :  { %6089 = vst [vmem:[%s8665_s1 + $0x1cd] sm:$0x1] %v5211_v37  ;;  %v5133_v44 = vld [vmem:[#allocation0 + $0xe10] sm:$0x3]  ;;  %v5127_v45 = vpack.c.bf16 0.0, %v5126_v42 }
 0x311   :  { %6090 = vst [vmem:[%s8665_s1 + $0x1ce] sm:$0x1] %v5218_v38  ;;  %v5140_v46 = vld [vmem:[#allocation0 + $0xe18] sm:$0x3]  ;;  %v5134_v49 = vpack.c.bf16 0.0, %v5133_v44 }
 0x312   :  { %6091 = vst [vmem:[%s8665_s1 + $0x1cf] sm:$0x1] %v5225_v40  ;;  %v5141_v50 = vpack.c.bf16 0.0, %v5140_v46 }
 0x313   :  { %1918 = vst.msk [vmem:[#allocation0 + $0xe01] ss:$8 sm:$0xf0] %vm963_vm0, %v6443_v15  }
 0x314   :  { %6076 = vst [vmem:[%s8665_s1 + $0x1c0] sm:$0x1] %v5120_v43 }
 0x315   :  { %6077 = vst [vmem:[%s8665_s1 + $0x1c1] sm:$0x1] %v5127_v45 }
 0x316   :  { %6078 = vst [vmem:[%s8665_s1 + $0x1c2] sm:$0x1] %v5134_v49 }
 0x317   :  { %6079 = vst [vmem:[%s8665_s1 + $0x1c3] sm:$0x1] %v5141_v50 }
 0x318   :  { %1943 = vst.msk [vmem:[#allocation0 + $0xec1] ss:$8 sm:$0xf] %vm963_vm0, %v6449_v51  }
 0x319   :  { %1945 = vst.msk [vmem:[#allocation0 + $0xec1] ss:$8 sm:$0xf0] %vm963_vm0, %v6449_v51  }
 0x31a   :  { %v5147_v52 = vld [vmem:[#allocation0 + $0xe20] sm:$0x3]  ;;  %v5154_v53 = vld [vmem:[#allocation0 + $0xe28] sm:$0x3]  ;;  %v5161_v47 = vld [vmem:[#allocation0 + $0xe30] sm:$0x3] }
 0x31b   :  { %v5148_v54 = vpack.c.bf16 0.0, %v5147_v52  ;;  %v5155_v55 = vpack.c.bf16 0.0, %v5154_v53  ;;  %v5162_v56 = vpack.c.bf16 0.0, %v5161_v47  ;;  %v5168_v57 = vld [vmem:[#allocation0 + $0xe38] sm:$0x3] }
 0x31c   :  { %v5169_v58 = vpack.c.bf16 0.0, %v5168_v57  ;;  %1934 = vst.msk [vmem:[#allocation0 + $0xe81] ss:$8 sm:$0xf] %vm963_vm0, %v6448_v48  }
 0x31d   :  { %6080 = vst [vmem:[%s8665_s1 + $0x1c4] sm:$0x1] %v5148_v54  ;;  %v6459_v54 = vunpack.i.h.bf16 %v8505_v3 }
 0x31e   :  { %6081 = vst [vmem:[%s8665_s1 + $0x1c5] sm:$0x1] %v5155_v55  ;;  %v6458_v55 = vunpack.i.l.bf16 %v8505_v3 }
 0x31f   :  { %6082 = vst [vmem:[%s8665_s1 + $0x1c6] sm:$0x1] %v5162_v56  ;;  %v5287_v61 = vld [vmem:[#allocation0 + $0xec0] sm:$0x3]  ;;  %v5294_v62 = vld [vmem:[#allocation0 + $0xec8] sm:$0x3] }
 0x320   :  { %6083 = vst [vmem:[%s8665_s1 + $0x1c7] sm:$0x1] %v5169_v58  ;;  %v5288_v63 = vpack.c.bf16 0.0, %v5287_v61  ;;  %v5295_v0 = vpack.c.bf16 0.0, %v5294_v62  ;;  %v5301_v1 = vld [vmem:[#allocation0 + $0xed0] sm:$0x3] }
 0x321   :  { %v5302_v59 = vpack.c.bf16 0.0, %v5301_v1  ;;  %v5308_v60 = vld [vmem:[#allocation0 + $0xed8] sm:$0x3]  ;;  %v5315_v2 = vld [vmem:[#allocation0 + $0xee0] sm:$0x3] }
 0x322   :  { %6100 = vst [vmem:[%s8665_s1 + $0x1d8] sm:$0x1] %v5288_v63  ;;  %v5309_v4 = vpack.c.bf16 0.0, %v5308_v60  ;;  %v5316_v5 = vpack.c.bf16 0.0, %v5315_v2  ;;  %v5322_v6 = vld [vmem:[#allocation0 + $0xee8] sm:$0x3] }
 0x323   :  { %6101 = vst [vmem:[%s8665_s1 + $0x1d9] sm:$0x1] %v5295_v0  ;;  %v5323_v7 = vpack.c.bf16 0.0, %v5322_v6  ;;  %v5329_v8 = vld [vmem:[#allocation0 + $0xef0] sm:$0x3] }
 0x324   :  { %6102 = vst [vmem:[%s8665_s1 + $0x1da] sm:$0x1] %v5302_v59  ;;  %v5330_v9 = vpack.c.bf16 0.0, %v5329_v8  ;;  %v5336_v10 = vld [vmem:[#allocation0 + $0xef8] sm:$0x3] }
 0x325   :  { %6103 = vst [vmem:[%s8665_s1 + $0x1db] sm:$0x1] %v5309_v4  ;;  %v5337_v11 = vpack.c.bf16 0.0, %v5336_v10  ;;  %v5231_v12 = vld [vmem:[#allocation0 + $0xe80] sm:$0x3] }
 0x326   :  { %6104 = vst [vmem:[%s8665_s1 + $0x1dc] sm:$0x1] %v5316_v5  ;;  %v5238_v13 = vld [vmem:[#allocation0 + $0xe88] sm:$0x3]  ;;  %v5232_v14 = vpack.c.bf16 0.0, %v5231_v12 }
 0x327   :  { %6105 = vst [vmem:[%s8665_s1 + $0x1dd] sm:$0x1] %v5323_v7  ;;  %v5245_v15 = vld [vmem:[#allocation0 + $0xe90] sm:$0x3]  ;;  %v5239_v16 = vpack.c.bf16 0.0, %v5238_v13 }
 0x328   :  { %6106 = vst [vmem:[%s8665_s1 + $0x1de] sm:$0x1] %v5330_v9  ;;  %v5252_v17 = vld [vmem:[#allocation0 + $0xe98] sm:$0x3]  ;;  %v5246_v18 = vpack.c.bf16 0.0, %v5245_v15 }
 0x329   :  { %6107 = vst [vmem:[%s8665_s1 + $0x1df] sm:$0x1] %v5337_v11  ;;  %v5253_v19 = vpack.c.bf16 0.0, %v5252_v17 }
 0x32a   :  { %1936 = vst.msk [vmem:[#allocation0 + $0xe81] ss:$8 sm:$0xf0] %vm963_vm0, %v6448_v48  }
 0x32b   :  { %6092 = vst [vmem:[%s8665_s1 + $0x1d0] sm:$0x1] %v5232_v14 }
 0x32c   :  { %6093 = vst [vmem:[%s8665_s1 + $0x1d1] sm:$0x1] %v5239_v16 }
 0x32d   :  { %6094 = vst [vmem:[%s8665_s1 + $0x1d2] sm:$0x1] %v5246_v18 }
 0x32e   :  { %6095 = vst [vmem:[%s8665_s1 + $0x1d3] sm:$0x1] %v5253_v19 }
 0x32f   :  { %1961 = vst.msk [vmem:[#allocation0 + $0xf41] ss:$8 sm:$0xf] %vm963_vm0, %v6454_v20  }
 0x330   :  { %1963 = vst.msk [vmem:[#allocation0 + $0xf41] ss:$8 sm:$0xf0] %vm963_vm0, %v6454_v20  }
 0x331   :  { %v5259_v22 = vld [vmem:[#allocation0 + $0xea0] sm:$0x3]  ;;  %v5266_v23 = vld [vmem:[#allocation0 + $0xea8] sm:$0x3]  ;;  %v5273_v24 = vld [vmem:[#allocation0 + $0xeb0] sm:$0x3] }
 0x332   :  { %v5260_v25 = vpack.c.bf16 0.0, %v5259_v22  ;;  %v5267_v26 = vpack.c.bf16 0.0, %v5266_v23  ;;  %v5274_v27 = vpack.c.bf16 0.0, %v5273_v24  ;;  %v5280_v28 = vld [vmem:[#allocation0 + $0xeb8] sm:$0x3] }
 0x333   :  { %v5281_v29 = vpack.c.bf16 0.0, %v5280_v28  ;;  %1952 = vst.msk [vmem:[#allocation0 + $0xf01] ss:$8 sm:$0xf] %vm963_vm0, %v6453_v21  }
 0x334   :  { %6096 = vst [vmem:[%s8665_s1 + $0x1d4] sm:$0x1] %v5260_v25 }
 0x335   :  { %6097 = vst [vmem:[%s8665_s1 + $0x1d5] sm:$0x1] %v5267_v26 }
 0x336   :  { %6098 = vst [vmem:[%s8665_s1 + $0x1d6] sm:$0x1] %v5274_v27  ;;  %v5399_v30 = vld [vmem:[#allocation0 + $0xf40] sm:$0x3]  ;;  %v5406_v31 = vld [vmem:[#allocation0 + $0xf48] sm:$0x3] }
 0x337   :  { %6099 = vst [vmem:[%s8665_s1 + $0x1d7] sm:$0x1] %v5281_v29  ;;  %v5400_v32 = vpack.c.bf16 0.0, %v5399_v30  ;;  %v5407_v33 = vpack.c.bf16 0.0, %v5406_v31  ;;  %v5413_v34 = vld [vmem:[#allocation0 + $0xf50] sm:$0x3] }
 0x338   :  { %v5414_v36 = vpack.c.bf16 0.0, %v5413_v34  ;;  %v5420_v37 = vld [vmem:[#allocation0 + $0xf58] sm:$0x3]  ;;  %v5427_v35 = vld [vmem:[#allocation0 + $0xf60] sm:$0x3] }
 0x339   :  { %6116 = vst [vmem:[%s8665_s1 + $0x1e8] sm:$0x1] %v5400_v32  ;;  %v5421_v38 = vpack.c.bf16 0.0, %v5420_v37  ;;  %v5428_v39 = vpack.c.bf16 0.0, %v5427_v35  ;;  %v5434_v40 = vld [vmem:[#allocation0 + $0xf68] sm:$0x3] }
 0x33a   :  { %6117 = vst [vmem:[%s8665_s1 + $0x1e9] sm:$0x1] %v5407_v33  ;;  %v5435_v41 = vpack.c.bf16 0.0, %v5434_v40  ;;  %v5441_v42 = vld [vmem:[#allocation0 + $0xf70] sm:$0x3] }
 0x33b   :  { %6118 = vst [vmem:[%s8665_s1 + $0x1ea] sm:$0x1] %v5414_v36  ;;  %v5442_v43 = vpack.c.bf16 0.0, %v5441_v42  ;;  %v5448_v44 = vld [vmem:[#allocation0 + $0xf78] sm:$0x3] }
 0x33c   :  { %6119 = vst [vmem:[%s8665_s1 + $0x1eb] sm:$0x1] %v5421_v38  ;;  %v5449_v45 = vpack.c.bf16 0.0, %v5448_v44  ;;  %v5343_v46 = vld [vmem:[#allocation0 + $0xf00] sm:$0x3] }
 0x33d   :  { %6120 = vst [vmem:[%s8665_s1 + $0x1ec] sm:$0x1] %v5428_v39  ;;  %v5350_v49 = vld [vmem:[#allocation0 + $0xf08] sm:$0x3]  ;;  %v5344_v50 = vpack.c.bf16 0.0, %v5343_v46 }
 0x33e   :  { %6121 = vst [vmem:[%s8665_s1 + $0x1ed] sm:$0x1] %v5435_v41  ;;  %v5357_v51 = vld [vmem:[#allocation0 + $0xf10] sm:$0x3]  ;;  %v5351_v48 = vpack.c.bf16 0.0, %v5350_v49 }
 0x33f   :  { %6122 = vst [vmem:[%s8665_s1 + $0x1ee] sm:$0x1] %v5442_v43  ;;  %v5364_v52 = vld [vmem:[#allocation0 + $0xf18] sm:$0x3]  ;;  %v5358_v53 = vpack.c.bf16 0.0, %v5357_v51 }
 0x340   :  { %6123 = vst [vmem:[%s8665_s1 + $0x1ef] sm:$0x1] %v5449_v45  ;;  %v5365_v47 = vpack.c.bf16 0.0, %v5364_v52 }
 0x341   :  { %1954 = vst.msk [vmem:[#allocation0 + $0xf01] ss:$8 sm:$0xf0] %vm963_vm0, %v6453_v21  }
 0x342   :  { %6108 = vst [vmem:[%s8665_s1 + $0x1e0] sm:$0x1] %v5344_v50 }
 0x343   :  { %6109 = vst [vmem:[%s8665_s1 + $0x1e1] sm:$0x1] %v5351_v48 }
 0x344   :  { %6110 = vst [vmem:[%s8665_s1 + $0x1e2] sm:$0x1] %v5358_v53 }
 0x345   :  { %6111 = vst [vmem:[%s8665_s1 + $0x1e3] sm:$0x1] %v5365_v47 }
 0x346   :  { %1979 = vst.msk [vmem:[#allocation0 + $0xfc1] ss:$8 sm:$0xf] %vm963_vm0, %v6459_v54  }
 0x347   :  { %1981 = vst.msk [vmem:[#allocation0 + $0xfc1] ss:$8 sm:$0xf0] %vm963_vm0, %v6459_v54  }
 0x348   :  { %v5371_v56 = vld [vmem:[#allocation0 + $0xf20] sm:$0x3]  ;;  %v5378_v57 = vld [vmem:[#allocation0 + $0xf28] sm:$0x3]  ;;  %v5385_v58 = vld [vmem:[#allocation0 + $0xf30] sm:$0x3] }
 0x349   :  { %v5372_v61 = vpack.c.bf16 0.0, %v5371_v56  ;;  %v5379_v62 = vpack.c.bf16 0.0, %v5378_v57  ;;  %v5386_v63 = vpack.c.bf16 0.0, %v5385_v58  ;;  %v5392_v0 = vld [vmem:[#allocation0 + $0xf38] sm:$0x3] }
 0x34a   :  { %v5393_v1 = vpack.c.bf16 0.0, %v5392_v0  ;;  %1970 = vst.msk [vmem:[#allocation0 + $0xf81] ss:$8 sm:$0xf] %vm963_vm0, %v6458_v55  }
 0x34b   :  { %6112 = vst [vmem:[%s8665_s1 + $0x1e4] sm:$0x1] %v5372_v61 }
 0x34c   :  { %6113 = vst [vmem:[%s8665_s1 + $0x1e5] sm:$0x1] %v5379_v62 }
 0x34d   :  { %6114 = vst [vmem:[%s8665_s1 + $0x1e6] sm:$0x1] %v5386_v63  ;;  %v5511_v59 = vld [vmem:[#allocation0 + $0xfc0] sm:$0x3]  ;;  %v5518_v60 = vld [vmem:[#allocation0 + $0xfc8] sm:$0x3] }
 0x34e   :  { %6115 = vst [vmem:[%s8665_s1 + $0x1e7] sm:$0x1] %v5393_v1  ;;  %v5512_v2 = vpack.c.bf16 0.0, %v5511_v59  ;;  %v5519_v3 = vpack.c.bf16 0.0, %v5518_v60  ;;  %v5525_v4 = vld [vmem:[#allocation0 + $0xfd0] sm:$0x3] }
 0x34f   :  { %v5526_v5 = vpack.c.bf16 0.0, %v5525_v4  ;;  %v5532_v6 = vld [vmem:[#allocation0 + $0xfd8] sm:$0x3]  ;;  %v5539_v7 = vld [vmem:[#allocation0 + $0xfe0] sm:$0x3] }
 0x350   :  { %6132 = vst [vmem:[%s8665_s1 + $0x1f8] sm:$0x1] %v5512_v2  ;;  %v5533_v8 = vpack.c.bf16 0.0, %v5532_v6  ;;  %v5540_v9 = vpack.c.bf16 0.0, %v5539_v7  ;;  %v5546_v10 = vld [vmem:[#allocation0 + $0xfe8] sm:$0x3] }
 0x351   :  { %6133 = vst [vmem:[%s8665_s1 + $0x1f9] sm:$0x1] %v5519_v3  ;;  %v5547_v11 = vpack.c.bf16 0.0, %v5546_v10  ;;  %v5553_v12 = vld [vmem:[#allocation0 + $0xff0] sm:$0x3] }
 0x352   :  { %6134 = vst [vmem:[%s8665_s1 + $0x1fa] sm:$0x1] %v5526_v5  ;;  %v5554_v13 = vpack.c.bf16 0.0, %v5553_v12  ;;  %v5560_v14 = vld [vmem:[#allocation0 + $0xff8] sm:$0x3] }
 0x353   :  { %6135 = vst [vmem:[%s8665_s1 + $0x1fb] sm:$0x1] %v5533_v8  ;;  %v5561_v15 = vpack.c.bf16 0.0, %v5560_v14  ;;  %v5455_v16 = vld [vmem:[#allocation0 + $0xf80] sm:$0x3] }
 0x354   :  { %6136 = vst [vmem:[%s8665_s1 + $0x1fc] sm:$0x1] %v5540_v9  ;;  %v5462_v17 = vld [vmem:[#allocation0 + $0xf88] sm:$0x3]  ;;  %v5456_v18 = vpack.c.bf16 0.0, %v5455_v16 }
 0x355   :  { %6137 = vst [vmem:[%s8665_s1 + $0x1fd] sm:$0x1] %v5547_v11  ;;  %v5469_v19 = vld [vmem:[#allocation0 + $0xf90] sm:$0x3]  ;;  %v5463_v20 = vpack.c.bf16 0.0, %v5462_v17 }
 0x356   :  { %6138 = vst [vmem:[%s8665_s1 + $0x1fe] sm:$0x1] %v5554_v13  ;;  %v5476_v21 = vld [vmem:[#allocation0 + $0xf98] sm:$0x3]  ;;  %v5470_v22 = vpack.c.bf16 0.0, %v5469_v19 }
 0x357   :  { %6139 = vst [vmem:[%s8665_s1 + $0x1ff] sm:$0x1] %v5561_v15  ;;  %v5477_v23 = vpack.c.bf16 0.0, %v5476_v21 }
 0x358   :  { %1972 = vst.msk [vmem:[#allocation0 + $0xf81] ss:$8 sm:$0xf0] %vm963_vm0, %v6458_v55  }
 0x359   :  { %6124 = vst [vmem:[%s8665_s1 + $0x1f0] sm:$0x1] %v5456_v18 }
 0x35a   :  { %6125 = vst [vmem:[%s8665_s1 + $0x1f1] sm:$0x1] %v5463_v20 }
 0x35b   :  { %6126 = vst [vmem:[%s8665_s1 + $0x1f2] sm:$0x1] %v5470_v22 }
 0x35c   :  { %6127 = vst [vmem:[%s8665_s1 + $0x1f3] sm:$0x1] %v5477_v23 }
 0x35f   :  { %v5483_v24 = vld [vmem:[#allocation0 + $0xfa0] sm:$0x3]  ;;  %v5490_v25 = vld [vmem:[#allocation0 + $0xfa8] sm:$0x3]  ;;  %v5497_v26 = vld [vmem:[#allocation0 + $0xfb0] sm:$0x3] }
 0x360   :  { %v5484_v27 = vpack.c.bf16 0.0, %v5483_v24  ;;  %v5491_v28 = vpack.c.bf16 0.0, %v5490_v25  ;;  %v5498_v29 = vpack.c.bf16 0.0, %v5497_v26  ;;  %v5504_v30 = vld [vmem:[#allocation0 + $0xfb8] sm:$0x3] }
 0x361   :  { %v5505_v31 = vpack.c.bf16 0.0, %v5504_v30 }
 0x362   :  { %6128 = vst [vmem:[%s8665_s1 + $0x1f4] sm:$0x1] %v5484_v27 }
 0x363   :  { %6129 = vst [vmem:[%s8665_s1 + $0x1f5] sm:$0x1] %v5491_v28 }
 0x364   :  { %6130 = vst [vmem:[%s8665_s1 + $0x1f6] sm:$0x1] %v5498_v29 }
 0x365   :  { %6131 = vst [vmem:[%s8665_s1 + $0x1f7] sm:$0x1] %v5505_v31 }

// kernel: weighted_path_aggregation.3
= control target key start
LH: loop header
LB: loop body
LE: loop exit
PB: predicated region body
PF: predicated region fallthrough
CT: control target
= control target key end

     0   :  { %s2209_s30 = smov 0   ;;  %s2885_s0 = inlined_call_operand.vmem [shape: bf16[512,36], index: 0, kind: input, shape index: {}]   ;;  %s2886_s1 = inlined_call_operand.vmem [shape: bf16[512,36], index: 1, kind: input, shape index: {}]   ;;  %s2887_s2 = inlined_call_operand.vmem [shape: bf16[36,4], index: 2, kind: input, shape index: {}]   ;;  %s2888_s3 = inlined_call_operand.vmem [shape: bf16[36,4], index: 3, kind: input, shape index: {}]   ;;  %s2889_s4 = inlined_call_operand.vmem [shape: f32[2,4], index: 4, kind: input, shape index: {}]   ;;  %s2890_s5 = inlined_call_operand.vmem [shape: f32[2,4], index: 5, kind: input, shape index: {}]   ;;  %s2891_s6 = inlined_call_operand.vmem [shape: f32[512,4], index: 6, kind: input, shape index: {}]   ;;  %s2892_s7 = inlined_call_operand.vmem [shape: f32[512,4], index: 7, kind: input, shape index: {}]   ;;  %s2893_s8 = inlined_call_operand.vmem [shape: f32[512,4], index: 8, kind: output, shape index: {0}]   ;;  %s2894_s9 = inlined_call_operand.vmem [shape: f32[512,4], index: 9, kind: output, shape index: {1}]  }
   0x1 LB: > { %s1770_s10 = sadd.s32 4294967295, %s2157_s30   ;;  %p1774_p0 = scmp.ge.s32.totalorder %s2157_s30, 1  ;;  %s2157_s30 = sphi %s2209_s30, %s20_s30  }
   0x2   : > { %p324_p1 = scmp.lt.s32.totalorder %s2157_s30, 3 }
   0x4   : > { %p325_p2 = pnand %p1774_p0, %p324_p1 }
   0x5   : > { %s1775_s15 = sshll.u32 (!%p325_p2), %s1770_s10, 5 }
   0x6   : > { %328 = sbr.rel (%p325_p2) target bundleno = 307 (0x133), region = 52  ;;  %p381_p3 = scmp.lt.s32.totalorder (!%p325_p2), %s1775_s15, 63 }
   0xb   : > { %v549_v0 = vld [vmem:[%s2887_s2 + $0x10] sm:$0x3]  ;;  %vm694_vm0 = vcmask 1041408   ;;  %s2896_s15 = smov (!%p381_p3, %s1775_s15), 63  ;;  %v1982_v8 = vld [vmem:[%s2887_s2 + $0x8] sm:$0xff]  ;;  %v1981_v10 = vld [vmem:[%s2887_s2] sm:$0xff] }
   0xc   : > { %v1116_v1 = vld [vmem:[%s2888_s3 + $0x10] sm:$0x3]  ;;  %v639_v2 = vunpack.c.l.b16 %v549_v0  ;;  %v2000_v9 = vld [vmem:[%s2888_s3 + $0x8] sm:$0xff]  ;;  %s1776_s20 = sshll.u32 %s2896_s15, 2  ;;  %v1999_v11 = vld [vmem:[%s2888_s3] sm:$0xff]  ;;  %vm645_vm1 = vcmask 293888  }
   0xd   : > { %v1206_v3 = vunpack.c.l.b16 %v1116_v1  ;;  %s2238_s25 = scalar_lea.vmem %s2885_s0, %s1776_s20  ;;  %s2246_s10 = scalar_lea.vmem %s2886_s1, %s1776_s20  ;;  %v2315_v44 = vld [vmem:[%s2889_s4] ss:$0 sm:$0xff]  ;;  %v2325_v46 = vld [vmem:[%s2889_s4 + $0x1] ss:$0 sm:$0xff]  ;;  %vm1047_vm2 = vcmask 31744  }
   0xe   : > { %v642_v4 = vpack.c.b16 %v639_v2, %v639_v2  ;;  %v1965_v12 = vld [vmem:[%s2238_s25] sm:$0xff]  ;;  %v1966_v16 = vld [vmem:[%s2238_s25 + $0x8] sm:$0xff]  ;;  %v1967_v20 = vld [vmem:[%s2238_s25 + $0x10] sm:$0xff]  ;;  %s2336_s20 = sshll.u32 %s2896_s15, 3 }
   0xf   : > { %v1209_v5 = vpack.c.b16 %v1206_v3, %v1206_v3  ;;  %v1973_v13 = vld [vmem:[%s2238_s25 + $0x40] sm:$0xff]  ;;  %v1974_v17 = vld [vmem:[%s2238_s25 + $0x48] sm:$0xff]  ;;  %v1975_v21 = vld [vmem:[%s2238_s25 + $0x50] sm:$0xff]  ;;  %s2343_s23 = scalar_lea.vmem %s2891_s6, %s2336_s20  ;;  %s2349_s26 = scalar_lea.vmem %s2892_s7, %s2336_s20 }
  0x10   : > { %v696_v6 = vsel %vm694_vm0, %v642_v4, 0  ;;  %v1983_v14 = vld [vmem:[%s2246_s10] sm:$0xff]  ;;  %v1984_v18 = vld [vmem:[%s2246_s10 + $0x8] sm:$0xff]  ;;  %v1985_v22 = vld [vmem:[%s2246_s10 + $0x10] sm:$0xff]  ;;  %s2399_s28 = scalar_lea.vmem %s2893_s8, %s2336_s20  ;;  %s2409_s11 = scalar_lea.vmem %s2894_s9, %s2336_s20 }
  0x11   : > { %v1261_v7 = vsel %vm694_vm0, %v1209_v5, 0  ;;  %703 = vmatpush.bf16.msra.mxu0 %v696_v6  ;;  %2001 = vmatpush.bf16.msra.mxu2 %v696_v6  ;;  %v1991_v15 = vld [vmem:[%s2246_s10 + $0x40] sm:$0xff]  ;;  %v1992_v19 = vld [vmem:[%s2246_s10 + $0x48] sm:$0xff]  ;;  %v1993_v23 = vld [vmem:[%s2246_s10 + $0x50] sm:$0xff] }
  0x12   : > { %1268 = vmatpush.bf16.msra.mxu1 %v1261_v7  ;;  %2004 = vmatpush.bf16.msra.mxu3 %v1261_v7  ;;  %v1968_v24 = vld [vmem:[%s2238_s25 + $0x18] sm:$0xff]  ;;  %v1969_v28 = vld [vmem:[%s2238_s25 + $0x20] sm:$0xff]  ;;  %v1970_v32 = vld [vmem:[%s2238_s25 + $0x28] sm:$0xff] }
  0x13   : > { %v1976_v25 = vld [vmem:[%s2238_s25 + $0x58] sm:$0xff]  ;;  %v1977_v29 = vld [vmem:[%s2238_s25 + $0x60] sm:$0xff]  ;;  %v1978_v33 = vld [vmem:[%s2238_s25 + $0x68] sm:$0xff] }
  0x14   : > { %v1986_v26 = vld [vmem:[%s2246_s10 + $0x18] sm:$0xff]  ;;  %v1987_v30 = vld [vmem:[%s2246_s10 + $0x20] sm:$0xff]  ;;  %v1988_v34 = vld [vmem:[%s2246_s10 + $0x28] sm:$0xff] }
  0x15   : > { %704 = vmatpush.bf16.msra.mxu0 %v1982_v8  ;;  %2002 = vmatpush.bf16.msra.mxu2 %v1982_v8  ;;  %v1994_v27 = vld [vmem:[%s2246_s10 + $0x58] sm:$0xff]  ;;  %v1995_v31 = vld [vmem:[%s2246_s10 + $0x60] sm:$0xff]  ;;  %v1996_v35 = vld [vmem:[%s2246_s10 + $0x68] sm:$0xff] }
  0x16   : > { %1269 = vmatpush.bf16.msra.mxu1 %v2000_v9  ;;  %2005 = vmatpush.bf16.msra.mxu3 %v2000_v9  ;;  %v1971_v36 = vld [vmem:[%s2238_s25 + $0x30] sm:$0xff]  ;;  %v1972_v40 = vld [vmem:[%s2238_s25 + $0x38] sm:$0xff]  ;;  %v2320_v45 = vld [vmem:[%s2890_s5] ss:$0 sm:$0xff] }
  0x17   : > { %v1979_v37 = vld [vmem:[%s2238_s25 + $0x70] sm:$0xff]  ;;  %v1980_v41 = vld [vmem:[%s2238_s25 + $0x78] sm:$0xff]  ;;  %v2330_v48 = vld [vmem:[%s2890_s5 + $0x1] ss:$0 sm:$0xff] }
  0x18   : > { %v1989_v38 = vld [vmem:[%s2246_s10 + $0x30] sm:$0xff]  ;;  %v1990_v42 = vld [vmem:[%s2246_s10 + $0x38] sm:$0xff]  ;;  %v417_v0 = vld [vmem:[%s2343_s23] sm:$0xff] }
  0x19   : > { %705 = vmatpush.bf16.msra.mxu0 %v1981_v10  ;;  %2003 = vmatpush.bf16.msra.mxu2 %v1981_v10  ;;  %v1997_v39 = vld [vmem:[%s2246_s10 + $0x70] sm:$0xff]  ;;  %v1998_v43 = vld [vmem:[%s2246_s10 + $0x78] sm:$0xff]  ;;  %v449_v1 = vld [vmem:[%s2349_s26] sm:$0xff] }
  0x1a   : > { %1270 = vmatpush.bf16.msra.mxu1 %v1999_v11  ;;  %2006 = vmatpush.bf16.msra.mxu3 %v1999_v11  ;;  %v433_v6 = vld [vmem:[%s2343_s23 + $0x80] sm:$0xff]  ;;  %v481_v11 = vsub.f32 %v417_v0, %v449_v1 }
  0x1b   : > { %v2362_v7 = vld [vmem:[%s2349_s26 + $0x80] sm:$0xff] }
  0x1c   : > { %1859 = vmatmul.msk.bf16.vlgmr.msra.gmra.mxu0 %vm645_vm1, %v1965_v12  ;;  %1867 = vmatmul.msk.bf16.vlgmr.msra.gmra.mxu2 %vm645_vm1, %v1973_v13  ;;  %v418_v12 = vld [vmem:[%s2343_s23 + $0x8] sm:$0xff] }
  0x1d   : > { %1947 = vmatmul.msk.bf16.vlgmr.msra.gmra.mxu1 %vm645_vm1, %v1983_v14  ;;  %1955 = vmatmul.msk.bf16.vlgmr.msra.gmra.mxu3 %vm645_vm1, %v1991_v15  ;;  %v2367_v13 = vld [vmem:[%s2349_s26 + $0x8] sm:$0xff] }
  0x2c   : > { %1860 = vmatmul.msk.bf16.gmra.mxu0 %vm645_vm1, %v1966_v16  ;;  %1868 = vmatmul.msk.bf16.gmra.mxu2 %vm645_vm1, %v1974_v17 }
  0x2d   : > { %1948 = vmatmul.msk.bf16.gmra.mxu1 %vm645_vm1, %v1984_v18  ;;  %1956 = vmatmul.msk.bf16.gmra.mxu3 %vm645_vm1, %v1992_v19  ;;  %v434_v18 = vld [vmem:[%s2343_s23 + $0x88] sm:$0xff] }
  0x2e   : > { %v2371_v19 = vld [vmem:[%s2349_s26 + $0x88] sm:$0xff] }
  0x3c   : > { %1861 = vmatmul.msk.bf16.gmra.mxu0 %vm645_vm1, %v1967_v20  ;;  %1869 = vmatmul.msk.bf16.gmra.mxu2 %vm645_vm1, %v1975_v21 }
  0x3d   : > { %1949 = vmatmul.msk.bf16.gmra.mxu1 %vm645_vm1, %v1985_v22  ;;  %1957 = vmatmul.msk.bf16.gmra.mxu3 %vm645_vm1, %v1993_v23  ;;  %v497_v22 = vsub.f32 %v433_v6, %v2362_v7 }
  0x4c   : > { %1862 = vmatmul.msk.bf16.gmra.mxu0 %vm645_vm1, %v1968_v24  ;;  %1870 = vmatmul.msk.bf16.gmra.mxu2 %vm645_vm1, %v1976_v25  ;;  %v419_v25 = vld [vmem:[%s2343_s23 + $0x10] sm:$0xff] }
  0x4d   : > { %1950 = vmatmul.msk.bf16.gmra.mxu1 %vm645_vm1, %v1986_v26  ;;  %1958 = vmatmul.msk.bf16.gmra.mxu3 %vm645_vm1, %v1994_v27  ;;  %v2377_v26 = vld [vmem:[%s2349_s26 + $0x10] sm:$0xff] }
  0x5c   : > { %1863 = vmatmul.msk.bf16.gmra.mxu0 %vm645_vm1, %v1969_v28  ;;  %1871 = vmatmul.msk.bf16.gmra.mxu2 %vm645_vm1, %v1977_v29  ;;  %v482_v28 = vsub.f32 %v418_v12, %v2367_v13 }
  0x5d   : > { %1951 = vmatmul.msk.bf16.gmra.mxu1 %vm645_vm1, %v1987_v30  ;;  %1959 = vmatmul.msk.bf16.gmra.mxu3 %vm645_vm1, %v1995_v31  ;;  %v435_v31 = vld [vmem:[%s2343_s23 + $0x90] sm:$0xff] }
  0x6c   : > { %1864 = vmatmul.msk.bf16.gmra.mxu0 %vm645_vm1, %v1970_v32  ;;  %1872 = vmatmul.msk.bf16.gmra.mxu2 %vm645_vm1, %v1978_v33  ;;  %v2383_v32 = vld [vmem:[%s2349_s26 + $0x90] sm:$0xff] }
  0x6d   : > { %1952 = vmatmul.msk.bf16.gmra.mxu1 %vm645_vm1, %v1988_v34  ;;  %1960 = vmatmul.msk.bf16.gmra.mxu3 %vm645_vm1, %v1996_v35  ;;  %v2386_v34 = vsub.f32 %v434_v18, %v2371_v19 }
  0x7c   : > { %1865 = vmatmul.msk.bf16.gmra.mxu0 %vm645_vm1, %v1971_v36  ;;  %1873 = vmatmul.msk.bf16.gmra.mxu2 %vm645_vm1, %v1979_v37 }
  0x7d   : > { %1953 = vmatmul.msk.bf16.gmra.mxu1 %vm645_vm1, %v1989_v38  ;;  %1961 = vmatmul.msk.bf16.gmra.mxu3 %vm645_vm1, %v1997_v39 }
  0x8c   : > { %1866 = vmatmul.msk.bf16.gmra.mxu0 %vm645_vm1, %v1972_v40  ;;  %1874 = vmatmul.msk.bf16.gmra.mxu2 %vm645_vm1, %v1980_v41  ;;  %v2392_v40 = vsub.f32 %v419_v25, %v2377_v26 }
  0x8d   : > { %1954 = vmatmul.msk.bf16.gmra.mxu1 %vm645_vm1, %v1990_v42  ;;  %1962 = vmatmul.msk.bf16.gmra.mxu3 %vm645_vm1, %v1998_v43 }
  0x99   : > { %v707_v47 = vpop.f32.mrf.mxu0 }
  0x9a   : > { %v789_v49 = vmul.f32 %v2315_v44, %v707_v47  ;;  %v1272_v50 = vpop.f32.mrf.mxu1 }
  0x9b   : > { %v1354_v51 = vmul.f32 %v2320_v45, %v1272_v50  ;;  %v2403_v50 = vsub.f32 %v435_v31, %v2383_v32 }
  0x9c   : > { %v823_v52 = vadd.f32 %v2325_v46, %v789_v49 }
  0x9d   : > { %v1388_v53 = vadd.f32 %v2330_v48, %v1354_v51 }
  0x9e   : > { %v855_v54 = vmul.f32 0.5, %v823_v52 }
  0x9f   : > { %v1420_v55 = vmul.f32 0.5, %v1388_v53  ;;  %v747_v56 = vpop.f32.mrf.mxu2 }
  0xa0   : > { %2019 = vtanh.f32 %v855_v54  ;;  %v805_v57 = vmul.f32 %v2315_v44, %v747_v56  ;;  %v1312_v58 = vpop.f32.mrf.mxu3 }
  0xa1   : > { %2021 = vtanh.f32 %v1420_v55  ;;  %v1370_v59 = vmul.f32 %v2320_v45, %v1312_v58  ;;  %v709_v60 = vpop.f32.mrf.mxu0 }
  0xa2   : > { %v839_v61 = vadd.f32 %v2325_v46, %v805_v57  ;;  %v790_v62 = vmul.f32 %v2315_v44, %v709_v60  ;;  %v1274_v63 = vpop.f32.mrf.mxu1 }
  0xa3   : > { %v1404_v2 = vadd.f32 %v2330_v48, %v1370_v59  ;;  %v1355_v3 = vmul.f32 %v2320_v45, %v1274_v63 }
  0xa4   : > { %v871_v4 = vmul.f32 0.5, %v839_v61  ;;  %v824_v5 = vadd.f32 %v2325_v46, %v790_v62 }
  0xa5   : > { %v1436_v8 = vmul.f32 0.5, %v1404_v2  ;;  %v1389_v9 = vadd.f32 %v2330_v48, %v1355_v3 }
  0xa6   : > { %v2020_v10 = vpop.eup %2019  ;;  %2023 = vtanh.f32 %v871_v4  ;;  %v856_v14 = vmul.f32 0.5, %v824_v5 }
  0xa7   : > { %v2022_v15 = vpop.eup %2021  ;;  %v919_v16 = vmul.f32 0.5, %v2020_v10  ;;  %2025 = vtanh.f32 %v1436_v8  ;;  %v1421_v17 = vmul.f32 0.5, %v1389_v9  ;;  %v749_v20 = vpop.f32.mrf.mxu2 }
  0xa8   : > { %v1484_v21 = vmul.f32 0.5, %v2022_v15  ;;  %2027 = vtanh.f32 %v856_v14  ;;  %v806_v23 = vmul.f32 %v2315_v44, %v749_v20  ;;  %v1314_v24 = vpop.f32.mrf.mxu3 }
  0xa9   : > { %v951_v27 = vadd.f32 0.5, %v919_v16  ;;  %2029 = vtanh.f32 %v1421_v17  ;;  %v1371_v29 = vmul.f32 %v2320_v45, %v1314_v24  ;;  %v712_v30 = vpop.f32.mrf.mxu0 }
  0xaa   : > { %v1516_v33 = vadd.f32 0.5, %v1484_v21  ;;  %v840_v35 = vadd.f32 %v2325_v46, %v806_v23  ;;  %v791_v36 = vmul.f32 %v2315_v44, %v712_v30  ;;  %v1277_v37 = vpop.f32.mrf.mxu1 }
  0xab   : > { %v983_v38 = vmul.f32 %v951_v27, %v481_v11  ;;  %v1405_v39 = vadd.f32 %v2330_v48, %v1371_v29  ;;  %v1356_v41 = vmul.f32 %v2320_v45, %v1277_v37 }
  0xac   : > { %v2024_v42 = vpop.eup %2023  ;;  %v1548_v43 = vmul.f32 %v1516_v33, %v481_v11  ;;  %v872_v47 = vmul.f32 0.5, %v840_v35  ;;  %v825_v49 = vadd.f32 %v2325_v46, %v791_v36 }
  0xad   : > { %v2026_v51 = vpop.eup %2025  ;;  %v1015_v52 = vadd.f32 %v983_v38, %v449_v1  ;;  %v935_v53 = vmul.f32 0.5, %v2024_v42  ;;  %v1437_v54 = vmul.f32 0.5, %v1405_v39  ;;  %v1390_v55 = vadd.f32 %v2330_v48, %v1356_v41  ;;  %v420_v41 = vld [vmem:[%s2343_s23 + $0x18] sm:$0xff] }
  0xae   : > { %v2028_v56 = vpop.eup %2027  ;;  %v1580_v57 = vadd.f32 %v1548_v43, %v449_v1  ;;  %v1500_v58 = vmul.f32 0.5, %v2026_v51  ;;  %2031 = vtanh.f32 %v872_v47  ;;  %v857_v59 = vmul.f32 0.5, %v825_v49  ;;  %v2436_v42 = vld [vmem:[%s2349_s26 + $0x18] sm:$0xff] }
  0xaf   : > { %v2030_v60 = vpop.eup %2029  ;;  %1048 = vst.msk [vmem:[%s2399_s28] sm:$0xff] %vm1047_vm2, %v1015_v52  ;;  %v967_v61 = vadd.f32 0.5, %v935_v53  ;;  %v920_v62 = vmul.f32 0.5, %v2028_v56  ;;  %2033 = vtanh.f32 %v1437_v54  ;;  %v1422_v63 = vmul.f32 0.5, %v1390_v55  ;;  %v752_v0 = vpop.f32.mrf.mxu2 }
  0xb0   : > { %1612 = vst.msk [vmem:[%s2409_s11] sm:$0xff] %vm1047_vm2, %v1580_v57  ;;  %v1532_v2 = vadd.f32 0.5, %v1500_v58  ;;  %v1485_v3 = vmul.f32 0.5, %v2030_v60  ;;  %2035 = vtanh.f32 %v857_v59  ;;  %v807_v4 = vmul.f32 %v2315_v44, %v752_v0  ;;  %v1317_v5 = vpop.f32.mrf.mxu3 }
  0xb1   : > { %v999_v1 = vmul.f32 %v967_v61, %v497_v22  ;;  %v952_v6 = vadd.f32 0.5, %v920_v62  ;;  %2037 = vtanh.f32 %v1422_v63  ;;  %v1372_v8 = vmul.f32 %v2320_v45, %v1317_v5  ;;  %v714_v9 = vpop.f32.mrf.mxu0 }
  0xb2   : > { %v1564_v10 = vmul.f32 %v1532_v2, %v497_v22  ;;  %v1517_v11 = vadd.f32 0.5, %v1485_v3  ;;  %v841_v12 = vadd.f32 %v2325_v46, %v807_v4  ;;  %v792_v14 = vmul.f32 %v2315_v44, %v714_v9  ;;  %v1279_v15 = vpop.f32.mrf.mxu1 }
  0xb3   : > { %v1031_v16 = vadd.f32 %v999_v1, %v2362_v7  ;;  %v984_v17 = vmul.f32 %v952_v6, %v482_v28  ;;  %v1406_v18 = vadd.f32 %v2330_v48, %v1372_v8  ;;  %v1357_v20 = vmul.f32 %v2320_v45, %v1279_v15 }
  0xb4   : > { %v2032_v21 = vpop.eup %2031  ;;  %v1596_v23 = vadd.f32 %v1564_v10, %v2362_v7  ;;  %v1549_v24 = vmul.f32 %v1517_v11, %v482_v28  ;;  %v873_v22 = vmul.f32 0.5, %v841_v12  ;;  %v826_v25 = vadd.f32 %v2325_v46, %v792_v14  ;;  %v436_v10 = vld [vmem:[%s2343_s23 + $0x98] sm:$0xff] }
  0xb5   : > { %v2034_v27 = vpop.eup %2033  ;;  %1064 = vst.msk [vmem:[%s2399_s28 + $0x80] sm:$0xff] %vm1047_vm2, %v1031_v16  ;;  %v1016_v29 = vadd.f32 %v984_v17, %v2367_v13  ;;  %v936_v30 = vmul.f32 0.5, %v2032_v21  ;;  %v1438_v31 = vmul.f32 0.5, %v1406_v18  ;;  %v1391_v33 = vadd.f32 %v2330_v48, %v1357_v20  ;;  %v2458_v11 = vld [vmem:[%s2349_s26 + $0x98] sm:$0xff] }
  0xb6   : > { %v2036_v35 = vpop.eup %2035  ;;  %1628 = vst.msk [vmem:[%s2409_s11 + $0x80] sm:$0xff] %vm1047_vm2, %v1596_v23  ;;  %v1581_v7 = vadd.f32 %v1549_v24, %v2367_v13  ;;  %v1501_v28 = vmul.f32 0.5, %v2034_v27  ;;  %2039 = vtanh.f32 %v873_v22  ;;  %v858_v36 = vmul.f32 0.5, %v826_v25  ;;  %v2472_v27 = vld [vmem:[%s2349_s26 + $0x20] sm:$0xff] }
  0xb7   : > { %v2038_v37 = vpop.eup %2037  ;;  %1049 = vst.msk [vmem:[%s2399_s28 + $0x8] sm:$0xff] %vm1047_vm2, %v1016_v29  ;;  %v968_v38 = vadd.f32 0.5, %v936_v30  ;;  %v921_v39 = vmul.f32 0.5, %v2036_v35  ;;  %2041 = vtanh.f32 %v1438_v31  ;;  %v1423_v43 = vmul.f32 0.5, %v1391_v33  ;;  %v754_v47 = vpop.f32.mrf.mxu2 }
  0xb8   : > { %1613 = vst.msk [vmem:[%s2409_s11 + $0x8] sm:$0xff] %vm1047_vm2, %v1581_v7  ;;  %v1533_v49 = vadd.f32 0.5, %v1501_v28  ;;  %v1486_v51 = vmul.f32 0.5, %v2038_v37  ;;  %2043 = vtanh.f32 %v858_v36  ;;  %v808_v13 = vmul.f32 %v2315_v44, %v754_v47  ;;  %v1319_v52 = vpop.f32.mrf.mxu3 }
  0xb9   : > { %v1000_v53 = vmul.f32 %v968_v38, %v2386_v34  ;;  %v953_v54 = vadd.f32 0.5, %v921_v39  ;;  %2045 = vtanh.f32 %v1423_v43  ;;  %v1373_v55 = vmul.f32 %v2320_v45, %v1319_v52  ;;  %v717_v56 = vpop.f32.mrf.mxu0  ;;  %v437_v52 = vld [vmem:[%s2343_s23 + $0xa0] sm:$0xff] }
  0xba   : > { %v1565_v57 = vmul.f32 %v1533_v49, %v2386_v34  ;;  %v1518_v58 = vadd.f32 0.5, %v1486_v51  ;;  %v484_v59 = vsub.f32 %v420_v41, %v2436_v42  ;;  %v842_v60 = vadd.f32 %v2325_v46, %v808_v13  ;;  %v1282_v61 = vpop.f32.mrf.mxu1 }
  0xbb   : > { %v1032_v62 = vadd.f32 %v1000_v53, %v2371_v19  ;;  %v985_v63 = vmul.f32 %v953_v54, %v2392_v40  ;;  %v1407_v0 = vadd.f32 %v2330_v48, %v1373_v55  ;;  %v793_v2 = vmul.f32 %v2315_v44, %v717_v56 }
  0xbc   : > { %v2040_v3 = vpop.eup %2039  ;;  %v1597_v34 = vadd.f32 %v1565_v57, %v2371_v19  ;;  %v1550_v4 = vmul.f32 %v1518_v58, %v2392_v40  ;;  %v874_v5 = vmul.f32 0.5, %v842_v60  ;;  %v1358_v1 = vmul.f32 %v2320_v45, %v1282_v61 }
  0xbd   : > { %v2042_v6 = vpop.eup %2041  ;;  %1065 = vst.msk [vmem:[%s2399_s28 + $0x88] sm:$0xff] %vm1047_vm2, %v1032_v62  ;;  %v1017_v8 = vadd.f32 %v985_v63, %v2377_v26  ;;  %v937_v9 = vmul.f32 0.5, %v2040_v3  ;;  %v1439_v12 = vmul.f32 0.5, %v1407_v0  ;;  %v827_v14 = vadd.f32 %v2325_v46, %v793_v2 }
  0xbe   : > { %v2044_v19 = vpop.eup %2043  ;;  %1629 = vst.msk [vmem:[%s2409_s11 + $0x88] sm:$0xff] %vm1047_vm2, %v1597_v34  ;;  %v1582_v40 = vadd.f32 %v1550_v4, %v2377_v26  ;;  %v1502_v15 = vmul.f32 0.5, %v2042_v6  ;;  %2047 = vtanh.f32 %v874_v5  ;;  %v1392_v16 = vadd.f32 %v2330_v48, %v1358_v1  ;;  %v421_v26 = vld [vmem:[%s2343_s23 + $0x20] sm:$0xff] }
  0xbf   : > { %v2046_v17 = vpop.eup %2045  ;;  %1050 = vst.msk [vmem:[%s2399_s28 + $0x10] sm:$0xff] %vm1047_vm2, %v1017_v8  ;;  %v969_v18 = vadd.f32 0.5, %v937_v9  ;;  %v922_v20 = vmul.f32 0.5, %v2044_v19  ;;  %2049 = vtanh.f32 %v1439_v12  ;;  %v859_v21 = vmul.f32 0.5, %v827_v14  ;;  %v757_v23 = vpop.f32.mrf.mxu2  ;;  %v2506_v12 = vld [vmem:[%s2349_s26 + $0x28] sm:$0xff] }
  0xc0   : > { %1614 = vst.msk [vmem:[%s2409_s11 + $0x10] sm:$0xff] %vm1047_vm2, %v1582_v40  ;;  %v1534_v24 = vadd.f32 0.5, %v1502_v15  ;;  %v1487_v22 = vmul.f32 0.5, %v2046_v17  ;;  %v500_v25 = vsub.f32 %v436_v10, %v2458_v11  ;;  %v1424_v29 = vmul.f32 0.5, %v1392_v16  ;;  %v1322_v30 = vpop.f32.mrf.mxu3  ;;  %v422_v10 = vld [vmem:[%s2343_s23 + $0x28] sm:$0xff] }
  0xc1   : > { %v1001_v31 = vmul.f32 %v969_v18, %v2403_v50  ;;  %v954_v33 = vadd.f32 0.5, %v922_v20  ;;  %2051 = vtanh.f32 %v859_v21  ;;  %v809_v35 = vmul.f32 %v2315_v44, %v757_v23  ;;  %v719_v7 = vpop.f32.mrf.mxu0  ;;  %v438_v23 = vld [vmem:[%s2343_s23 + $0xa8] sm:$0xff] }
  0xc2   : > { %v1566_v28 = vmul.f32 %v1534_v24, %v2403_v50  ;;  %v1519_v36 = vadd.f32 0.5, %v1487_v22  ;;  %2053 = vtanh.f32 %v1424_v29  ;;  %v1374_v37 = vmul.f32 %v2320_v45, %v1322_v30  ;;  %v1284_v38 = vpop.f32.mrf.mxu1  ;;  %v2484_v50 = vld [vmem:[%s2349_s26 + $0xa0] sm:$0xff]  ;;  %v2513_v24 = vld [vmem:[%s2349_s26 + $0xa8] sm:$0xff] }
  0xc3   : > { %v1033_v39 = vadd.f32 %v1001_v31, %v2383_v32  ;;  %v986_v41 = vmul.f32 %v954_v33, %v484_v59  ;;  %v485_v43 = vsub.f32 %v421_v26, %v2472_v27  ;;  %v843_v47 = vadd.f32 %v2325_v46, %v809_v35 }
  0xc4   : > { %v2048_v49 = vpop.eup %2047  ;;  %v1598_v51 = vadd.f32 %v1566_v28, %v2383_v32  ;;  %v1551_v13 = vmul.f32 %v1519_v36, %v484_v59  ;;  %v1408_v53 = vadd.f32 %v2330_v48, %v1374_v37  ;;  %v794_v54 = vmul.f32 %v2315_v44, %v719_v7 }
  0xc5   : > { %v2050_v55 = vpop.eup %2049  ;;  %1066 = vst.msk [vmem:[%s2399_s28 + $0x90] sm:$0xff] %vm1047_vm2, %v1033_v39  ;;  %v1018_v56 = vadd.f32 %v986_v41, %v2436_v42  ;;  %v938_v57 = vmul.f32 0.5, %v2048_v49  ;;  %v875_v58 = vmul.f32 0.5, %v843_v47  ;;  %v1359_v60 = vmul.f32 %v2320_v45, %v1284_v38 }
  0xc6   : > { %1630 = vst.msk [vmem:[%s2409_s11 + $0x90] sm:$0xff] %vm1047_vm2, %v1598_v51  ;;  %v1583_v32 = vadd.f32 %v1551_v13, %v2436_v42  ;;  %v1503_v59 = vmul.f32 0.5, %v2050_v55  ;;  %v1440_v61 = vmul.f32 0.5, %v1408_v53  ;;  %v828_v62 = vadd.f32 %v2325_v46, %v794_v54 }
  0xc7   : > { %v2052_v63 = vpop.eup %2051  ;;  %1051 = vst.msk [vmem:[%s2399_s28 + $0x18] sm:$0xff] %vm1047_vm2, %v1018_v56  ;;  %v970_v0 = vadd.f32 0.5, %v938_v57  ;;  %v2499_v2 = vsub.f32 %v437_v52, %v2484_v50  ;;  %2055 = vtanh.f32 %v875_v58  ;;  %v1393_v3 = vadd.f32 %v2330_v48, %v1359_v60  ;;  %v759_v34 = vpop.f32.mrf.mxu2 }
  0xc8   : > { %v2054_v4 = vpop.eup %2053  ;;  %1615 = vst.msk [vmem:[%s2409_s11 + $0x18] sm:$0xff] %vm1047_vm2, %v1583_v32  ;;  %v1535_v42 = vadd.f32 0.5, %v1503_v59  ;;  %v923_v5 = vmul.f32 0.5, %v2052_v63  ;;  %2057 = vtanh.f32 %v1440_v61  ;;  %v860_v1 = vmul.f32 0.5, %v828_v62  ;;  %v1324_v6 = vpop.f32.mrf.mxu3  ;;  %v423_v61 = vld [vmem:[%s2343_s23 + $0x30] sm:$0xff] }
  0xc9   : > { %v1002_v8 = vmul.f32 %v970_v0, %v500_v25  ;;  %v1488_v9 = vmul.f32 0.5, %v2054_v4  ;;  %v1425_v14 = vmul.f32 0.5, %v1393_v3  ;;  %v810_v19 = vmul.f32 %v2315_v44, %v759_v34  ;;  %v722_v40 = vpop.f32.mrf.mxu0  ;;  %v2541_v62 = vld [vmem:[%s2349_s26 + $0x30] sm:$0xff] }
  0xca   : > { %v1567_v15 = vmul.f32 %v1535_v42, %v500_v25  ;;  %v955_v16 = vadd.f32 0.5, %v923_v5  ;;  %2059 = vtanh.f32 %v860_v1  ;;  %v1375_v17 = vmul.f32 %v2320_v45, %v1324_v6  ;;  %v1287_v18 = vpop.f32.mrf.mxu1 }
  0xcb   : > { %v1034_v20 = vadd.f32 %v1002_v8, %v2458_v11  ;;  %v1520_v21 = vadd.f32 0.5, %v1488_v9  ;;  %2061 = vtanh.f32 %v1425_v14  ;;  %v844_v22 = vadd.f32 %v2325_v46, %v810_v19  ;;  %v2551_v19 = vld [vmem:[%s2349_s26 + $0xb0] sm:$0xff] }
  0xcc   : > { %v1599_v26 = vadd.f32 %v1567_v15, %v2458_v11  ;;  %v987_v29 = vmul.f32 %v955_v16, %v485_v43  ;;  %v486_v25 = vsub.f32 %v422_v10, %v2506_v12  ;;  %v1409_v30 = vadd.f32 %v2330_v48, %v1375_v17 }
  0xcd   : > { %v2056_v31 = vpop.eup %2055  ;;  %1067 = vst.msk [vmem:[%s2399_s28 + $0x98] sm:$0xff] %vm1047_vm2, %v1034_v20  ;;  %v1552_v33 = vmul.f32 %v1520_v21, %v485_v43  ;;  %v876_v35 = vmul.f32 0.5, %v844_v22  ;;  %v795_v7 = vmul.f32 %v2315_v44, %v722_v40  ;;  %v1360_v28 = vmul.f32 %v2320_v45, %v1287_v18  ;;  %v424_v21 = vld [vmem:[%s2343_s23 + $0x38] sm:$0xff] }
  0xce   : > { %v2058_v36 = vpop.eup %2057  ;;  %1631 = vst.msk [vmem:[%s2409_s11 + $0x98] sm:$0xff] %vm1047_vm2, %v1599_v26  ;;  %v1019_v11 = vadd.f32 %v987_v29, %v2472_v27  ;;  %v939_v37 = vmul.f32 0.5, %v2056_v31  ;;  %v2527_v38 = vsub.f32 %v438_v23, %v2513_v24  ;;  %v1441_v39 = vmul.f32 0.5, %v1409_v30  ;;  %v2561_v23 = vld [vmem:[%s2349_s26 + $0x38] sm:$0xff] }
  0xcf   : > { %v1584_v41 = vadd.f32 %v1552_v33, %v2472_v27  ;;  %v1504_v43 = vmul.f32 0.5, %v2058_v36  ;;  %2063 = vtanh.f32 %v876_v35  ;;  %v829_v47 = vadd.f32 %v2325_v46, %v795_v7  ;;  %v762_v49 = vpop.f32.mrf.mxu2 }
  0xd0   : > { %v2060_v51 = vpop.eup %2059  ;;  %1052 = vst.msk [vmem:[%s2399_s28 + $0x20] sm:$0xff] %vm1047_vm2, %v1019_v11  ;;  %v971_v13 = vadd.f32 0.5, %v939_v37  ;;  %2065 = vtanh.f32 %v1441_v39  ;;  %v1394_v52 = vadd.f32 %v2330_v48, %v1360_v28  ;;  %v811_v53 = vmul.f32 %v2315_v44, %v762_v49  ;;  %v1327_v54 = vpop.f32.mrf.mxu3 }
  0xd1   : > { %v2062_v55 = vpop.eup %2061  ;;  %1616 = vst.msk [vmem:[%s2409_s11 + $0x20] sm:$0xff] %vm1047_vm2, %v1584_v41  ;;  %v1536_v27 = vadd.f32 0.5, %v1504_v43  ;;  %v924_v56 = vmul.f32 0.5, %v2060_v51  ;;  %v861_v57 = vmul.f32 0.5, %v829_v47  ;;  %v1376_v58 = vmul.f32 %v2320_v45, %v1327_v54  ;;  %v724_v60 = vpop.f32.mrf.mxu0 }
  0xd2   : > { %v1003_v32 = vmul.f32 %v971_v13, %v2499_v2  ;;  %v1489_v59 = vmul.f32 0.5, %v2062_v55  ;;  %v1426_v63 = vmul.f32 0.5, %v1394_v52  ;;  %v845_v0 = vadd.f32 %v2325_v46, %v811_v53  ;;  %v1289_v3 = vpop.f32.mrf.mxu1 }
  0xd3   : > { %v1568_v34 = vmul.f32 %v1536_v27, %v2499_v2  ;;  %v956_v4 = vadd.f32 0.5, %v924_v56  ;;  %2067 = vtanh.f32 %v861_v57  ;;  %v1410_v42 = vadd.f32 %v2330_v48, %v1376_v58  ;;  %v439_v2 = vld [vmem:[%s2343_s23 + $0xb0] sm:$0xff] }
  0xd4   : > { %v1035_v5 = vadd.f32 %v1003_v32, %v2484_v50  ;;  %v1521_v1 = vadd.f32 0.5, %v1489_v59  ;;  %2069 = vtanh.f32 %v1426_v63  ;;  %v877_v6 = vmul.f32 0.5, %v845_v0  ;;  %v2585_v59 = vld [vmem:[%s2349_s26 + $0xb8] sm:$0xff] }
  0xd5   : > { %v2064_v8 = vpop.eup %2063  ;;  %v1600_v9 = vadd.f32 %v1568_v34, %v2484_v50  ;;  %v988_v10 = vmul.f32 %v956_v4, %v486_v25  ;;  %v487_v14 = vsub.f32 %v423_v61, %v2541_v62  ;;  %v1442_v40 = vmul.f32 0.5, %v1410_v42 }
  0xd6   : > { %v2066_v15 = vpop.eup %2065  ;;  %1068 = vst.msk [vmem:[%s2399_s28 + $0xa0] sm:$0xff] %vm1047_vm2, %v1035_v5  ;;  %v1553_v16 = vmul.f32 %v1521_v1, %v486_v25  ;;  %v940_v17 = vmul.f32 0.5, %v2064_v8  ;;  %2071 = vtanh.f32 %v877_v6  ;;  %v796_v18 = vmul.f32 %v2315_v44, %v724_v60 }
  0xd7   : > { %1632 = vst.msk [vmem:[%s2409_s11 + $0xa0] sm:$0xff] %vm1047_vm2, %v1600_v9  ;;  %v1020_v50 = vadd.f32 %v988_v10, %v2506_v12  ;;  %v1505_v20 = vmul.f32 0.5, %v2066_v15  ;;  %2073 = vtanh.f32 %v1442_v40  ;;  %v1361_v22 = vmul.f32 %v2320_v45, %v1289_v3  ;;  %v764_v26 = vpop.f32.mrf.mxu2  ;;  %v425_v9 = vld [vmem:[%s2343_s23 + $0x40] sm:$0xff] }
  0xd8   : > { %v1585_v29 = vadd.f32 %v1553_v16, %v2506_v12  ;;  %v972_v25 = vadd.f32 0.5, %v940_v17  ;;  %v503_v30 = vsub.f32 %v439_v2, %v2551_v19  ;;  %v830_v31 = vadd.f32 %v2325_v46, %v796_v18  ;;  %v1329_v33 = vpop.f32.mrf.mxu3  ;;  %v2599_v10 = vld [vmem:[%s2349_s26 + $0x40] sm:$0xff] }
  0xd9   : > { %v2068_v35 = vpop.eup %2067  ;;  %1053 = vst.msk [vmem:[%s2399_s28 + $0x28] sm:$0xff] %vm1047_vm2, %v1020_v50  ;;  %v1537_v7 = vadd.f32 0.5, %v1505_v20  ;;  %v1395_v28 = vadd.f32 %v2330_v48, %v1361_v22  ;;  %v812_v36 = vmul.f32 %v2315_v44, %v764_v26  ;;  %v1377_v11 = vmul.f32 %v2320_v45, %v1329_v33  ;;  %v727_v37 = vpop.f32.mrf.mxu0 }
  0xda   : > { %v2070_v39 = vpop.eup %2069  ;;  %1617 = vst.msk [vmem:[%s2409_s11 + $0x28] sm:$0xff] %vm1047_vm2, %v1585_v29  ;;  %v1004_v12 = vmul.f32 %v972_v25, %v2527_v38  ;;  %v925_v41 = vmul.f32 0.5, %v2068_v35  ;;  %v2576_v43 = vsub.f32 %v424_v21, %v2561_v23  ;;  %v862_v47 = vmul.f32 0.5, %v830_v31  ;;  %v1292_v49 = vpop.f32.mrf.mxu1 }
  0xdb   : > { %v1569_v51 = vmul.f32 %v1537_v7, %v2527_v38  ;;  %v1490_v13 = vmul.f32 0.5, %v2070_v39  ;;  %v1427_v52 = vmul.f32 0.5, %v1395_v28  ;;  %v846_v53 = vadd.f32 %v2325_v46, %v812_v36  ;;  %v440_v38 = vld [vmem:[%s2343_s23 + $0xb8] sm:$0xff] }
  0xdc   : > { %v2072_v54 = vpop.eup %2071  ;;  %v1036_v55 = vadd.f32 %v1004_v12, %v2513_v24  ;;  %v957_v27 = vadd.f32 0.5, %v925_v41  ;;  %2075 = vtanh.f32 %v862_v47  ;;  %v1411_v56 = vadd.f32 %v2330_v48, %v1377_v11 }
  0xdd   : > { %v2074_v57 = vpop.eup %2073  ;;  %v1601_v58 = vadd.f32 %v1569_v51, %v2513_v24  ;;  %v1522_v60 = vadd.f32 0.5, %v1490_v13  ;;  %v941_v32 = vmul.f32 0.5, %v2072_v54  ;;  %2077 = vtanh.f32 %v1427_v52  ;;  %v441_v51 = vld [vmem:[%s2343_s23 + $0xc0] sm:$0xff] }
  0xde   : > { %1069 = vst.msk [vmem:[%s2399_s28 + $0xa8] sm:$0xff] %vm1047_vm2, %v1036_v55  ;;  %v989_v61 = vmul.f32 %v957_v27, %v487_v14  ;;  %v1506_v63 = vmul.f32 0.5, %v2074_v57  ;;  %v878_v0 = vmul.f32 0.5, %v846_v53  ;;  %v1443_v3 = vmul.f32 0.5, %v1411_v56  ;;  %v2626_v13 = vld [vmem:[%s2349_s26 + $0xc0] sm:$0xff] }
  0xdf   : > { %1633 = vst.msk [vmem:[%s2409_s11 + $0xa8] sm:$0xff] %vm1047_vm2, %v1601_v58  ;;  %v1554_v34 = vmul.f32 %v1522_v60, %v487_v14  ;;  %v973_v4 = vadd.f32 0.5, %v941_v32  ;;  %v797_v24 = vmul.f32 %v2315_v44, %v727_v37  ;;  %v1362_v42 = vmul.f32 %v2320_v45, %v1292_v49  ;;  %v767_v5 = vpop.f32.mrf.mxu2  ;;  %v426_v32 = vld [vmem:[%s2343_s23 + $0x48] sm:$0xff] }
  0xe0   : > { %v1021_v1 = vadd.f32 %v989_v61, %v2541_v62  ;;  %v1538_v6 = vadd.f32 0.5, %v1506_v63  ;;  %v2595_v8 = vsub.f32 %v440_v38, %v2585_v59  ;;  %2079 = vtanh.f32 %v878_v0  ;;  %v1332_v2 = vpop.f32.mrf.mxu3  ;;  %v2634_v38 = vld [vmem:[%s2349_s26 + $0x48] sm:$0xff] }
  0xe1   : > { %v1586_v14 = vadd.f32 %v1554_v34, %v2541_v62  ;;  %v1005_v40 = vmul.f32 %v973_v4, %v503_v30  ;;  %2081 = vtanh.f32 %v1443_v3  ;;  %v831_v15 = vadd.f32 %v2325_v46, %v797_v24  ;;  %v729_v16 = vpop.f32.mrf.mxu0 }
  0xe2   : > { %v2076_v17 = vpop.eup %2075  ;;  %1054 = vst.msk [vmem:[%s2399_s28 + $0x30] sm:$0xff] %vm1047_vm2, %v1021_v1  ;;  %v1570_v18 = vmul.f32 %v1538_v6, %v503_v30  ;;  %v1396_v50 = vadd.f32 %v2330_v48, %v1362_v42  ;;  %v813_v20 = vmul.f32 %v2315_v44, %v767_v5  ;;  %v1378_v21 = vmul.f32 %v2320_v45, %v1332_v2  ;;  %v1294_v22 = vpop.f32.mrf.mxu1 }
  0xe3   : > { %v2078_v26 = vpop.eup %2077  ;;  %1618 = vst.msk [vmem:[%s2409_s11 + $0x30] sm:$0xff] %vm1047_vm2, %v1586_v14  ;;  %v1037_v62 = vadd.f32 %v1005_v40, %v2551_v19  ;;  %v926_v29 = vmul.f32 0.5, %v2076_v17  ;;  %v2612_v25 = vsub.f32 %v425_v9, %v2599_v10  ;;  %v863_v31 = vmul.f32 0.5, %v831_v15 }
  0xe4   : > { %v1602_v30 = vadd.f32 %v1570_v18, %v2551_v19  ;;  %v1491_v33 = vmul.f32 0.5, %v2078_v26  ;;  %v1428_v35 = vmul.f32 0.5, %v1396_v50  ;;  %v847_v7 = vadd.f32 %v2325_v46, %v813_v20  ;;  %v442_v20 = vld [vmem:[%s2343_s23 + $0xc8] sm:$0xff] }
  0xe5   : > { %1070 = vst.msk [vmem:[%s2399_s28 + $0xb0] sm:$0xff] %vm1047_vm2, %v1037_v62  ;;  %v958_v28 = vadd.f32 0.5, %v926_v29  ;;  %2083 = vtanh.f32 %v863_v31  ;;  %v1412_v36 = vadd.f32 %v2330_v48, %v1378_v21  ;;  %v798_v11 = vmul.f32 %v2315_v44, %v729_v16  ;;  %v2653_v21 = vld [vmem:[%s2349_s26 + $0xc8] sm:$0xff] }
  0xe6   : > { %v2080_v37 = vpop.eup %2079  ;;  %1634 = vst.msk [vmem:[%s2409_s11 + $0xb0] sm:$0xff] %vm1047_vm2, %v1602_v30  ;;  %v1523_v39 = vadd.f32 0.5, %v1491_v33  ;;  %2085 = vtanh.f32 %v1428_v35  ;;  %v879_v19 = vmul.f32 0.5, %v847_v7  ;;  %v1363_v12 = vmul.f32 %v2320_v45, %v1294_v22 }
  0xe7   : > { %v2082_v41 = vpop.eup %2081  ;;  %v990_v47 = vmul.f32 %v958_v28, %v2576_v43  ;;  %v942_v49 = vmul.f32 0.5, %v2080_v37  ;;  %v1444_v52 = vmul.f32 0.5, %v1412_v36  ;;  %v832_v53 = vadd.f32 %v2325_v46, %v798_v11  ;;  %v769_v54 = vpop.f32.mrf.mxu2 }
  0xe8   : > { %v1555_v55 = vmul.f32 %v1523_v39, %v2576_v43  ;;  %v1507_v27 = vmul.f32 0.5, %v2082_v41  ;;  %2087 = vtanh.f32 %v879_v19  ;;  %v1397_v56 = vadd.f32 %v2330_v48, %v1363_v12  ;;  %v1334_v57 = vpop.f32.mrf.mxu3 }
  0xe9   : > { %v1022_v58 = vadd.f32 %v990_v47, %v2561_v23  ;;  %v974_v60 = vadd.f32 0.5, %v942_v49  ;;  %2089 = vtanh.f32 %v1444_v52  ;;  %v864_v61 = vmul.f32 0.5, %v832_v53  ;;  %v732_v63 = vpop.f32.mrf.mxu0 }
  0xea   : > { %v1587_v0 = vadd.f32 %v1555_v55, %v2561_v23  ;;  %v1539_v3 = vadd.f32 0.5, %v1507_v27  ;;  %v505_v43 = vsub.f32 %v441_v51, %v2626_v13  ;;  %v1429_v34 = vmul.f32 0.5, %v1397_v56  ;;  %v1297_v4 = vpop.f32.mrf.mxu1  ;;  %v427_v56 = vld [vmem:[%s2343_s23 + $0x50] sm:$0xff] }
  0xeb   : > { %v2084_v24 = vpop.eup %2083  ;;  %1055 = vst.msk [vmem:[%s2399_s28 + $0x38] sm:$0xff] %vm1047_vm2, %v1022_v58  ;;  %v1006_v42 = vmul.f32 %v974_v60, %v2595_v8  ;;  %2091 = vtanh.f32 %v864_v61  ;;  %v814_v5 = vmul.f32 %v2315_v44, %v769_v54  ;;  %v1379_v1 = vmul.f32 %v2320_v45, %v1334_v57  ;;  %v2674_v57 = vld [vmem:[%s2349_s26 + $0x50] sm:$0xff] }
  0xec   : > { %v2086_v6 = vpop.eup %2085  ;;  %1619 = vst.msk [vmem:[%s2409_s11 + $0x38] sm:$0xff] %vm1047_vm2, %v1587_v0  ;;  %v1571_v23 = vmul.f32 %v1539_v3, %v2595_v8  ;;  %v927_v9 = vmul.f32 0.5, %v2084_v24  ;;  %v490_v2 = vsub.f32 %v426_v32, %v2634_v38  ;;  %2093 = vtanh.f32 %v1429_v34  ;;  %v2690_v24 = vld [vmem:[%s2349_s26 + $0xd0] sm:$0xff] }
  0xed   : > { %v1038_v14 = vadd.f32 %v1006_v42, %v2585_v59  ;;  %v1492_v40 = vmul.f32 0.5, %v2086_v6  ;;  %v848_v15 = vadd.f32 %v2325_v46, %v814_v5  ;;  %v1413_v16 = vadd.f32 %v2330_v48, %v1379_v1 }
  0xee   : > { %v2088_v17 = vpop.eup %2087  ;;  %v1603_v18 = vadd.f32 %v1571_v23, %v2585_v59  ;;  %v959_v50 = vadd.f32 0.5, %v927_v9  ;;  %v799_v8 = vmul.f32 %v2315_v44, %v732_v63  ;;  %v1364_v22 = vmul.f32 %v2320_v45, %v1297_v4  ;;  %v443_v4 = vld [vmem:[%s2343_s23 + $0xd0] sm:$0xff] }
  0xef   : > { %v2090_v26 = vpop.eup %2089  ;;  %1071 = vst.msk [vmem:[%s2399_s28 + $0xb8] sm:$0xff] %vm1047_vm2, %v1038_v14  ;;  %v1524_v62 = vadd.f32 0.5, %v1492_v40  ;;  %v943_v29 = vmul.f32 0.5, %v2088_v17  ;;  %v880_v31 = vmul.f32 0.5, %v848_v15  ;;  %v1445_v30 = vmul.f32 0.5, %v1413_v16  ;;  %v772_v33 = vpop.f32.mrf.mxu2 }
  0xf0   : > { %1635 = vst.msk [vmem:[%s2409_s11 + $0xb8] sm:$0xff] %vm1047_vm2, %v1603_v18  ;;  %v991_v59 = vmul.f32 %v959_v50, %v2612_v25  ;;  %v1508_v35 = vmul.f32 0.5, %v2090_v26  ;;  %v833_v7 = vadd.f32 %v2325_v46, %v799_v8  ;;  %v1398_v28 = vadd.f32 %v2330_v48, %v1364_v22  ;;  %v1337_v36 = vpop.f32.mrf.mxu3  ;;  %v2717_v18 = vld [vmem:[%s2889_s4 + $0x1] ss:$0 sm:$0xff] }
  0xf1   : > { %v2092_v11 = vpop.eup %2091  ;;  %v1556_v37 = vmul.f32 %v1524_v62, %v2612_v25  ;;  %v975_v39 = vadd.f32 0.5, %v943_v29  ;;  %v2666_v19 = vsub.f32 %v442_v20, %v2653_v21  ;;  %2095 = vtanh.f32 %v880_v31  ;;  %v734_v12 = vpop.f32.mrf.mxu0 }
  0xf2   : > { %v2094_v41 = vpop.eup %2093  ;;  %v1023_v47 = vadd.f32 %v991_v59, %v2599_v10  ;;  %v1540_v49 = vadd.f32 0.5, %v1508_v35  ;;  %v928_v51 = vmul.f32 0.5, %v2092_v11  ;;  %2097 = vtanh.f32 %v1445_v30  ;;  %v1299_v48 = vpop.f32.mrf.mxu1 }
  0xf3   : > { %v1588_v52 = vadd.f32 %v1556_v37, %v2599_v10  ;;  %v1007_v53 = vmul.f32 %v975_v39, %v505_v43  ;;  %v1493_v25 = vmul.f32 0.5, %v2094_v41  ;;  %v865_v54 = vmul.f32 0.5, %v833_v7  ;;  %v428_v7 = vld [vmem:[%s2343_s23 + $0x58] sm:$0xff] }
  0xf4   : > { %1056 = vst.msk [vmem:[%s2399_s28 + $0x40] sm:$0xff] %vm1047_vm2, %v1023_v47  ;;  %v1572_v55 = vmul.f32 %v1540_v49, %v505_v43  ;;  %v960_v27 = vadd.f32 0.5, %v928_v51  ;;  %v1430_v58 = vmul.f32 0.5, %v1398_v28  ;;  %v815_v60 = vmul.f32 %v2315_v44, %v772_v33  ;;  %v2732_v28 = vld [vmem:[%s2349_s26 + $0x58] sm:$0xff] }
  0xf5   : > { %1620 = vst.msk [vmem:[%s2409_s11 + $0x40] sm:$0xff] %vm1047_vm2, %v1588_v52  ;;  %v1039_v10 = vadd.f32 %v1007_v53, %v2626_v13  ;;  %v1525_v32 = vadd.f32 0.5, %v1493_v25  ;;  %2099 = vtanh.f32 %v865_v54  ;;  %v1380_v61 = vmul.f32 %v2320_v45, %v1337_v36  ;;  %v2695_v45 = vld [vmem:[%s2890_s5 + $0x1] ss:$0 sm:$0xff]  ;;  %v444_v49 = vld [vmem:[%s2343_s23 + $0xd8] sm:$0xff] }
  0xf6   : > { %v1604_v63 = vadd.f32 %v1572_v55, %v2626_v13  ;;  %v992_v0 = vmul.f32 %v960_v27, %v490_v2  ;;  %2101 = vtanh.f32 %v1430_v58  ;;  %v849_v3 = vadd.f32 %v2325_v46, %v815_v60  ;;  %v2701_v46 = vld [vmem:[%s2889_s4] ss:$0 sm:$0xff]  ;;  %v2740_v51 = vld [vmem:[%s2349_s26 + $0xd8] sm:$0xff] }
  0xf7   : > { %v2096_v43 = vpop.eup %2095  ;;  %1072 = vst.msk [vmem:[%s2399_s28 + $0xc0] sm:$0xff] %vm1047_vm2, %v1039_v10  ;;  %v1557_v34 = vmul.f32 %v1525_v32, %v490_v2  ;;  %v2686_v44 = vsub.f32 %v427_v56, %v2674_v57  ;;  %v1414_v13 = vadd.f32 %v2695_v45, %v1380_v61  ;;  %v800_v42 = vmul.f32 %v2701_v46, %v734_v12  ;;  %v774_v5 = vpop.f32.mrf.mxu2  ;;  %v2710_v2 = vld [vmem:[%s2890_s5] ss:$0 sm:$0xff] }
  0xf8   : > { %v2098_v1 = vpop.eup %2097  ;;  %1636 = vst.msk [vmem:[%s2409_s11 + $0xc0] sm:$0xff] %vm1047_vm2, %v1604_v63  ;;  %v1024_v6 = vadd.f32 %v992_v0, %v2634_v38  ;;  %v944_v23 = vmul.f32 0.5, %v2096_v43  ;;  %v881_v9 = vmul.f32 0.5, %v849_v3  ;;  %v1365_v14 = vmul.f32 %v2710_v2, %v1299_v48  ;;  %v1339_v40 = vpop.f32.mrf.mxu3 }
  0xf9   : > { %v1589_v15 = vadd.f32 %v1557_v34, %v2634_v38  ;;  %v1509_v16 = vmul.f32 0.5, %v2098_v1  ;;  %v1446_v17 = vmul.f32 0.5, %v1414_v13  ;;  %v834_v50 = vadd.f32 %v2717_v18, %v800_v42  ;;  %v737_v20 = vpop.f32.mrf.mxu0 }
  0xfa   : > { %1057 = vst.msk [vmem:[%s2399_s28 + $0x48] sm:$0xff] %vm1047_vm2, %v1024_v6  ;;  %v976_v8 = vadd.f32 0.5, %v944_v23  ;;  %v2723_v22 = vsub.f32 %v443_v4, %v2690_v24  ;;  %2103 = vtanh.f32 %v881_v9  ;;  %v1399_v38 = vadd.f32 %v2695_v45, %v1365_v14  ;;  %v1302_v26 = vpop.f32.mrf.mxu1 }
  0xfb   : > { %v2100_v62 = vpop.eup %2099  ;;  %1621 = vst.msk [vmem:[%s2409_s11 + $0x48] sm:$0xff] %vm1047_vm2, %v1589_v15  ;;  %v1541_v29 = vadd.f32 0.5, %v1509_v16  ;;  %2105 = vtanh.f32 %v1446_v17  ;;  %v866_v31 = vmul.f32 0.5, %v834_v50  ;;  %v816_v30 = vmul.f32 %v2701_v46, %v774_v5 }
  0xfc   : > { %v2102_v33 = vpop.eup %2101  ;;  %v1008_v59 = vmul.f32 %v976_v8, %v2666_v19  ;;  %v929_v35 = vmul.f32 0.5, %v2100_v62  ;;  %v1431_v36 = vmul.f32 0.5, %v1399_v38  ;;  %v1381_v11 = vmul.f32 %v2710_v2, %v1339_v40 }
  0xfd   : > { %v1573_v37 = vmul.f32 %v1541_v29, %v2666_v19  ;;  %v1494_v39 = vmul.f32 0.5, %v2102_v33  ;;  %2107 = vtanh.f32 %v866_v31  ;;  %v850_v12 = vadd.f32 %v2717_v18, %v816_v30 }
  0xfe   : > { %v1040_v41 = vadd.f32 %v1008_v59, %v2653_v21  ;;  %v961_v47 = vadd.f32 0.5, %v929_v35  ;;  %2109 = vtanh.f32 %v1431_v36  ;;  %v1415_v48 = vadd.f32 %v2695_v45, %v1381_v11  ;;  %v429_v35 = vld [vmem:[%s2343_s23 + $0x60] sm:$0xff] }
  0xff   : > { %v1605_v52 = vadd.f32 %v1573_v37, %v2653_v21  ;;  %v1526_v53 = vadd.f32 0.5, %v1494_v39  ;;  %v492_v19 = vsub.f32 %v428_v7, %v2732_v28  ;;  %v882_v25 = vmul.f32 0.5, %v850_v12  ;;  %v777_v54 = vpop.f32.mrf.mxu2  ;;  %v2774_v7 = vld [vmem:[%s2349_s26 + $0x60] sm:$0xff] }
 0x100   : > { %v2104_v55 = vpop.eup %2103  ;;  %1073 = vst.msk [vmem:[%s2399_s28 + $0xc8] sm:$0xff] %vm1047_vm2, %v1040_v41  ;;  %v993_v27 = vmul.f32 %v961_v47, %v2686_v44  ;;  %v1447_v56 = vmul.f32 0.5, %v1415_v48  ;;  %v801_v58 = vmul.f32 %v2701_v46, %v737_v20  ;;  %v1366_v60 = vmul.f32 %v2710_v2, %v1302_v26  ;;  %v1342_v10 = vpop.f32.mrf.mxu3  ;;  %v445_v47 = vld [vmem:[%s2343_s23 + $0xe0] sm:$0xff] }
 0x101   : > { %v2106_v32 = vpop.eup %2105  ;;  %1637 = vst.msk [vmem:[%s2409_s11 + $0xc8] sm:$0xff] %vm1047_vm2, %v1605_v52  ;;  %v1558_v21 = vmul.f32 %v1526_v53, %v2686_v44  ;;  %v945_v61 = vmul.f32 0.5, %v2104_v55  ;;  %v2754_v63 = vsub.f32 %v444_v49, %v2740_v51  ;;  %2111 = vtanh.f32 %v882_v25  ;;  %v739_v0 = vpop.f32.mrf.mxu0  ;;  %v2783_v49 = vld [vmem:[%s2349_s26 + $0xe0] sm:$0xff] }
 0x102   : > { %v1025_v3 = vadd.f32 %v993_v27, %v2674_v57  ;;  %v1510_v43 = vmul.f32 0.5, %v2106_v32  ;;  %2113 = vtanh.f32 %v1447_v56  ;;  %v835_v34 = vadd.f32 %v2717_v18, %v801_v58  ;;  %v1304_v40 = vpop.f32.mrf.mxu1 }
 0x103   : > { %v2108_v4 = vpop.eup %2107  ;;  %v1590_v13 = vadd.f32 %v1558_v21, %v2674_v57  ;;  %v977_v42 = vadd.f32 0.5, %v945_v61  ;;  %v1400_v5 = vadd.f32 %v2695_v45, %v1366_v60  ;;  %v817_v44 = vmul.f32 %v2701_v46, %v777_v54 }
 0x104   : > { %v2110_v1 = vpop.eup %2109  ;;  %1058 = vst.msk [vmem:[%s2399_s28 + $0x50] sm:$0xff] %vm1047_vm2, %v1025_v3  ;;  %v1542_v6 = vadd.f32 0.5, %v1510_v43  ;;  %v930_v23 = vmul.f32 0.5, %v2108_v4  ;;  %v867_v9 = vmul.f32 0.5, %v835_v34  ;;  %v1382_v14 = vmul.f32 %v2710_v2, %v1342_v10 }
 0x105   : > { %1622 = vst.msk [vmem:[%s2409_s11 + $0x50] sm:$0xff] %vm1047_vm2, %v1590_v13  ;;  %v1009_v15 = vmul.f32 %v977_v42, %v2723_v22  ;;  %v1495_v16 = vmul.f32 0.5, %v2110_v1  ;;  %v1432_v57 = vmul.f32 0.5, %v1400_v5  ;;  %v851_v17 = vadd.f32 %v2717_v18, %v817_v44 }
 0x106   : > { %v1574_v50 = vmul.f32 %v1542_v6, %v2723_v22  ;;  %v962_v20 = vadd.f32 0.5, %v930_v23  ;;  %2115 = vtanh.f32 %v867_v9  ;;  %v1416_v8 = vadd.f32 %v2695_v45, %v1382_v14 }
 0x107   : > { %v2112_v38 = vpop.eup %2111  ;;  %v1041_v26 = vadd.f32 %v1009_v15, %v2690_v24  ;;  %v1527_v62 = vadd.f32 0.5, %v1495_v16  ;;  %2117 = vtanh.f32 %v1432_v57  ;;  %v883_v29 = vmul.f32 0.5, %v851_v17  ;;  %v779_v31 = vpop.f32.mrf.mxu2  ;;  %v2810_v15 = vld [vmem:[%s2349_s26 + $0x68] sm:$0xff] }
 0x108   : > { %v2114_v30 = vpop.eup %2113  ;;  %v1606_v33 = vadd.f32 %v1574_v50, %v2690_v24  ;;  %v994_v59 = vmul.f32 %v962_v20, %v492_v19  ;;  %v946_v22 = vmul.f32 0.5, %v2112_v38  ;;  %v1448_v36 = vmul.f32 0.5, %v1416_v8  ;;  %v1344_v11 = vpop.f32.mrf.mxu3 }
 0x109   : > { %1074 = vst.msk [vmem:[%s2399_s28 + $0xd0] sm:$0xff] %vm1047_vm2, %v1041_v26  ;;  %v1559_v37 = vmul.f32 %v1527_v62, %v492_v19  ;;  %v1511_v39 = vmul.f32 0.5, %v2114_v30  ;;  %2119 = vtanh.f32 %v883_v29  ;;  %v742_v12 = vpop.f32.mrf.mxu0  ;;  %v802_v48 = vmul.f32 %v2701_v46, %v739_v0  ;;  %v446_v26 = vld [vmem:[%s2343_s23 + $0xe8] sm:$0xff] }
 0x10a   : > { %1638 = vst.msk [vmem:[%s2409_s11 + $0xd0] sm:$0xff] %vm1047_vm2, %v1606_v33  ;;  %v1026_v41 = vadd.f32 %v994_v59, %v2732_v28  ;;  %v978_v24 = vadd.f32 0.5, %v946_v22  ;;  %2121 = vtanh.f32 %v1448_v36  ;;  %v493_v19 = vsub.f32 %v429_v35, %v2774_v7  ;;  %v1307_v34 = vpop.f32.mrf.mxu1  ;;  %v2816_v62 = vld [vmem:[%s2349_s26 + $0xe8] sm:$0xff] }
 0x10b   : > { %v1591_v52 = vadd.f32 %v1559_v37, %v2732_v28  ;;  %v1543_v53 = vadd.f32 0.5, %v1511_v39  ;;  %v1367_v25 = vmul.f32 %v2710_v2, %v1304_v40  ;;  %v836_v27 = vadd.f32 %v2717_v18, %v802_v48  ;;  %v430_v40 = vld [vmem:[%s2343_s23 + $0x68] sm:$0xff] }
 0x10c   : > { %v2116_v54 = vpop.eup %2115  ;;  %1059 = vst.msk [vmem:[%s2399_s28 + $0x58] sm:$0xff] %vm1047_vm2, %v1026_v41  ;;  %v1010_v55 = vmul.f32 %v978_v24, %v2754_v63  ;;  %v818_v56 = vmul.f32 %v2701_v46, %v779_v31  ;;  %v1383_v58 = vmul.f32 %v2710_v2, %v1344_v11  ;;  %v509_v32 = vsub.f32 %v445_v47, %v2783_v49 }
 0x10d   : > { %v2118_v60 = vpop.eup %2117  ;;  %1623 = vst.msk [vmem:[%s2409_s11 + $0x58] sm:$0xff] %vm1047_vm2, %v1591_v52  ;;  %v1575_v28 = vmul.f32 %v1543_v53, %v2754_v63  ;;  %v931_v10 = vmul.f32 0.5, %v2116_v54  ;;  %v1401_v21 = vadd.f32 %v2695_v45, %v1367_v25  ;;  %v868_v3 = vmul.f32 0.5, %v836_v27 }
 0x10e   : > { %v1042_v61 = vadd.f32 %v1010_v55, %v2740_v51  ;;  %v1496_v0 = vmul.f32 0.5, %v2118_v60  ;;  %v852_v43 = vadd.f32 %v2717_v18, %v818_v56  ;;  %v1417_v5 = vadd.f32 %v2695_v45, %v1383_v58 }
 0x10f   : > { %v2120_v4 = vpop.eup %2119  ;;  %v1607_v13 = vadd.f32 %v1575_v28, %v2740_v51  ;;  %v963_v42 = vadd.f32 0.5, %v931_v10  ;;  %v1433_v63 = vmul.f32 0.5, %v1401_v21  ;;  %2123 = vtanh.f32 %v868_v3  ;;  %v782_v16 = vpop.f32.mrf.mxu2 }
 0x110   : > { %v2122_v44 = vpop.eup %2121  ;;  %1075 = vst.msk [vmem:[%s2399_s28 + $0xd8] sm:$0xff] %vm1047_vm2, %v1042_v61  ;;  %v1528_v1 = vadd.f32 0.5, %v1496_v0  ;;  %v947_v6 = vmul.f32 0.5, %v2120_v4  ;;  %v884_v23 = vmul.f32 0.5, %v852_v43  ;;  %v1449_v51 = vmul.f32 0.5, %v1417_v5  ;;  %v1347_v57 = vpop.f32.mrf.mxu3  ;;  %v463_v5 = vld [vmem:[%s2349_s26 + $0x70] sm:$0xff] }
 0x111   : > { %1639 = vst.msk [vmem:[%s2409_s11 + $0xd8] sm:$0xff] %vm1047_vm2, %v1607_v13  ;;  %v995_v9 = vmul.f32 %v963_v42, %v493_v19  ;;  %v1512_v14 = vmul.f32 0.5, %v2122_v44  ;;  %2125 = vtanh.f32 %v1433_v63  ;;  %v803_v20 = vmul.f32 %v2701_v46, %v742_v12  ;;  %v744_v31 = vpop.f32.mrf.mxu0  ;;  %v431_v63 = vld [vmem:[%s2343_s23 + $0x70] sm:$0xff] }
 0x112   : > { %v1560_v17 = vmul.f32 %v1528_v1, %v493_v19  ;;  %v979_v50 = vadd.f32 0.5, %v947_v6  ;;  %2127 = vtanh.f32 %v884_v23  ;;  %v1368_v29 = vmul.f32 %v2710_v2, %v1307_v34  ;;  %v1309_v56 = vpop.f32.mrf.mxu1 }
 0x113   : > { %v1027_v8 = vadd.f32 %v995_v9, %v2774_v7  ;;  %v1544_v38 = vadd.f32 0.5, %v1512_v14  ;;  %2129 = vtanh.f32 %v1449_v51  ;;  %v494_v59 = vsub.f32 %v430_v40, %v2810_v15  ;;  %v447_v40 = vld [vmem:[%s2343_s23 + $0xf0] sm:$0xff] }
 0x114   : > { %v1592_v30 = vadd.f32 %v1560_v17, %v2774_v7  ;;  %v1011_v33 = vmul.f32 %v979_v50, %v509_v32  ;;  %v837_v22 = vadd.f32 %v2717_v18, %v803_v20  ;;  %v1402_v36 = vadd.f32 %v2695_v45, %v1368_v29  ;;  %v479_v51 = vld [vmem:[%s2349_s26 + $0xf0] sm:$0xff]  ;;  %v432_v29 = vld [vmem:[%s2343_s23 + $0x78] sm:$0xff] }
 0x115   : > { %1060 = vst.msk [vmem:[%s2399_s28 + $0x60] sm:$0xff] %vm1047_vm2, %v1027_v8  ;;  %v1576_v35 = vmul.f32 %v1544_v38, %v509_v32  ;;  %v819_v11 = vmul.f32 %v2701_v46, %v782_v16  ;;  %v1384_v37 = vmul.f32 %v2710_v2, %v1347_v57  ;;  %v2124_v39 = vpop.eup %2123  ;;  %v510_v12 = vsub.f32 %v446_v26, %v2816_v62 }
 0x116   : > { %1624 = vst.msk [vmem:[%s2409_s11 + $0x60] sm:$0xff] %vm1047_vm2, %v1592_v30  ;;  %v1043_v7 = vadd.f32 %v1011_v33, %v2783_v49  ;;  %v869_v41 = vmul.f32 0.5, %v837_v22  ;;  %v804_v24 = vmul.f32 %v2701_v46, %v744_v31  ;;  %v932_v52 = vmul.f32 0.5, %v2124_v39  ;;  %v464_v31 = vld [vmem:[%s2349_s26 + $0x78] sm:$0xff] }
 0x117   : > { %v2126_v47 = vpop.eup %2125  ;;  %v1608_v48 = vadd.f32 %v1576_v35, %v2783_v49  ;;  %v1434_v53 = vmul.f32 0.5, %v1402_v36  ;;  %v853_v19 = vadd.f32 %v2717_v18, %v819_v11  ;;  %v1418_v55 = vadd.f32 %v2695_v45, %v1384_v37  ;;  %v784_v34 = vpop.f32.mrf.mxu2 }
 0x118   : > { %v2128_v25 = vpop.eup %2127  ;;  %1076 = vst.msk [vmem:[%s2399_s28 + $0xe0] sm:$0xff] %vm1047_vm2, %v1043_v7  ;;  %v1497_v54 = vmul.f32 0.5, %v2126_v47  ;;  %2131 = vtanh.f32 %v869_v41  ;;  %v838_v27 = vadd.f32 %v2717_v18, %v804_v24  ;;  %v964_v60 = vadd.f32 0.5, %v932_v52  ;;  %v1349_v4 = vpop.f32.mrf.mxu3 }
 0x119   : > { %v2130_v58 = vpop.eup %2129  ;;  %1640 = vst.msk [vmem:[%s2409_s11 + $0xe0] sm:$0xff] %vm1047_vm2, %v1608_v48  ;;  %v948_v49 = vmul.f32 0.5, %v2128_v25  ;;  %2133 = vtanh.f32 %v1434_v53  ;;  %v885_v28 = vmul.f32 0.5, %v853_v19  ;;  %v1450_v21 = vmul.f32 0.5, %v1418_v55 }
 0x11a   : > { %v1529_v10 = vadd.f32 0.5, %v1497_v54  ;;  %v1513_v32 = vmul.f32 0.5, %v2130_v58  ;;  %v870_v61 = vmul.f32 0.5, %v838_v27  ;;  %v996_v0 = vmul.f32 %v964_v60, %v494_v59  ;;  %v480_v58 = vld [vmem:[%s2349_s26 + $0xf8] sm:$0xff] }
 0x11b   : > { %v980_v3 = vadd.f32 0.5, %v948_v49  ;;  %2135 = vtanh.f32 %v885_v28  ;;  %v1369_v43 = vmul.f32 %v2710_v2, %v1309_v56  ;;  %v820_v16 = vmul.f32 %v2701_v46, %v784_v34  ;;  %v448_v56 = vld [vmem:[%s2343_s23 + $0xf8] sm:$0xff] }
 0x11c   : > { %v1561_v13 = vmul.f32 %v1529_v10, %v494_v59  ;;  %v1545_v42 = vadd.f32 0.5, %v1513_v32  ;;  %2137 = vtanh.f32 %v1450_v21  ;;  %v1028_v44 = vadd.f32 %v996_v0, %v2810_v15 }
 0x11d   : > { %v1012_v1 = vmul.f32 %v980_v3, %v510_v12  ;;  %2139 = vtanh.f32 %v870_v61  ;;  %v1403_v6 = vadd.f32 %v2695_v45, %v1369_v43  ;;  %v1385_v57 = vmul.f32 %v2710_v2, %v1349_v4 }
 0x11e   : > { %v2132_v23 = vpop.eup %2131  ;;  %v1593_v9 = vadd.f32 %v1561_v13, %v2810_v15  ;;  %v1577_v14 = vmul.f32 %v1545_v42, %v510_v12  ;;  %1061 = vst.msk [vmem:[%s2399_s28 + $0x68] sm:$0xff] %vm1047_vm2, %v1028_v44  ;;  %v495_v20 = vsub.f32 %v431_v63, %v463_v5  ;;  %v854_v46 = vadd.f32 %v2717_v18, %v820_v16 }
 0x11f   : > { %v2134_v17 = vpop.eup %2133  ;;  %v1044_v50 = vadd.f32 %v1012_v1, %v2816_v62  ;;  %v933_v8 = vmul.f32 0.5, %v2132_v23  ;;  %v1435_v38 = vmul.f32 0.5, %v1403_v6  ;;  %v1419_v2 = vadd.f32 %v2695_v45, %v1385_v57 }
 0x120   : > { %1625 = vst.msk [vmem:[%s2409_s11 + $0x68] sm:$0xff] %vm1047_vm2, %v1593_v9  ;;  %v1609_v15 = vadd.f32 %v1577_v14, %v2816_v62  ;;  %v1498_v26 = vmul.f32 0.5, %v2134_v17  ;;  %v511_v59 = vsub.f32 %v447_v40, %v479_v51  ;;  %v886_v11 = vmul.f32 0.5, %v854_v46 }
 0x121   : > { %v2136_v30 = vpop.eup %2135  ;;  %1077 = vst.msk [vmem:[%s2399_s28 + $0xe8] sm:$0xff] %vm1047_vm2, %v1044_v50  ;;  %v965_v33 = vadd.f32 0.5, %v933_v8  ;;  %2141 = vtanh.f32 %v1435_v38  ;;  %v1451_v62 = vmul.f32 0.5, %v1419_v2  ;;  %v496_v7 = vsub.f32 %v432_v29, %v464_v31 }
 0x122   : > { %v2138_v22 = vpop.eup %2137  ;;  %1641 = vst.msk [vmem:[%s2409_s11 + $0xe8] sm:$0xff] %vm1047_vm2, %v1609_v15  ;;  %v1530_v35 = vadd.f32 0.5, %v1498_v26  ;;  %v949_v36 = vmul.f32 0.5, %v2136_v30  ;;  %2143 = vtanh.f32 %v886_v11  ;;  %v512_v21 = vsub.f32 %v448_v56, %v480_v58 }
 0x123   : > { %v2140_v37 = vpop.eup %2139  ;;  %v997_v39 = vmul.f32 %v965_v33, %v495_v20  ;;  %v1514_v18 = vmul.f32 0.5, %v2138_v22  ;;  %2145 = vtanh.f32 %v1451_v62 }
 0x124   : > { %v1562_v45 = vmul.f32 %v1530_v35, %v495_v20  ;;  %v981_v12 = vadd.f32 0.5, %v949_v36  ;;  %v934_v41 = vmul.f32 0.5, %v2140_v37 }
 0x125   : > { %v1029_v24 = vadd.f32 %v997_v39, %v463_v5  ;;  %v1546_v47 = vadd.f32 0.5, %v1514_v18 }
 0x126   : > { %v1594_v48 = vadd.f32 %v1562_v45, %v463_v5  ;;  %v1013_v52 = vmul.f32 %v981_v12, %v511_v59  ;;  %v966_v53 = vadd.f32 0.5, %v934_v41 }
 0x127   : > { %v2142_v19 = vpop.eup %2141  ;;  %1062 = vst.msk [vmem:[%s2399_s28 + $0x70] sm:$0xff] %vm1047_vm2, %v1029_v24  ;;  %v1578_v25 = vmul.f32 %v1546_v47, %v511_v59 }
 0x128   : > { %1626 = vst.msk [vmem:[%s2409_s11 + $0x70] sm:$0xff] %vm1047_vm2, %v1594_v48  ;;  %v1045_v54 = vadd.f32 %v1013_v52, %v479_v51  ;;  %v998_v55 = vmul.f32 %v966_v53, %v496_v7  ;;  %v1499_v27 = vmul.f32 0.5, %v2142_v19  ;;  %v2144_v49 = vpop.eup %2143 }
 0x129   : > { %v1610_v60 = vadd.f32 %v1578_v25, %v479_v51  ;;  %v2146_v32 = vpop.eup %2145  ;;  %v950_v61 = vmul.f32 0.5, %v2144_v49 }
 0x12a   : > { %1078 = vst.msk [vmem:[%s2399_s28 + $0xf0] sm:$0xff] %vm1047_vm2, %v1045_v54  ;;  %v1030_v28 = vadd.f32 %v998_v55, %v464_v31  ;;  %v1531_v10 = vadd.f32 0.5, %v1499_v27  ;;  %v1515_v3 = vmul.f32 0.5, %v2146_v32 }
 0x12b   : > { %1642 = vst.msk [vmem:[%s2409_s11 + $0xf0] sm:$0xff] %vm1047_vm2, %v1610_v60  ;;  %v982_v43 = vadd.f32 0.5, %v950_v61 }
 0x12c   : > { %1063 = vst.msk [vmem:[%s2399_s28 + $0x78] sm:$0xff] %vm1047_vm2, %v1030_v28  ;;  %v1563_v0 = vmul.f32 %v1531_v10, %v496_v7  ;;  %v1547_v4 = vadd.f32 0.5, %v1515_v3 }
 0x12d   : > { %v1014_v13 = vmul.f32 %v982_v43, %v512_v21 }
 0x12e   : > { %v1595_v34 = vadd.f32 %v1563_v0, %v464_v31  ;;  %v1579_v42 = vmul.f32 %v1547_v4, %v512_v21 }
 0x12f   : > { %v1046_v63 = vadd.f32 %v1014_v13, %v480_v58 }
 0x130   : > { %1627 = vst.msk [vmem:[%s2409_s11 + $0x78] sm:$0xff] %vm1047_vm2, %v1595_v34  ;;  %v1611_v5 = vadd.f32 %v1579_v42, %v480_v58 }
 0x131   : > { %1079 = vst.msk [vmem:[%s2399_s28 + $0xf8] sm:$0xff] %vm1047_vm2, %v1046_v63 }
 0x132   : > { %1643 = vst.msk [vmem:[%s2409_s11 + $0xf8] sm:$0xff] %vm1047_vm2, %v1611_v5 }
 0x133 PF: > { %s20_s30 = sadd.s32 1, %s2157_s30  }
 0x134   : > { %p17_p4 = scmp.ge.s32.totalorder %s20_s30, 4  }
 0x136   :  { %19 = sbr.rel (!%p17_p4) target bundleno = 1 (0x1), region = 103 }

</bundles_post_ra>
